<compile_context>
chip_gen: v6e
topology: v6e:2x2x1
jax: 0.10.0
libtpu: 0.0.40
codegen_flags: <defaults>
</compile_context>

<pallas_src>
import jax
import jax.numpy as jnp
from jax import lax
from jax.experimental import pallas as pl
from jax.experimental.pallas import tpu as pltpu

K = 7
PAD = K // 2          # 3
EPS = 1e-6
INV_SQRT2 = 0.7071067811865476


def make_convnext_kernel(H, W, C, Chid, Cout):
    Hp, Wp = H + 2 * PAD, W + 2 * PAD
    # Contiguous span of the padded-flat grid covering every output pixel:
    # output pixel (r, c) lives at range index r*Wp + c.
    L = (H - 1) * Wp + W

    def kernel(x_ref, dw_ref, db_ref, g_ref, b_ref,
               w1t_ref, b1_ref, w2t_ref, b2_ref, o_ref, xp_ref):
        # Re-zero the padded scratch each step (cheap: a few vregs) so the halo
        # reads as 0 and the kernel stays correct if the batch axis is sharded
        # across TensorCores.
        xp_ref[...] = jnp.zeros(xp_ref.shape, xp_ref.dtype)

        # Scatter the lane-dense (C, H*W) input rows into the padded flat grid.
        x = x_ref[0].astype(jnp.float32)                       # (C, H*W)
        for r in range(H):
            dst = (r + PAD) * Wp + PAD
            xp_ref[:, dst:dst + W] = x[:, r * W:(r + 1) * W]

        # Depthwise 7x7 conv: tap (i, j) is the constant flat offset i*Wp + j.
        dw = dw_ref[...].astype(jnp.float32)                   # (C, K*K)
        acc = jnp.zeros((C, L), jnp.float32)
        for i in range(K):
            for j in range(K):
                off = i * Wp + j
                t = i * K + j
                acc = acc + xp_ref[:, off:off + L] * dw[:, t:t + 1]
        acc = acc + db_ref[...].astype(jnp.float32)            # (C, 1)

        # Per-pixel LayerNorm over channels (biased variance, eps = 1e-6):
        # a 4-element cross-sublane reduction (XLU, cheap).
        mu = jnp.mean(acc, axis=0, keepdims=True)              # (1, L)
        var = jnp.mean((acc - mu) ** 2, axis=0, keepdims=True)
        xn = (acc - mu) * lax.rsqrt(var + EPS)
        xn = xn * g_ref[...].astype(jnp.float32) + b_ref[...].astype(jnp.float32)

        # 1x1 conv #1 (C -> 4C) as C broadcast-FMAs over lane-dense slabs.
        w1t = w1t_ref[...].astype(jnp.float32)                 # (Chid, C)
        h = jnp.zeros((Chid, L), jnp.float32)
        for c in range(C):
            h = h + w1t[:, c:c + 1] * xn[c:c + 1, :]
        h = h + b1_ref[...].astype(jnp.float32)                # (Chid, 1)

        # Exact (erf-based) GELU, matching nn.GELU(approximate='none').
        h = 0.5 * h * (1.0 + lax.erf(h * INV_SQRT2))

        # 1x1 conv #2 (4C -> Cout) as Chid broadcast-FMAs.
        w2t = w2t_ref[...].astype(jnp.float32)                 # (Cout, Chid)
        y = jnp.zeros((Cout, L), jnp.float32)
        for k in range(Chid):
            y = y + w2t[:, k:k + 1] * h[k:k + 1, :]
        y = y + b2_ref[...].astype(jnp.float32)                # (Cout, 1)

        # TODO(synk): Dropout2d(p=0.2) treated as identity (eval mode only).

        # Compact the padded-stride columns into the lane-dense (Cout, H*W)
        # output tile; the write-back DMA is then fully contiguous.
        for r in range(H):
            o_ref[0, :, r * W:(r + 1) * W] = (
                y[:, r * Wp:r * Wp + W].astype(o_ref.dtype))

    return kernel, (C, Hp * Wp)


def convnext_block(x_nchw, params):
    dw, db, g, b, w1, b1, w2, b2 = params
    N, C, H, W = x_nchw.shape
    Chid = w1.shape[1]
    Cout = w2.shape[1]
    HW = H * W

    # Free metadata reshape: NCHW with (H, W) flattened -> lane-dense (C, H*W).
    x_flat = x_nchw.reshape(N, C, HW)

    # Tiny, one-off weight re-layouts (channels on sublanes, (C,1)-style biases
    # that broadcast along lanes); negligible next to activation traffic.
    dw_ck = jnp.transpose(dw, (2, 0, 1)).reshape(C, K * K)     # (C, 49)
    db_c = db.reshape(C, 1)
    g_c = g.reshape(C, 1)
    b_c = b.reshape(C, 1)
    w1t = jnp.transpose(w1)                                    # (Chid, C)
    b1_c = b1.reshape(Chid, 1)
    w2t = jnp.transpose(w2)                                    # (Cout, Chid)
    b2_c = b2.reshape(Cout, 1)

    kernel, scratch_shape = make_convnext_kernel(H, W, C, Chid, Cout)

    def full_spec(shape):
        nd = len(shape)
        return pl.BlockSpec(shape, lambda n, _nd=nd: (0,) * _nd)

    out_flat = pl.pallas_call(
        kernel,
        out_shape=jax.ShapeDtypeStruct((N, Cout, HW), x_nchw.dtype),
        grid_spec=pltpu.PrefetchScalarGridSpec(
            num_scalar_prefetch=0,
            grid=(N,),
            in_specs=[
                pl.BlockSpec((1, C, HW), lambda n: (n, 0, 0)),
                full_spec(dw_ck.shape), full_spec(db_c.shape),
                full_spec(g_c.shape), full_spec(b_c.shape),
                full_spec(w1t.shape), full_spec(b1_c.shape),
                full_spec(w2t.shape), full_spec(b2_c.shape),
            ],
            out_specs=pl.BlockSpec((1, Cout, HW), lambda n: (n, 0, 0)),
            scratch_shapes=[pltpu.VMEM(scratch_shape, jnp.float32)],
        ),
        compiler_params=pltpu.CompilerParams(
            dimension_semantics=("parallel",)),
    )(x_flat, dw_ck, db_c, g_c, b_c, w1t, b1_c, w2t, b2_c)

    return out_flat.reshape(N, Cout, H, W)


def reference(x_nchw, params):
    """Pure-JAX reference of the same forward pass (for correctness check)."""
    dw, db, g, b, w1, b1, w2, b2 = params
    x = jnp.transpose(x_nchw, (0, 2, 3, 1))
    xp = jnp.pad(x, ((0, 0), (PAD, PAD), (PAD, PAD), (0, 0)))
    N, Hp, Wp, C = xp.shape
    H, W = Hp - 2 * PAD, Wp - 2 * PAD
    acc = jnp.zeros((N, H, W, C), jnp.float32)
    for i in range(K):
        for j in range(K):
            acc = acc + xp[:, i:i + H, j:j + W, :] * dw[i, j, :]
    acc = acc + db
    mu = acc.mean(-1, keepdims=True)
    var = ((acc - mu) ** 2).mean(-1, keepdims=True)
    xn = (acc - mu) / jnp.sqrt(var + EPS) * g + b
    h = xn @ w1 + b1
    h = 0.5 * h * (1.0 + lax.erf(h * INV_SQRT2))
    y = h @ w2 + b2
    return jnp.transpose(y, (0, 3, 1, 2))


if __name__ == "__main__":
    # small shapes consistent with ConvNextBlock(input_dim=4, output_dim=8)
    N, C, H, W = 2, 4, 16, 16
    Cout = 8
    Chid = 4 * C

    key = jax.random.PRNGKey(0)
    ks = jax.random.split(key, 8)
    dw = 0.1 * jax.random.normal(ks[0], (K, K, C), jnp.float32)       # depthwise
    db = 0.1 * jax.random.normal(ks[1], (C,), jnp.float32)
    g = 1.0 + 0.1 * jax.random.normal(ks[2], (C,), jnp.float32)       # LN weight
    b = 0.1 * jax.random.normal(ks[3], (C,), jnp.float32)             # LN bias
    w1 = 0.1 * jax.random.normal(ks[4], (C, Chid), jnp.float32)       # 1x1 conv1
    b1 = 0.1 * jax.random.normal(ks[5], (Chid,), jnp.float32)
    w2 = 0.1 * jax.random.normal(ks[6], (Chid, Cout), jnp.float32)    # 1x1 conv2
    b2 = 0.1 * jax.random.normal(ks[7], (Cout,), jnp.float32)
    params = (dw, db, g, b, w1, b1, w2, b2)

    x = jax.random.normal(jax.random.PRNGKey(42), (N, C, H, W), jnp.float32)

    y = convnext_block(x, params)
    jax.block_until_ready(y)

    y_ref = reference(x, params)
    assert y.shape == (N, Cout, H, W)
    assert jnp.allclose(y, y_ref, atol=1e-4, rtol=1e-4), "mismatch vs reference"

    print("KERNEL_OK")
</pallas_src>

<mosaic_0001>
module attributes {stable_mosaic.version = 11 : i64} {
  func.func @kernel(%arg0: i32, %arg1: memref<1x4x256xf32, #tpu.memory_space<vmem>>, %arg2: memref<4x49xf32, #tpu.memory_space<vmem>>, %arg3: memref<4x1xf32, #tpu.memory_space<vmem>>, %arg4: memref<4x1xf32, #tpu.memory_space<vmem>>, %arg5: memref<4x1xf32, #tpu.memory_space<vmem>>, %arg6: memref<16x4xf32, #tpu.memory_space<vmem>>, %arg7: memref<16x1xf32, #tpu.memory_space<vmem>>, %arg8: memref<8x16xf32, #tpu.memory_space<vmem>>, %arg9: memref<8x1xf32, #tpu.memory_space<vmem>>, %arg10: memref<1x8x256xf32, #tpu.memory_space<vmem>>, %arg11: memref<4x484xf32, #tpu.memory_space<vmem>>) attributes {dimension_semantics = [#tpu.dimension_semantics<parallel>], iteration_bounds = array<i64: 2>, scalar_prefetch = 0 : i64, scratch_operands = 1 : i64, tpu.core_type = #tpu.core_type<tc>, window_params = [{transform_indices = @transform_0, window_bounds = array<i64: 1, 4, 256>}, {pipeline_mode = #tpu.pipeline_mode<synchronous>, transform_indices = @transform_1, window_bounds = array<i64: 4, 49>}, {pipeline_mode = #tpu.pipeline_mode<synchronous>, transform_indices = @transform_2, window_bounds = array<i64: 4, 1>}, {pipeline_mode = #tpu.pipeline_mode<synchronous>, transform_indices = @transform_3, window_bounds = array<i64: 4, 1>}, {pipeline_mode = #tpu.pipeline_mode<synchronous>, transform_indices = @transform_4, window_bounds = array<i64: 4, 1>}, {pipeline_mode = #tpu.pipeline_mode<synchronous>, transform_indices = @transform_5, window_bounds = array<i64: 16, 4>}, {pipeline_mode = #tpu.pipeline_mode<synchronous>, transform_indices = @transform_6, window_bounds = array<i64: 16, 1>}, {pipeline_mode = #tpu.pipeline_mode<synchronous>, transform_indices = @transform_7, window_bounds = array<i64: 8, 16>}, {pipeline_mode = #tpu.pipeline_mode<synchronous>, transform_indices = @transform_8, window_bounds = array<i64: 8, 1>}, {transform_indices = @transform_9, window_bounds = array<i64: 1, 8, 256>}]} {
    %cst = arith.constant 0.000000e+00 : f32
    %0 = vector.broadcast %cst : f32 to vector<4x484xf32>
    %c0 = arith.constant 0 : index
    %c0_0 = arith.constant 0 : index
    %1 = vector.load %arg11[%c0, %c0_0] : memref<4x484xf32, #tpu.memory_space<vmem>>, vector<4x484xf32>
    tpu.vector_store %arg11[%c0, %c0_0], %0 {strides = array<i32>} : memref<4x484xf32, #tpu.memory_space<vmem>>, vector<4x484xf32>,
    %c0_1 = arith.constant 0 : index
    %c0_2 = arith.constant 0 : index
    %c0_3 = arith.constant 0 : index
    %2 = vector.load %arg1[%c0_1, %c0_2, %c0_3] : memref<1x4x256xf32, #tpu.memory_space<vmem>>, vector<1x4x256xf32>
    %3 = vector.shape_cast %2 : vector<1x4x256xf32> to vector<4x256xf32>
    %4 = vector.extract_strided_slice %3 {offsets = [0, 0], sizes = [4, 16], strides = [1, 1]} : vector<4x256xf32> to vector<4x16xf32>
    %c0_4 = arith.constant 0 : index
    %c69 = arith.constant 69 : index
    %5 = vector.load %arg11[%c0_4, %c69] : memref<4x484xf32, #tpu.memory_space<vmem>>, vector<4x16xf32>
    tpu.vector_store %arg11[%c0_4, %c69], %4 {strides = array<i32>} : memref<4x484xf32, #tpu.memory_space<vmem>>, vector<4x16xf32>,
    %6 = vector.extract_strided_slice %3 {offsets = [0, 16], sizes = [4, 16], strides = [1, 1]} : vector<4x256xf32> to vector<4x16xf32>
    %c0_5 = arith.constant 0 : index
    %c91 = arith.constant 91 : index
    %7 = vector.load %arg11[%c0_5, %c91] : memref<4x484xf32, #tpu.memory_space<vmem>>, vector<4x16xf32>
    tpu.vector_store %arg11[%c0_5, %c91], %6 {strides = array<i32>} : memref<4x484xf32, #tpu.memory_space<vmem>>, vector<4x16xf32>,
    %8 = vector.extract_strided_slice %3 {offsets = [0, 32], sizes = [4, 16], strides = [1, 1]} : vector<4x256xf32> to vector<4x16xf32>
    %c0_6 = arith.constant 0 : index
    %c113 = arith.constant 113 : index
    %9 = vector.load %arg11[%c0_6, %c113] : memref<4x484xf32, #tpu.memory_space<vmem>>, vector<4x16xf32>
    tpu.vector_store %arg11[%c0_6, %c113], %8 {strides = array<i32>} : memref<4x484xf32, #tpu.memory_space<vmem>>, vector<4x16xf32>,
    %10 = vector.extract_strided_slice %3 {offsets = [0, 48], sizes = [4, 16], strides = [1, 1]} : vector<4x256xf32> to vector<4x16xf32>
    %c0_7 = arith.constant 0 : index
    %c135 = arith.constant 135 : index
    %11 = vector.load %arg11[%c0_7, %c135] : memref<4x484xf32, #tpu.memory_space<vmem>>, vector<4x16xf32>
    tpu.vector_store %arg11[%c0_7, %c135], %10 {strides = array<i32>} : memref<4x484xf32, #tpu.memory_space<vmem>>, vector<4x16xf32>,
    %12 = vector.extract_strided_slice %3 {offsets = [0, 64], sizes = [4, 16], strides = [1, 1]} : vector<4x256xf32> to vector<4x16xf32>
    %c0_8 = arith.constant 0 : index
    %c157 = arith.constant 157 : index
    %13 = vector.load %arg11[%c0_8, %c157] : memref<4x484xf32, #tpu.memory_space<vmem>>, vector<4x16xf32>
    tpu.vector_store %arg11[%c0_8, %c157], %12 {strides = array<i32>} : memref<4x484xf32, #tpu.memory_space<vmem>>, vector<4x16xf32>,
    %14 = vector.extract_strided_slice %3 {offsets = [0, 80], sizes = [4, 16], strides = [1, 1]} : vector<4x256xf32> to vector<4x16xf32>
    %c0_9 = arith.constant 0 : index
    %c179 = arith.constant 179 : index
    %15 = vector.load %arg11[%c0_9, %c179] : memref<4x484xf32, #tpu.memory_space<vmem>>, vector<4x16xf32>
    tpu.vector_store %arg11[%c0_9, %c179], %14 {strides = array<i32>} : memref<4x484xf32, #tpu.memory_space<vmem>>, vector<4x16xf32>,
    %16 = vector.extract_strided_slice %3 {offsets = [0, 96], sizes = [4, 16], strides = [1, 1]} : vector<4x256xf32> to vector<4x16xf32>
    %c0_10 = arith.constant 0 : index
    %c201 = arith.constant 201 : index
    %17 = vector.load %arg11[%c0_10, %c201] : memref<4x484xf32, #tpu.memory_space<vmem>>, vector<4x16xf32>
    tpu.vector_store %arg11[%c0_10, %c201], %16 {strides = array<i32>} : memref<4x484xf32, #tpu.memory_space<vmem>>, vector<4x16xf32>,
    %18 = vector.extract_strided_slice %3 {offsets = [0, 112], sizes = [4, 16], strides = [1, 1]} : vector<4x256xf32> to vector<4x16xf32>
    %c0_11 = arith.constant 0 : index
    %c223 = arith.constant 223 : index
    %19 = vector.load %arg11[%c0_11, %c223] : memref<4x484xf32, #tpu.memory_space<vmem>>, vector<4x16xf32>
    tpu.vector_store %arg11[%c0_11, %c223], %18 {strides = array<i32>} : memref<4x484xf32, #tpu.memory_space<vmem>>, vector<4x16xf32>,
    %20 = vector.extract_strided_slice %3 {offsets = [0, 128], sizes = [4, 16], strides = [1, 1]} : vector<4x256xf32> to vector<4x16xf32>
    %c0_12 = arith.constant 0 : index
    %c245 = arith.constant 245 : index
    %21 = vector.load %arg11[%c0_12, %c245] : memref<4x484xf32, #tpu.memory_space<vmem>>, vector<4x16xf32>
    tpu.vector_store %arg11[%c0_12, %c245], %20 {strides = array<i32>} : memref<4x484xf32, #tpu.memory_space<vmem>>, vector<4x16xf32>,
    %22 = vector.extract_strided_slice %3 {offsets = [0, 144], sizes = [4, 16], strides = [1, 1]} : vector<4x256xf32> to vector<4x16xf32>
    %c0_13 = arith.constant 0 : index
    %c267 = arith.constant 267 : index
    %23 = vector.load %arg11[%c0_13, %c267] : memref<4x484xf32, #tpu.memory_space<vmem>>, vector<4x16xf32>
    tpu.vector_store %arg11[%c0_13, %c267], %22 {strides = array<i32>} : memref<4x484xf32, #tpu.memory_space<vmem>>, vector<4x16xf32>,
    %24 = vector.extract_strided_slice %3 {offsets = [0, 160], sizes = [4, 16], strides = [1, 1]} : vector<4x256xf32> to vector<4x16xf32>
    %c0_14 = arith.constant 0 : index
    %c289 = arith.constant 289 : index
    %25 = vector.load %arg11[%c0_14, %c289] : memref<4x484xf32, #tpu.memory_space<vmem>>, vector<4x16xf32>
    tpu.vector_store %arg11[%c0_14, %c289], %24 {strides = array<i32>} : memref<4x484xf32, #tpu.memory_space<vmem>>, vector<4x16xf32>,
    %26 = vector.extract_strided_slice %3 {offsets = [0, 176], sizes = [4, 16], strides = [1, 1]} : vector<4x256xf32> to vector<4x16xf32>
    %c0_15 = arith.constant 0 : index
    %c311 = arith.constant 311 : index
    %27 = vector.load %arg11[%c0_15, %c311] : memref<4x484xf32, #tpu.memory_space<vmem>>, vector<4x16xf32>
    tpu.vector_store %arg11[%c0_15, %c311], %26 {strides = array<i32>} : memref<4x484xf32, #tpu.memory_space<vmem>>, vector<4x16xf32>,
    %28 = vector.extract_strided_slice %3 {offsets = [0, 192], sizes = [4, 16], strides = [1, 1]} : vector<4x256xf32> to vector<4x16xf32>
    %c0_16 = arith.constant 0 : index
    %c333 = arith.constant 333 : index
    %29 = vector.load %arg11[%c0_16, %c333] : memref<4x484xf32, #tpu.memory_space<vmem>>, vector<4x16xf32>
    tpu.vector_store %arg11[%c0_16, %c333], %28 {strides = array<i32>} : memref<4x484xf32, #tpu.memory_space<vmem>>, vector<4x16xf32>,
    %30 = vector.extract_strided_slice %3 {offsets = [0, 208], sizes = [4, 16], strides = [1, 1]} : vector<4x256xf32> to vector<4x16xf32>
    %c0_17 = arith.constant 0 : index
    %c355 = arith.constant 355 : index
    %31 = vector.load %arg11[%c0_17, %c355] : memref<4x484xf32, #tpu.memory_space<vmem>>, vector<4x16xf32>
    tpu.vector_store %arg11[%c0_17, %c355], %30 {strides = array<i32>} : memref<4x484xf32, #tpu.memory_space<vmem>>, vector<4x16xf32>,
    %32 = vector.extract_strided_slice %3 {offsets = [0, 224], sizes = [4, 16], strides = [1, 1]} : vector<4x256xf32> to vector<4x16xf32>
    %c0_18 = arith.constant 0 : index
    %c377 = arith.constant 377 : index
    %33 = vector.load %arg11[%c0_18, %c377] : memref<4x484xf32, #tpu.memory_space<vmem>>, vector<4x16xf32>
    tpu.vector_store %arg11[%c0_18, %c377], %32 {strides = array<i32>} : memref<4x484xf32, #tpu.memory_space<vmem>>, vector<4x16xf32>,
    %34 = vector.extract_strided_slice %3 {offsets = [0, 240], sizes = [4, 16], strides = [1, 1]} : vector<4x256xf32> to vector<4x16xf32>
    %c0_19 = arith.constant 0 : index
    %c399 = arith.constant 399 : index
    %35 = vector.load %arg11[%c0_19, %c399] : memref<4x484xf32, #tpu.memory_space<vmem>>, vector<4x16xf32>
    tpu.vector_store %arg11[%c0_19, %c399], %34 {strides = array<i32>} : memref<4x484xf32, #tpu.memory_space<vmem>>, vector<4x16xf32>,
    %c0_20 = arith.constant 0 : index
    %c0_21 = arith.constant 0 : index
    %36 = vector.load %arg2[%c0_20, %c0_21] : memref<4x49xf32, #tpu.memory_space<vmem>>, vector<4x49xf32>
    %cst_22 = arith.constant 0.000000e+00 : f32
    %37 = vector.broadcast %cst_22 : f32 to vector<4x346xf32>
    %c0_23 = arith.constant 0 : index
    %c0_24 = arith.constant 0 : index
    %38 = vector.load %arg11[%c0_23, %c0_24] : memref<4x484xf32, #tpu.memory_space<vmem>>, vector<4x346xf32>
    %39 = vector.extract_strided_slice %36 {offsets = [0, 0], sizes = [4, 1], strides = [1, 1]} : vector<4x49xf32> to vector<4x1xf32>
    %40 = vector.broadcast %39 : vector<4x1xf32> to vector<4x346xf32>
    %41 = arith.mulf %38, %40 : vector<4x346xf32>
    %42 = arith.addf %37, %41 : vector<4x346xf32>
    %c0_25 = arith.constant 0 : index
    %c1 = arith.constant 1 : index
    %43 = vector.load %arg11[%c0_25, %c1] : memref<4x484xf32, #tpu.memory_space<vmem>>, vector<4x346xf32>
    %44 = vector.extract_strided_slice %36 {offsets = [0, 1], sizes = [4, 1], strides = [1, 1]} : vector<4x49xf32> to vector<4x1xf32>
    %45 = vector.broadcast %44 : vector<4x1xf32> to vector<4x346xf32>
    %46 = arith.mulf %43, %45 : vector<4x346xf32>
    %47 = arith.addf %42, %46 : vector<4x346xf32>
    %c0_26 = arith.constant 0 : index
    %c2 = arith.constant 2 : index
    %48 = vector.load %arg11[%c0_26, %c2] : memref<4x484xf32, #tpu.memory_space<vmem>>, vector<4x346xf32>
    %49 = vector.extract_strided_slice %36 {offsets = [0, 2], sizes = [4, 1], strides = [1, 1]} : vector<4x49xf32> to vector<4x1xf32>
    %50 = vector.broadcast %49 : vector<4x1xf32> to vector<4x346xf32>
    %51 = arith.mulf %48, %50 : vector<4x346xf32>
    %52 = arith.addf %47, %51 : vector<4x346xf32>
    %c0_27 = arith.constant 0 : index
    %c3 = arith.constant 3 : index
    %53 = vector.load %arg11[%c0_27, %c3] : memref<4x484xf32, #tpu.memory_space<vmem>>, vector<4x346xf32>
    %54 = vector.extract_strided_slice %36 {offsets = [0, 3], sizes = [4, 1], strides = [1, 1]} : vector<4x49xf32> to vector<4x1xf32>
    %55 = vector.broadcast %54 : vector<4x1xf32> to vector<4x346xf32>
    %56 = arith.mulf %53, %55 : vector<4x346xf32>
    %57 = arith.addf %52, %56 : vector<4x346xf32>
    %c0_28 = arith.constant 0 : index
    %c4 = arith.constant 4 : index
    %58 = vector.load %arg11[%c0_28, %c4] : memref<4x484xf32, #tpu.memory_space<vmem>>, vector<4x346xf32>
    %59 = vector.extract_strided_slice %36 {offsets = [0, 4], sizes = [4, 1], strides = [1, 1]} : vector<4x49xf32> to vector<4x1xf32>
    %60 = vector.broadcast %59 : vector<4x1xf32> to vector<4x346xf32>
    %61 = arith.mulf %58, %60 : vector<4x346xf32>
    %62 = arith.addf %57, %61 : vector<4x346xf32>
    %c0_29 = arith.constant 0 : index
    %c5 = arith.constant 5 : index
    %63 = vector.load %arg11[%c0_29, %c5] : memref<4x484xf32, #tpu.memory_space<vmem>>, vector<4x346xf32>
    %64 = vector.extract_strided_slice %36 {offsets = [0, 5], sizes = [4, 1], strides = [1, 1]} : vector<4x49xf32> to vector<4x1xf32>
    %65 = vector.broadcast %64 : vector<4x1xf32> to vector<4x346xf32>
    %66 = arith.mulf %63, %65 : vector<4x346xf32>
    %67 = arith.addf %62, %66 : vector<4x346xf32>
    %c0_30 = arith.constant 0 : index
    %c6 = arith.constant 6 : index
    %68 = vector.load %arg11[%c0_30, %c6] : memref<4x484xf32, #tpu.memory_space<vmem>>, vector<4x346xf32>
    %69 = vector.extract_strided_slice %36 {offsets = [0, 6], sizes = [4, 1], strides = [1, 1]} : vector<4x49xf32> to vector<4x1xf32>
    %70 = vector.broadcast %69 : vector<4x1xf32> to vector<4x346xf32>
    %71 = arith.mulf %68, %70 : vector<4x346xf32>
    %72 = arith.addf %67, %71 : vector<4x346xf32>
    %c0_31 = arith.constant 0 : index
    %c22 = arith.constant 22 : index
    %73 = vector.load %arg11[%c0_31, %c22] : memref<4x484xf32, #tpu.memory_space<vmem>>, vector<4x346xf32>
    %74 = vector.extract_strided_slice %36 {offsets = [0, 7], sizes = [4, 1], strides = [1, 1]} : vector<4x49xf32> to vector<4x1xf32>
    %75 = vector.broadcast %74 : vector<4x1xf32> to vector<4x346xf32>
    %76 = arith.mulf %73, %75 : vector<4x346xf32>
    %77 = arith.addf %72, %76 : vector<4x346xf32>
    %c0_32 = arith.constant 0 : index
    %c23 = arith.constant 23 : index
    %78 = vector.load %arg11[%c0_32, %c23] : memref<4x484xf32, #tpu.memory_space<vmem>>, vector<4x346xf32>
    %79 = vector.extract_strided_slice %36 {offsets = [0, 8], sizes = [4, 1], strides = [1, 1]} : vector<4x49xf32> to vector<4x1xf32>
    %80 = vector.broadcast %79 : vector<4x1xf32> to vector<4x346xf32>
    %81 = arith.mulf %78, %80 : vector<4x346xf32>
    %82 = arith.addf %77, %81 : vector<4x346xf32>
    %c0_33 = arith.constant 0 : index
    %c24 = arith.constant 24 : index
    %83 = vector.load %arg11[%c0_33, %c24] : memref<4x484xf32, #tpu.memory_space<vmem>>, vector<4x346xf32>
    %84 = vector.extract_strided_slice %36 {offsets = [0, 9], sizes = [4, 1], strides = [1, 1]} : vector<4x49xf32> to vector<4x1xf32>
    %85 = vector.broadcast %84 : vector<4x1xf32> to vector<4x346xf32>
    %86 = arith.mulf %83, %85 : vector<4x346xf32>
    %87 = arith.addf %82, %86 : vector<4x346xf32>
    %c0_34 = arith.constant 0 : index
    %c25 = arith.constant 25 : index
    %88 = vector.load %arg11[%c0_34, %c25] : memref<4x484xf32, #tpu.memory_space<vmem>>, vector<4x346xf32>
    %89 = vector.extract_strided_slice %36 {offsets = [0, 10], sizes = [4, 1], strides = [1, 1]} : vector<4x49xf32> to vector<4x1xf32>
    %90 = vector.broadcast %89 : vector<4x1xf32> to vector<4x346xf32>
    %91 = arith.mulf %88, %90 : vector<4x346xf32>
    %92 = arith.addf %87, %91 : vector<4x346xf32>
    %c0_35 = arith.constant 0 : index
    %c26 = arith.constant 26 : index
    %93 = vector.load %arg11[%c0_35, %c26] : memref<4x484xf32, #tpu.memory_space<vmem>>, vector<4x346xf32>
    %94 = vector.extract_strided_slice %36 {offsets = [0, 11], sizes = [4, 1], strides = [1, 1]} : vector<4x49xf32> to vector<4x1xf32>
    %95 = vector.broadcast %94 : vector<4x1xf32> to vector<4x346xf32>
    %96 = arith.mulf %93, %95 : vector<4x346xf32>
    %97 = arith.addf %92, %96 : vector<4x346xf32>
    %c0_36 = arith.constant 0 : index
    %c27 = arith.constant 27 : index
    %98 = vector.load %arg11[%c0_36, %c27] : memref<4x484xf32, #tpu.memory_space<vmem>>, vector<4x346xf32>
    %99 = vector.extract_strided_slice %36 {offsets = [0, 12], sizes = [4, 1], strides = [1, 1]} : vector<4x49xf32> to vector<4x1xf32>
    %100 = vector.broadcast %99 : vector<4x1xf32> to vector<4x346xf32>
    %101 = arith.mulf %98, %100 : vector<4x346xf32>
    %102 = arith.addf %97, %101 : vector<4x346xf32>
    %c0_37 = arith.constant 0 : index
    %c28 = arith.constant 28 : index
    %103 = vector.load %arg11[%c0_37, %c28] : memref<4x484xf32, #tpu.memory_space<vmem>>, vector<4x346xf32>
    %104 = vector.extract_strided_slice %36 {offsets = [0, 13], sizes = [4, 1], strides = [1, 1]} : vector<4x49xf32> to vector<4x1xf32>
    %105 = vector.broadcast %104 : vector<4x1xf32> to vector<4x346xf32>
    %106 = arith.mulf %103, %105 : vector<4x346xf32>
    %107 = arith.addf %102, %106 : vector<4x346xf32>
    %c0_38 = arith.constant 0 : index
    %c44 = arith.constant 44 : index
    %108 = vector.load %arg11[%c0_38, %c44] : memref<4x484xf32, #tpu.memory_space<vmem>>, vector<4x346xf32>
    %109 = vector.extract_strided_slice %36 {offsets = [0, 14], sizes = [4, 1], strides = [1, 1]} : vector<4x49xf32> to vector<4x1xf32>
    %110 = vector.broadcast %109 : vector<4x1xf32> to vector<4x346xf32>
    %111 = arith.mulf %108, %110 : vector<4x346xf32>
    %112 = arith.addf %107, %111 : vector<4x346xf32>
    %c0_39 = arith.constant 0 : index
    %c45 = arith.constant 45 : index
    %113 = vector.load %arg11[%c0_39, %c45] : memref<4x484xf32, #tpu.memory_space<vmem>>, vector<4x346xf32>
    %114 = vector.extract_strided_slice %36 {offsets = [0, 15], sizes = [4, 1], strides = [1, 1]} : vector<4x49xf32> to vector<4x1xf32>
    %115 = vector.broadcast %114 : vector<4x1xf32> to vector<4x346xf32>
    %116 = arith.mulf %113, %115 : vector<4x346xf32>
    %117 = arith.addf %112, %116 : vector<4x346xf32>
    %c0_40 = arith.constant 0 : index
    %c46 = arith.constant 46 : index
    %118 = vector.load %arg11[%c0_40, %c46] : memref<4x484xf32, #tpu.memory_space<vmem>>, vector<4x346xf32>
    %119 = vector.extract_strided_slice %36 {offsets = [0, 16], sizes = [4, 1], strides = [1, 1]} : vector<4x49xf32> to vector<4x1xf32>
    %120 = vector.broadcast %119 : vector<4x1xf32> to vector<4x346xf32>
    %121 = arith.mulf %118, %120 : vector<4x346xf32>
    %122 = arith.addf %117, %121 : vector<4x346xf32>
    %c0_41 = arith.constant 0 : index
    %c47 = arith.constant 47 : index
    %123 = vector.load %arg11[%c0_41, %c47] : memref<4x484xf32, #tpu.memory_space<vmem>>, vector<4x346xf32>
    %124 = vector.extract_strided_slice %36 {offsets = [0, 17], sizes = [4, 1], strides = [1, 1]} : vector<4x49xf32> to vector<4x1xf32>
    %125 = vector.broadcast %124 : vector<4x1xf32> to vector<4x346xf32>
    %126 = arith.mulf %123, %125 : vector<4x346xf32>
    %127 = arith.addf %122, %126 : vector<4x346xf32>
    %c0_42 = arith.constant 0 : index
    %c48 = arith.constant 48 : index
    %128 = vector.load %arg11[%c0_42, %c48] : memref<4x484xf32, #tpu.memory_space<vmem>>, vector<4x346xf32>
    %129 = vector.extract_strided_slice %36 {offsets = [0, 18], sizes = [4, 1], strides = [1, 1]} : vector<4x49xf32> to vector<4x1xf32>
    %130 = vector.broadcast %129 : vector<4x1xf32> to vector<4x346xf32>
    %131 = arith.mulf %128, %130 : vector<4x346xf32>
    %132 = arith.addf %127, %131 : vector<4x346xf32>
    %c0_43 = arith.constant 0 : index
    %c49 = arith.constant 49 : index
    %133 = vector.load %arg11[%c0_43, %c49] : memref<4x484xf32, #tpu.memory_space<vmem>>, vector<4x346xf32>
    %134 = vector.extract_strided_slice %36 {offsets = [0, 19], sizes = [4, 1], strides = [1, 1]} : vector<4x49xf32> to vector<4x1xf32>
    %135 = vector.broadcast %134 : vector<4x1xf32> to vector<4x346xf32>
    %136 = arith.mulf %133, %135 : vector<4x346xf32>
    %137 = arith.addf %132, %136 : vector<4x346xf32>
    %c0_44 = arith.constant 0 : index
    %c50 = arith.constant 50 : index
    %138 = vector.load %arg11[%c0_44, %c50] : memref<4x484xf32, #tpu.memory_space<vmem>>, vector<4x346xf32>
    %139 = vector.extract_strided_slice %36 {offsets = [0, 20], sizes = [4, 1], strides = [1, 1]} : vector<4x49xf32> to vector<4x1xf32>
    %140 = vector.broadcast %139 : vector<4x1xf32> to vector<4x346xf32>
    %141 = arith.mulf %138, %140 : vector<4x346xf32>
    %142 = arith.addf %137, %141 : vector<4x346xf32>
    %c0_45 = arith.constant 0 : index
    %c66 = arith.constant 66 : index
    %143 = vector.load %arg11[%c0_45, %c66] : memref<4x484xf32, #tpu.memory_space<vmem>>, vector<4x346xf32>
    %144 = vector.extract_strided_slice %36 {offsets = [0, 21], sizes = [4, 1], strides = [1, 1]} : vector<4x49xf32> to vector<4x1xf32>
    %145 = vector.broadcast %144 : vector<4x1xf32> to vector<4x346xf32>
    %146 = arith.mulf %143, %145 : vector<4x346xf32>
    %147 = arith.addf %142, %146 : vector<4x346xf32>
    %c0_46 = arith.constant 0 : index
    %c67 = arith.constant 67 : index
    %148 = vector.load %arg11[%c0_46, %c67] : memref<4x484xf32, #tpu.memory_space<vmem>>, vector<4x346xf32>
    %149 = vector.extract_strided_slice %36 {offsets = [0, 22], sizes = [4, 1], strides = [1, 1]} : vector<4x49xf32> to vector<4x1xf32>
    %150 = vector.broadcast %149 : vector<4x1xf32> to vector<4x346xf32>
    %151 = arith.mulf %148, %150 : vector<4x346xf32>
    %152 = arith.addf %147, %151 : vector<4x346xf32>
    %c0_47 = arith.constant 0 : index
    %c68 = arith.constant 68 : index
    %153 = vector.load %arg11[%c0_47, %c68] : memref<4x484xf32, #tpu.memory_space<vmem>>, vector<4x346xf32>
    %154 = vector.extract_strided_slice %36 {offsets = [0, 23], sizes = [4, 1], strides = [1, 1]} : vector<4x49xf32> to vector<4x1xf32>
    %155 = vector.broadcast %154 : vector<4x1xf32> to vector<4x346xf32>
    %156 = arith.mulf %153, %155 : vector<4x346xf32>
    %157 = arith.addf %152, %156 : vector<4x346xf32>
    %c0_48 = arith.constant 0 : index
    %c69_49 = arith.constant 69 : index
    %158 = vector.load %arg11[%c0_48, %c69_49] : memref<4x484xf32, #tpu.memory_space<vmem>>, vector<4x346xf32>
    %159 = vector.extract_strided_slice %36 {offsets = [0, 24], sizes = [4, 1], strides = [1, 1]} : vector<4x49xf32> to vector<4x1xf32>
    %160 = vector.broadcast %159 : vector<4x1xf32> to vector<4x346xf32>
    %161 = arith.mulf %158, %160 : vector<4x346xf32>
    %162 = arith.addf %157, %161 : vector<4x346xf32>
    %c0_50 = arith.constant 0 : index
    %c70 = arith.constant 70 : index
    %163 = vector.load %arg11[%c0_50, %c70] : memref<4x484xf32, #tpu.memory_space<vmem>>, vector<4x346xf32>
    %164 = vector.extract_strided_slice %36 {offsets = [0, 25], sizes = [4, 1], strides = [1, 1]} : vector<4x49xf32> to vector<4x1xf32>
    %165 = vector.broadcast %164 : vector<4x1xf32> to vector<4x346xf32>
    %166 = arith.mulf %163, %165 : vector<4x346xf32>
    %167 = arith.addf %162, %166 : vector<4x346xf32>
    %c0_51 = arith.constant 0 : index
    %c71 = arith.constant 71 : index
    %168 = vector.load %arg11[%c0_51, %c71] : memref<4x484xf32, #tpu.memory_space<vmem>>, vector<4x346xf32>
    %169 = vector.extract_strided_slice %36 {offsets = [0, 26], sizes = [4, 1], strides = [1, 1]} : vector<4x49xf32> to vector<4x1xf32>
    %170 = vector.broadcast %169 : vector<4x1xf32> to vector<4x346xf32>
    %171 = arith.mulf %168, %170 : vector<4x346xf32>
    %172 = arith.addf %167, %171 : vector<4x346xf32>
    %c0_52 = arith.constant 0 : index
    %c72 = arith.constant 72 : index
    %173 = vector.load %arg11[%c0_52, %c72] : memref<4x484xf32, #tpu.memory_space<vmem>>, vector<4x346xf32>
    %174 = vector.extract_strided_slice %36 {offsets = [0, 27], sizes = [4, 1], strides = [1, 1]} : vector<4x49xf32> to vector<4x1xf32>
    %175 = vector.broadcast %174 : vector<4x1xf32> to vector<4x346xf32>
    %176 = arith.mulf %173, %175 : vector<4x346xf32>
    %177 = arith.addf %172, %176 : vector<4x346xf32>
    %c0_53 = arith.constant 0 : index
    %c88 = arith.constant 88 : index
    %178 = vector.load %arg11[%c0_53, %c88] : memref<4x484xf32, #tpu.memory_space<vmem>>, vector<4x346xf32>
    %179 = vector.extract_strided_slice %36 {offsets = [0, 28], sizes = [4, 1], strides = [1, 1]} : vector<4x49xf32> to vector<4x1xf32>
    %180 = vector.broadcast %179 : vector<4x1xf32> to vector<4x346xf32>
    %181 = arith.mulf %178, %180 : vector<4x346xf32>
    %182 = arith.addf %177, %181 : vector<4x346xf32>
    %c0_54 = arith.constant 0 : index
    %c89 = arith.constant 89 : index
    %183 = vector.load %arg11[%c0_54, %c89] : memref<4x484xf32, #tpu.memory_space<vmem>>, vector<4x346xf32>
    %184 = vector.extract_strided_slice %36 {offsets = [0, 29], sizes = [4, 1], strides = [1, 1]} : vector<4x49xf32> to vector<4x1xf32>
    %185 = vector.broadcast %184 : vector<4x1xf32> to vector<4x346xf32>
    %186 = arith.mulf %183, %185 : vector<4x346xf32>
    %187 = arith.addf %182, %186 : vector<4x346xf32>
    %c0_55 = arith.constant 0 : index
    %c90 = arith.constant 90 : index
    %188 = vector.load %arg11[%c0_55, %c90] : memref<4x484xf32, #tpu.memory_space<vmem>>, vector<4x346xf32>
    %189 = vector.extract_strided_slice %36 {offsets = [0, 30], sizes = [4, 1], strides = [1, 1]} : vector<4x49xf32> to vector<4x1xf32>
    %190 = vector.broadcast %189 : vector<4x1xf32> to vector<4x346xf32>
    %191 = arith.mulf %188, %190 : vector<4x346xf32>
    %192 = arith.addf %187, %191 : vector<4x346xf32>
    %c0_56 = arith.constant 0 : index
    %c91_57 = arith.constant 91 : index
    %193 = vector.load %arg11[%c0_56, %c91_57] : memref<4x484xf32, #tpu.memory_space<vmem>>, vector<4x346xf32>
    %194 = vector.extract_strided_slice %36 {offsets = [0, 31], sizes = [4, 1], strides = [1, 1]} : vector<4x49xf32> to vector<4x1xf32>
    %195 = vector.broadcast %194 : vector<4x1xf32> to vector<4x346xf32>
    %196 = arith.mulf %193, %195 : vector<4x346xf32>
    %197 = arith.addf %192, %196 : vector<4x346xf32>
    %c0_58 = arith.constant 0 : index
    %c92 = arith.constant 92 : index
    %198 = vector.load %arg11[%c0_58, %c92] : memref<4x484xf32, #tpu.memory_space<vmem>>, vector<4x346xf32>
    %199 = vector.extract_strided_slice %36 {offsets = [0, 32], sizes = [4, 1], strides = [1, 1]} : vector<4x49xf32> to vector<4x1xf32>
    %200 = vector.broadcast %199 : vector<4x1xf32> to vector<4x346xf32>
    %201 = arith.mulf %198, %200 : vector<4x346xf32>
    %202 = arith.addf %197, %201 : vector<4x346xf32>
    %c0_59 = arith.constant 0 : index
    %c93 = arith.constant 93 : index
    %203 = vector.load %arg11[%c0_59, %c93] : memref<4x484xf32, #tpu.memory_space<vmem>>, vector<4x346xf32>
    %204 = vector.extract_strided_slice %36 {offsets = [0, 33], sizes = [4, 1], strides = [1, 1]} : vector<4x49xf32> to vector<4x1xf32>
    %205 = vector.broadcast %204 : vector<4x1xf32> to vector<4x346xf32>
    %206 = arith.mulf %203, %205 : vector<4x346xf32>
    %207 = arith.addf %202, %206 : vector<4x346xf32>
    %c0_60 = arith.constant 0 : index
    %c94 = arith.constant 94 : index
    %208 = vector.load %arg11[%c0_60, %c94] : memref<4x484xf32, #tpu.memory_space<vmem>>, vector<4x346xf32>
    %209 = vector.extract_strided_slice %36 {offsets = [0, 34], sizes = [4, 1], strides = [1, 1]} : vector<4x49xf32> to vector<4x1xf32>
    %210 = vector.broadcast %209 : vector<4x1xf32> to vector<4x346xf32>
    %211 = arith.mulf %208, %210 : vector<4x346xf32>
    %212 = arith.addf %207, %211 : vector<4x346xf32>
    %c0_61 = arith.constant 0 : index
    %c110 = arith.constant 110 : index
    %213 = vector.load %arg11[%c0_61, %c110] : memref<4x484xf32, #tpu.memory_space<vmem>>, vector<4x346xf32>
    %214 = vector.extract_strided_slice %36 {offsets = [0, 35], sizes = [4, 1], strides = [1, 1]} : vector<4x49xf32> to vector<4x1xf32>
    %215 = vector.broadcast %214 : vector<4x1xf32> to vector<4x346xf32>
    %216 = arith.mulf %213, %215 : vector<4x346xf32>
    %217 = arith.addf %212, %216 : vector<4x346xf32>
    %c0_62 = arith.constant 0 : index
    %c111 = arith.constant 111 : index
    %218 = vector.load %arg11[%c0_62, %c111] : memref<4x484xf32, #tpu.memory_space<vmem>>, vector<4x346xf32>
    %219 = vector.extract_strided_slice %36 {offsets = [0, 36], sizes = [4, 1], strides = [1, 1]} : vector<4x49xf32> to vector<4x1xf32>
    %220 = vector.broadcast %219 : vector<4x1xf32> to vector<4x346xf32>
    %221 = arith.mulf %218, %220 : vector<4x346xf32>
    %222 = arith.addf %217, %221 : vector<4x346xf32>
    %c0_63 = arith.constant 0 : index
    %c112 = arith.constant 112 : index
    %223 = vector.load %arg11[%c0_63, %c112] : memref<4x484xf32, #tpu.memory_space<vmem>>, vector<4x346xf32>
    %224 = vector.extract_strided_slice %36 {offsets = [0, 37], sizes = [4, 1], strides = [1, 1]} : vector<4x49xf32> to vector<4x1xf32>
    %225 = vector.broadcast %224 : vector<4x1xf32> to vector<4x346xf32>
    %226 = arith.mulf %223, %225 : vector<4x346xf32>
    %227 = arith.addf %222, %226 : vector<4x346xf32>
    %c0_64 = arith.constant 0 : index
    %c113_65 = arith.constant 113 : index
    %228 = vector.load %arg11[%c0_64, %c113_65] : memref<4x484xf32, #tpu.memory_space<vmem>>, vector<4x346xf32>
    %229 = vector.extract_strided_slice %36 {offsets = [0, 38], sizes = [4, 1], strides = [1, 1]} : vector<4x49xf32> to vector<4x1xf32>
    %230 = vector.broadcast %229 : vector<4x1xf32> to vector<4x346xf32>
    %231 = arith.mulf %228, %230 : vector<4x346xf32>
    %232 = arith.addf %227, %231 : vector<4x346xf32>
    %c0_66 = arith.constant 0 : index
    %c114 = arith.constant 114 : index
    %233 = vector.load %arg11[%c0_66, %c114] : memref<4x484xf32, #tpu.memory_space<vmem>>, vector<4x346xf32>
    %234 = vector.extract_strided_slice %36 {offsets = [0, 39], sizes = [4, 1], strides = [1, 1]} : vector<4x49xf32> to vector<4x1xf32>
    %235 = vector.broadcast %234 : vector<4x1xf32> to vector<4x346xf32>
    %236 = arith.mulf %233, %235 : vector<4x346xf32>
    %237 = arith.addf %232, %236 : vector<4x346xf32>
    %c0_67 = arith.constant 0 : index
    %c115 = arith.constant 115 : index
    %238 = vector.load %arg11[%c0_67, %c115] : memref<4x484xf32, #tpu.memory_space<vmem>>, vector<4x346xf32>
    %239 = vector.extract_strided_slice %36 {offsets = [0, 40], sizes = [4, 1], strides = [1, 1]} : vector<4x49xf32> to vector<4x1xf32>
    %240 = vector.broadcast %239 : vector<4x1xf32> to vector<4x346xf32>
    %241 = arith.mulf %238, %240 : vector<4x346xf32>
    %242 = arith.addf %237, %241 : vector<4x346xf32>
    %c0_68 = arith.constant 0 : index
    %c116 = arith.constant 116 : index
    %243 = vector.load %arg11[%c0_68, %c116] : memref<4x484xf32, #tpu.memory_space<vmem>>, vector<4x346xf32>
    %244 = vector.extract_strided_slice %36 {offsets = [0, 41], sizes = [4, 1], strides = [1, 1]} : vector<4x49xf32> to vector<4x1xf32>
    %245 = vector.broadcast %244 : vector<4x1xf32> to vector<4x346xf32>
    %246 = arith.mulf %243, %245 : vector<4x346xf32>
    %247 = arith.addf %242, %246 : vector<4x346xf32>
    %c0_69 = arith.constant 0 : index
    %c132 = arith.constant 132 : index
    %248 = vector.load %arg11[%c0_69, %c132] : memref<4x484xf32, #tpu.memory_space<vmem>>, vector<4x346xf32>
    %249 = vector.extract_strided_slice %36 {offsets = [0, 42], sizes = [4, 1], strides = [1, 1]} : vector<4x49xf32> to vector<4x1xf32>
    %250 = vector.broadcast %249 : vector<4x1xf32> to vector<4x346xf32>
    %251 = arith.mulf %248, %250 : vector<4x346xf32>
    %252 = arith.addf %247, %251 : vector<4x346xf32>
    %c0_70 = arith.constant 0 : index
    %c133 = arith.constant 133 : index
    %253 = vector.load %arg11[%c0_70, %c133] : memref<4x484xf32, #tpu.memory_space<vmem>>, vector<4x346xf32>
    %254 = vector.extract_strided_slice %36 {offsets = [0, 43], sizes = [4, 1], strides = [1, 1]} : vector<4x49xf32> to vector<4x1xf32>
    %255 = vector.broadcast %254 : vector<4x1xf32> to vector<4x346xf32>
    %256 = arith.mulf %253, %255 : vector<4x346xf32>
    %257 = arith.addf %252, %256 : vector<4x346xf32>
    %c0_71 = arith.constant 0 : index
    %c134 = arith.constant 134 : index
    %258 = vector.load %arg11[%c0_71, %c134] : memref<4x484xf32, #tpu.memory_space<vmem>>, vector<4x346xf32>
    %259 = vector.extract_strided_slice %36 {offsets = [0, 44], sizes = [4, 1], strides = [1, 1]} : vector<4x49xf32> to vector<4x1xf32>
    %260 = vector.broadcast %259 : vector<4x1xf32> to vector<4x346xf32>
    %261 = arith.mulf %258, %260 : vector<4x346xf32>
    %262 = arith.addf %257, %261 : vector<4x346xf32>
    %c0_72 = arith.constant 0 : index
    %c135_73 = arith.constant 135 : index
    %263 = vector.load %arg11[%c0_72, %c135_73] : memref<4x484xf32, #tpu.memory_space<vmem>>, vector<4x346xf32>
    %264 = vector.extract_strided_slice %36 {offsets = [0, 45], sizes = [4, 1], strides = [1, 1]} : vector<4x49xf32> to vector<4x1xf32>
    %265 = vector.broadcast %264 : vector<4x1xf32> to vector<4x346xf32>
    %266 = arith.mulf %263, %265 : vector<4x346xf32>
    %267 = arith.addf %262, %266 : vector<4x346xf32>
    %c0_74 = arith.constant 0 : index
    %c136 = arith.constant 136 : index
    %268 = vector.load %arg11[%c0_74, %c136] : memref<4x484xf32, #tpu.memory_space<vmem>>, vector<4x346xf32>
    %269 = vector.extract_strided_slice %36 {offsets = [0, 46], sizes = [4, 1], strides = [1, 1]} : vector<4x49xf32> to vector<4x1xf32>
    %270 = vector.broadcast %269 : vector<4x1xf32> to vector<4x346xf32>
    %271 = arith.mulf %268, %270 : vector<4x346xf32>
    %272 = arith.addf %267, %271 : vector<4x346xf32>
    %c0_75 = arith.constant 0 : index
    %c137 = arith.constant 137 : index
    %273 = vector.load %arg11[%c0_75, %c137] : memref<4x484xf32, #tpu.memory_space<vmem>>, vector<4x346xf32>
    %274 = vector.extract_strided_slice %36 {offsets = [0, 47], sizes = [4, 1], strides = [1, 1]} : vector<4x49xf32> to vector<4x1xf32>
    %275 = vector.broadcast %274 : vector<4x1xf32> to vector<4x346xf32>
    %276 = arith.mulf %273, %275 : vector<4x346xf32>
    %277 = arith.addf %272, %276 : vector<4x346xf32>
    %c0_76 = arith.constant 0 : index
    %c138 = arith.constant 138 : index
    %278 = vector.load %arg11[%c0_76, %c138] : memref<4x484xf32, #tpu.memory_space<vmem>>, vector<4x346xf32>
    %279 = vector.extract_strided_slice %36 {offsets = [0, 48], sizes = [4, 1], strides = [1, 1]} : vector<4x49xf32> to vector<4x1xf32>
    %280 = vector.broadcast %279 : vector<4x1xf32> to vector<4x346xf32>
    %281 = arith.mulf %278, %280 : vector<4x346xf32>
    %282 = arith.addf %277, %281 : vector<4x346xf32>
    %c0_77 = arith.constant 0 : index
    %c0_78 = arith.constant 0 : index
    %283 = vector.load %arg3[%c0_77, %c0_78] : memref<4x1xf32, #tpu.memory_space<vmem>>, vector<4x1xf32>
    %284 = vector.broadcast %283 : vector<4x1xf32> to vector<4x346xf32>
    %285 = arith.addf %282, %284 : vector<4x346xf32>
    %cst_79 = arith.constant dense<0.000000e+00> : vector<346xf32>
    %286 = vector.multi_reduction <add>, %285, %cst_79 [0] : vector<4x346xf32> to vector<346xf32>
    %287 = vector.shape_cast %286 : vector<346xf32> to vector<1x346xf32>
    %cst_80 = arith.constant 4.000000e+00 : f32
    %288 = vector.broadcast %cst_80 : f32 to vector<1x346xf32>
    %289 = arith.divf %287, %288 : vector<1x346xf32>
    %290 = vector.broadcast %289 : vector<1x346xf32> to vector<4x346xf32>
    %291 = arith.subf %285, %290 : vector<4x346xf32>
    %292 = arith.mulf %291, %291 : vector<4x346xf32>
    %cst_81 = arith.constant dense<0.000000e+00> : vector<346xf32>
    %293 = vector.multi_reduction <add>, %292, %cst_81 [0] : vector<4x346xf32> to vector<346xf32>
    %294 = vector.shape_cast %293 : vector<346xf32> to vector<1x346xf32>
    %cst_82 = arith.constant 4.000000e+00 : f32
    %295 = vector.broadcast %cst_82 : f32 to vector<1x346xf32>
    %296 = arith.divf %294, %295 : vector<1x346xf32>
    %297 = vector.broadcast %289 : vector<1x346xf32> to vector<4x346xf32>
    %298 = arith.subf %285, %297 : vector<4x346xf32>
    %cst_83 = arith.constant 9.99999997E-7 : f32
    %299 = vector.broadcast %cst_83 : f32 to vector<1x346xf32>
    %300 = arith.addf %296, %299 : vector<1x346xf32>
    %301 = math.rsqrt %300 : vector<1x346xf32>
    %302 = vector.broadcast %301 : vector<1x346xf32> to vector<4x346xf32>
    %303 = arith.mulf %298, %302 : vector<4x346xf32>
    %c0_84 = arith.constant 0 : index
    %c0_85 = arith.constant 0 : index
    %304 = vector.load %arg4[%c0_84, %c0_85] : memref<4x1xf32, #tpu.memory_space<vmem>>, vector<4x1xf32>
    %305 = vector.broadcast %304 : vector<4x1xf32> to vector<4x346xf32>
    %306 = arith.mulf %303, %305 : vector<4x346xf32>
    %c0_86 = arith.constant 0 : index
    %c0_87 = arith.constant 0 : index
    %307 = vector.load %arg5[%c0_86, %c0_87] : memref<4x1xf32, #tpu.memory_space<vmem>>, vector<4x1xf32>
    %308 = vector.broadcast %307 : vector<4x1xf32> to vector<4x346xf32>
    %309 = arith.addf %306, %308 : vector<4x346xf32>
    %c0_88 = arith.constant 0 : index
    %c0_89 = arith.constant 0 : index
    %310 = vector.load %arg6[%c0_88, %c0_89] : memref<16x4xf32, #tpu.memory_space<vmem>>, vector<16x4xf32>
    %cst_90 = arith.constant 0.000000e+00 : f32
    %311 = vector.broadcast %cst_90 : f32 to vector<16x346xf32>
    %312 = vector.extract_strided_slice %310 {offsets = [0, 0], sizes = [16, 1], strides = [1, 1]} : vector<16x4xf32> to vector<16x1xf32>
    %313 = vector.extract_strided_slice %309 {offsets = [0, 0], sizes = [1, 346], strides = [1, 1]} : vector<4x346xf32> to vector<1x346xf32>
    %314 = vector.broadcast %312 : vector<16x1xf32> to vector<16x346xf32>
    %315 = vector.broadcast %313 : vector<1x346xf32> to vector<16x346xf32>
    %316 = arith.mulf %314, %315 : vector<16x346xf32>
    %317 = arith.addf %311, %316 : vector<16x346xf32>
    %318 = vector.extract_strided_slice %310 {offsets = [0, 1], sizes = [16, 1], strides = [1, 1]} : vector<16x4xf32> to vector<16x1xf32>
    %319 = vector.extract_strided_slice %309 {offsets = [1, 0], sizes = [1, 346], strides = [1, 1]} : vector<4x346xf32> to vector<1x346xf32>
    %320 = vector.broadcast %318 : vector<16x1xf32> to vector<16x346xf32>
    %321 = vector.broadcast %319 : vector<1x346xf32> to vector<16x346xf32>
    %322 = arith.mulf %320, %321 : vector<16x346xf32>
    %323 = arith.addf %317, %322 : vector<16x346xf32>
    %324 = vector.extract_strided_slice %310 {offsets = [0, 2], sizes = [16, 1], strides = [1, 1]} : vector<16x4xf32> to vector<16x1xf32>
    %325 = vector.extract_strided_slice %309 {offsets = [2, 0], sizes = [1, 346], strides = [1, 1]} : vector<4x346xf32> to vector<1x346xf32>
    %326 = vector.broadcast %324 : vector<16x1xf32> to vector<16x346xf32>
    %327 = vector.broadcast %325 : vector<1x346xf32> to vector<16x346xf32>
    %328 = arith.mulf %326, %327 : vector<16x346xf32>
    %329 = arith.addf %323, %328 : vector<16x346xf32>
    %330 = vector.extract_strided_slice %310 {offsets = [0, 3], sizes = [16, 1], strides = [1, 1]} : vector<16x4xf32> to vector<16x1xf32>
    %331 = vector.extract_strided_slice %309 {offsets = [3, 0], sizes = [1, 346], strides = [1, 1]} : vector<4x346xf32> to vector<1x346xf32>
    %332 = vector.broadcast %330 : vector<16x1xf32> to vector<16x346xf32>
    %333 = vector.broadcast %331 : vector<1x346xf32> to vector<16x346xf32>
    %334 = arith.mulf %332, %333 : vector<16x346xf32>
    %335 = arith.addf %329, %334 : vector<16x346xf32>
    %c0_91 = arith.constant 0 : index
    %c0_92 = arith.constant 0 : index
    %336 = vector.load %arg7[%c0_91, %c0_92] : memref<16x1xf32, #tpu.memory_space<vmem>>, vector<16x1xf32>
    %337 = vector.broadcast %336 : vector<16x1xf32> to vector<16x346xf32>
    %338 = arith.addf %335, %337 : vector<16x346xf32>
    %cst_93 = arith.constant 5.000000e-01 : f32
    %339 = vector.broadcast %cst_93 : f32 to vector<16x346xf32>
    %340 = arith.mulf %339, %338 : vector<16x346xf32>
    %cst_94 = arith.constant 0.707106769 : f32
    %341 = vector.broadcast %cst_94 : f32 to vector<16x346xf32>
    %342 = arith.mulf %338, %341 : vector<16x346xf32>
    %343 = math.erf %342 : vector<16x346xf32>
    %cst_95 = arith.constant 1.000000e+00 : f32
    %344 = vector.broadcast %cst_95 : f32 to vector<16x346xf32>
    %345 = arith.addf %344, %343 : vector<16x346xf32>
    %346 = arith.mulf %340, %345 : vector<16x346xf32>
    %c0_96 = arith.constant 0 : index
    %c0_97 = arith.constant 0 : index
    %347 = vector.load %arg8[%c0_96, %c0_97] : memref<8x16xf32, #tpu.memory_space<vmem>>, vector<8x16xf32>
    %cst_98 = arith.constant 0.000000e+00 : f32
    %348 = vector.broadcast %cst_98 : f32 to vector<8x346xf32>
    %349 = vector.extract_strided_slice %347 {offsets = [0, 0], sizes = [8, 1], strides = [1, 1]} : vector<8x16xf32> to vector<8x1xf32>
    %350 = vector.extract_strided_slice %346 {offsets = [0, 0], sizes = [1, 346], strides = [1, 1]} : vector<16x346xf32> to vector<1x346xf32>
    %351 = vector.broadcast %349 : vector<8x1xf32> to vector<8x346xf32>
    %352 = vector.broadcast %350 : vector<1x346xf32> to vector<8x346xf32>
    %353 = arith.mulf %351, %352 : vector<8x346xf32>
    %354 = arith.addf %348, %353 : vector<8x346xf32>
    %355 = vector.extract_strided_slice %347 {offsets = [0, 1], sizes = [8, 1], strides = [1, 1]} : vector<8x16xf32> to vector<8x1xf32>
    %356 = vector.extract_strided_slice %346 {offsets = [1, 0], sizes = [1, 346], strides = [1, 1]} : vector<16x346xf32> to vector<1x346xf32>
    %357 = vector.broadcast %355 : vector<8x1xf32> to vector<8x346xf32>
    %358 = vector.broadcast %356 : vector<1x346xf32> to vector<8x346xf32>
    %359 = arith.mulf %357, %358 : vector<8x346xf32>
    %360 = arith.addf %354, %359 : vector<8x346xf32>
    %361 = vector.extract_strided_slice %347 {offsets = [0, 2], sizes = [8, 1], strides = [1, 1]} : vector<8x16xf32> to vector<8x1xf32>
    %362 = vector.extract_strided_slice %346 {offsets = [2, 0], sizes = [1, 346], strides = [1, 1]} : vector<16x346xf32> to vector<1x346xf32>
    %363 = vector.broadcast %361 : vector<8x1xf32> to vector<8x346xf32>
    %364 = vector.broadcast %362 : vector<1x346xf32> to vector<8x346xf32>
    %365 = arith.mulf %363, %364 : vector<8x346xf32>
    %366 = arith.addf %360, %365 : vector<8x346xf32>
    %367 = vector.extract_strided_slice %347 {offsets = [0, 3], sizes = [8, 1], strides = [1, 1]} : vector<8x16xf32> to vector<8x1xf32>
    %368 = vector.extract_strided_slice %346 {offsets = [3, 0], sizes = [1, 346], strides = [1, 1]} : vector<16x346xf32> to vector<1x346xf32>
    %369 = vector.broadcast %367 : vector<8x1xf32> to vector<8x346xf32>
    %370 = vector.broadcast %368 : vector<1x346xf32> to vector<8x346xf32>
    %371 = arith.mulf %369, %370 : vector<8x346xf32>
    %372 = arith.addf %366, %371 : vector<8x346xf32>
    %373 = vector.extract_strided_slice %347 {offsets = [0, 4], sizes = [8, 1], strides = [1, 1]} : vector<8x16xf32> to vector<8x1xf32>
    %374 = vector.extract_strided_slice %346 {offsets = [4, 0], sizes = [1, 346], strides = [1, 1]} : vector<16x346xf32> to vector<1x346xf32>
    %375 = vector.broadcast %373 : vector<8x1xf32> to vector<8x346xf32>
    %376 = vector.broadcast %374 : vector<1x346xf32> to vector<8x346xf32>
    %377 = arith.mulf %375, %376 : vector<8x346xf32>
    %378 = arith.addf %372, %377 : vector<8x346xf32>
    %379 = vector.extract_strided_slice %347 {offsets = [0, 5], sizes = [8, 1], strides = [1, 1]} : vector<8x16xf32> to vector<8x1xf32>
    %380 = vector.extract_strided_slice %346 {offsets = [5, 0], sizes = [1, 346], strides = [1, 1]} : vector<16x346xf32> to vector<1x346xf32>
    %381 = vector.broadcast %379 : vector<8x1xf32> to vector<8x346xf32>
    %382 = vector.broadcast %380 : vector<1x346xf32> to vector<8x346xf32>
    %383 = arith.mulf %381, %382 : vector<8x346xf32>
    %384 = arith.addf %378, %383 : vector<8x346xf32>
    %385 = vector.extract_strided_slice %347 {offsets = [0, 6], sizes = [8, 1], strides = [1, 1]} : vector<8x16xf32> to vector<8x1xf32>
    %386 = vector.extract_strided_slice %346 {offsets = [6, 0], sizes = [1, 346], strides = [1, 1]} : vector<16x346xf32> to vector<1x346xf32>
    %387 = vector.broadcast %385 : vector<8x1xf32> to vector<8x346xf32>
    %388 = vector.broadcast %386 : vector<1x346xf32> to vector<8x346xf32>
    %389 = arith.mulf %387, %388 : vector<8x346xf32>
    %390 = arith.addf %384, %389 : vector<8x346xf32>
    %391 = vector.extract_strided_slice %347 {offsets = [0, 7], sizes = [8, 1], strides = [1, 1]} : vector<8x16xf32> to vector<8x1xf32>
    %392 = vector.extract_strided_slice %346 {offsets = [7, 0], sizes = [1, 346], strides = [1, 1]} : vector<16x346xf32> to vector<1x346xf32>
    %393 = vector.broadcast %391 : vector<8x1xf32> to vector<8x346xf32>
    %394 = vector.broadcast %392 : vector<1x346xf32> to vector<8x346xf32>
    %395 = arith.mulf %393, %394 : vector<8x346xf32>
    %396 = arith.addf %390, %395 : vector<8x346xf32>
    %397 = vector.extract_strided_slice %347 {offsets = [0, 8], sizes = [8, 1], strides = [1, 1]} : vector<8x16xf32> to vector<8x1xf32>
    %398 = vector.extract_strided_slice %346 {offsets = [8, 0], sizes = [1, 346], strides = [1, 1]} : vector<16x346xf32> to vector<1x346xf32>
    %399 = vector.broadcast %397 : vector<8x1xf32> to vector<8x346xf32>
    %400 = vector.broadcast %398 : vector<1x346xf32> to vector<8x346xf32>
    %401 = arith.mulf %399, %400 : vector<8x346xf32>
    %402 = arith.addf %396, %401 : vector<8x346xf32>
    %403 = vector.extract_strided_slice %347 {offsets = [0, 9], sizes = [8, 1], strides = [1, 1]} : vector<8x16xf32> to vector<8x1xf32>
    %404 = vector.extract_strided_slice %346 {offsets = [9, 0], sizes = [1, 346], strides = [1, 1]} : vector<16x346xf32> to vector<1x346xf32>
    %405 = vector.broadcast %403 : vector<8x1xf32> to vector<8x346xf32>
    %406 = vector.broadcast %404 : vector<1x346xf32> to vector<8x346xf32>
    %407 = arith.mulf %405, %406 : vector<8x346xf32>
    %408 = arith.addf %402, %407 : vector<8x346xf32>
    %409 = vector.extract_strided_slice %347 {offsets = [0, 10], sizes = [8, 1], strides = [1, 1]} : vector<8x16xf32> to vector<8x1xf32>
    %410 = vector.extract_strided_slice %346 {offsets = [10, 0], sizes = [1, 346], strides = [1, 1]} : vector<16x346xf32> to vector<1x346xf32>
    %411 = vector.broadcast %409 : vector<8x1xf32> to vector<8x346xf32>
    %412 = vector.broadcast %410 : vector<1x346xf32> to vector<8x346xf32>
    %413 = arith.mulf %411, %412 : vector<8x346xf32>
    %414 = arith.addf %408, %413 : vector<8x346xf32>
    %415 = vector.extract_strided_slice %347 {offsets = [0, 11], sizes = [8, 1], strides = [1, 1]} : vector<8x16xf32> to vector<8x1xf32>
    %416 = vector.extract_strided_slice %346 {offsets = [11, 0], sizes = [1, 346], strides = [1, 1]} : vector<16x346xf32> to vector<1x346xf32>
    %417 = vector.broadcast %415 : vector<8x1xf32> to vector<8x346xf32>
    %418 = vector.broadcast %416 : vector<1x346xf32> to vector<8x346xf32>
    %419 = arith.mulf %417, %418 : vector<8x346xf32>
    %420 = arith.addf %414, %419 : vector<8x346xf32>
    %421 = vector.extract_strided_slice %347 {offsets = [0, 12], sizes = [8, 1], strides = [1, 1]} : vector<8x16xf32> to vector<8x1xf32>
    %422 = vector.extract_strided_slice %346 {offsets = [12, 0], sizes = [1, 346], strides = [1, 1]} : vector<16x346xf32> to vector<1x346xf32>
    %423 = vector.broadcast %421 : vector<8x1xf32> to vector<8x346xf32>
    %424 = vector.broadcast %422 : vector<1x346xf32> to vector<8x346xf32>
    %425 = arith.mulf %423, %424 : vector<8x346xf32>
    %426 = arith.addf %420, %425 : vector<8x346xf32>
    %427 = vector.extract_strided_slice %347 {offsets = [0, 13], sizes = [8, 1], strides = [1, 1]} : vector<8x16xf32> to vector<8x1xf32>
    %428 = vector.extract_strided_slice %346 {offsets = [13, 0], sizes = [1, 346], strides = [1, 1]} : vector<16x346xf32> to vector<1x346xf32>
    %429 = vector.broadcast %427 : vector<8x1xf32> to vector<8x346xf32>
    %430 = vector.broadcast %428 : vector<1x346xf32> to vector<8x346xf32>
    %431 = arith.mulf %429, %430 : vector<8x346xf32>
    %432 = arith.addf %426, %431 : vector<8x346xf32>
    %433 = vector.extract_strided_slice %347 {offsets = [0, 14], sizes = [8, 1], strides = [1, 1]} : vector<8x16xf32> to vector<8x1xf32>
    %434 = vector.extract_strided_slice %346 {offsets = [14, 0], sizes = [1, 346], strides = [1, 1]} : vector<16x346xf32> to vector<1x346xf32>
    %435 = vector.broadcast %433 : vector<8x1xf32> to vector<8x346xf32>
    %436 = vector.broadcast %434 : vector<1x346xf32> to vector<8x346xf32>
    %437 = arith.mulf %435, %436 : vector<8x346xf32>
    %438 = arith.addf %432, %437 : vector<8x346xf32>
    %439 = vector.extract_strided_slice %347 {offsets = [0, 15], sizes = [8, 1], strides = [1, 1]} : vector<8x16xf32> to vector<8x1xf32>
    %440 = vector.extract_strided_slice %346 {offsets = [15, 0], sizes = [1, 346], strides = [1, 1]} : vector<16x346xf32> to vector<1x346xf32>
    %441 = vector.broadcast %439 : vector<8x1xf32> to vector<8x346xf32>
    %442 = vector.broadcast %440 : vector<1x346xf32> to vector<8x346xf32>
    %443 = arith.mulf %441, %442 : vector<8x346xf32>
    %444 = arith.addf %438, %443 : vector<8x346xf32>
    %c0_99 = arith.constant 0 : index
    %c0_100 = arith.constant 0 : index
    %445 = vector.load %arg9[%c0_99, %c0_100] : memref<8x1xf32, #tpu.memory_space<vmem>>, vector<8x1xf32>
    %446 = vector.broadcast %445 : vector<8x1xf32> to vector<8x346xf32>
    %447 = arith.addf %444, %446 : vector<8x346xf32>
    %448 = vector.extract_strided_slice %447 {offsets = [0, 0], sizes = [8, 16], strides = [1, 1]} : vector<8x346xf32> to vector<8x16xf32>
    %c0_101 = arith.constant 0 : index
    %c0_102 = arith.constant 0 : index
    %c0_103 = arith.constant 0 : index
    %449 = vector.load %arg10[%c0_101, %c0_102, %c0_103] : memref<1x8x256xf32, #tpu.memory_space<vmem>>, vector<1x8x16xf32>
    %450 = vector.shape_cast %449 : vector<1x8x16xf32> to vector<8x16xf32>
    %451 = vector.shape_cast %448 : vector<8x16xf32> to vector<1x8x16xf32>
    tpu.vector_store %arg10[%c0_101, %c0_102, %c0_103], %451 {strides = array<i32>} : memref<1x8x256xf32, #tpu.memory_space<vmem>>, vector<1x8x16xf32>,
    %452 = vector.extract_strided_slice %447 {offsets = [0, 22], sizes = [8, 16], strides = [1, 1]} : vector<8x346xf32> to vector<8x16xf32>
    %c0_104 = arith.constant 0 : index
    %c0_105 = arith.constant 0 : index
    %c16 = arith.constant 16 : index
    %453 = vector.load %arg10[%c0_104, %c0_105, %c16] : memref<1x8x256xf32, #tpu.memory_space<vmem>>, vector<1x8x16xf32>
    %454 = vector.shape_cast %453 : vector<1x8x16xf32> to vector<8x16xf32>
    %455 = vector.shape_cast %452 : vector<8x16xf32> to vector<1x8x16xf32>
    tpu.vector_store %arg10[%c0_104, %c0_105, %c16], %455 {strides = array<i32>} : memref<1x8x256xf32, #tpu.memory_space<vmem>>, vector<1x8x16xf32>,
    %456 = vector.extract_strided_slice %447 {offsets = [0, 44], sizes = [8, 16], strides = [1, 1]} : vector<8x346xf32> to vector<8x16xf32>
    %c0_106 = arith.constant 0 : index
    %c0_107 = arith.constant 0 : index
    %c32 = arith.constant 32 : index
    %457 = vector.load %arg10[%c0_106, %c0_107, %c32] : memref<1x8x256xf32, #tpu.memory_space<vmem>>, vector<1x8x16xf32>
    %458 = vector.shape_cast %457 : vector<1x8x16xf32> to vector<8x16xf32>
    %459 = vector.shape_cast %456 : vector<8x16xf32> to vector<1x8x16xf32>
    tpu.vector_store %arg10[%c0_106, %c0_107, %c32], %459 {strides = array<i32>} : memref<1x8x256xf32, #tpu.memory_space<vmem>>, vector<1x8x16xf32>,
    %460 = vector.extract_strided_slice %447 {offsets = [0, 66], sizes = [8, 16], strides = [1, 1]} : vector<8x346xf32> to vector<8x16xf32>
    %c0_108 = arith.constant 0 : index
    %c0_109 = arith.constant 0 : index
    %c48_110 = arith.constant 48 : index
    %461 = vector.load %arg10[%c0_108, %c0_109, %c48_110] : memref<1x8x256xf32, #tpu.memory_space<vmem>>, vector<1x8x16xf32>
    %462 = vector.shape_cast %461 : vector<1x8x16xf32> to vector<8x16xf32>
    %463 = vector.shape_cast %460 : vector<8x16xf32> to vector<1x8x16xf32>
    tpu.vector_store %arg10[%c0_108, %c0_109, %c48_110], %463 {strides = array<i32>} : memref<1x8x256xf32, #tpu.memory_space<vmem>>, vector<1x8x16xf32>,
    %464 = vector.extract_strided_slice %447 {offsets = [0, 88], sizes = [8, 16], strides = [1, 1]} : vector<8x346xf32> to vector<8x16xf32>
    %c0_111 = arith.constant 0 : index
    %c0_112 = arith.constant 0 : index
    %c64 = arith.constant 64 : index
    %465 = vector.load %arg10[%c0_111, %c0_112, %c64] : memref<1x8x256xf32, #tpu.memory_space<vmem>>, vector<1x8x16xf32>
    %466 = vector.shape_cast %465 : vector<1x8x16xf32> to vector<8x16xf32>
    %467 = vector.shape_cast %464 : vector<8x16xf32> to vector<1x8x16xf32>
    tpu.vector_store %arg10[%c0_111, %c0_112, %c64], %467 {strides = array<i32>} : memref<1x8x256xf32, #tpu.memory_space<vmem>>, vector<1x8x16xf32>,
    %468 = vector.extract_strided_slice %447 {offsets = [0, 110], sizes = [8, 16], strides = [1, 1]} : vector<8x346xf32> to vector<8x16xf32>
    %c0_113 = arith.constant 0 : index
    %c0_114 = arith.constant 0 : index
    %c80 = arith.constant 80 : index
    %469 = vector.load %arg10[%c0_113, %c0_114, %c80] : memref<1x8x256xf32, #tpu.memory_space<vmem>>, vector<1x8x16xf32>
    %470 = vector.shape_cast %469 : vector<1x8x16xf32> to vector<8x16xf32>
    %471 = vector.shape_cast %468 : vector<8x16xf32> to vector<1x8x16xf32>
    tpu.vector_store %arg10[%c0_113, %c0_114, %c80], %471 {strides = array<i32>} : memref<1x8x256xf32, #tpu.memory_space<vmem>>, vector<1x8x16xf32>,
    %472 = vector.extract_strided_slice %447 {offsets = [0, 132], sizes = [8, 16], strides = [1, 1]} : vector<8x346xf32> to vector<8x16xf32>
    %c0_115 = arith.constant 0 : index
    %c0_116 = arith.constant 0 : index
    %c96 = arith.constant 96 : index
    %473 = vector.load %arg10[%c0_115, %c0_116, %c96] : memref<1x8x256xf32, #tpu.memory_space<vmem>>, vector<1x8x16xf32>
    %474 = vector.shape_cast %473 : vector<1x8x16xf32> to vector<8x16xf32>
    %475 = vector.shape_cast %472 : vector<8x16xf32> to vector<1x8x16xf32>
    tpu.vector_store %arg10[%c0_115, %c0_116, %c96], %475 {strides = array<i32>} : memref<1x8x256xf32, #tpu.memory_space<vmem>>, vector<1x8x16xf32>,
    %476 = vector.extract_strided_slice %447 {offsets = [0, 154], sizes = [8, 16], strides = [1, 1]} : vector<8x346xf32> to vector<8x16xf32>
    %c0_117 = arith.constant 0 : index
    %c0_118 = arith.constant 0 : index
    %c112_119 = arith.constant 112 : index
    %477 = vector.load %arg10[%c0_117, %c0_118, %c112_119] : memref<1x8x256xf32, #tpu.memory_space<vmem>>, vector<1x8x16xf32>
    %478 = vector.shape_cast %477 : vector<1x8x16xf32> to vector<8x16xf32>
    %479 = vector.shape_cast %476 : vector<8x16xf32> to vector<1x8x16xf32>
    tpu.vector_store %arg10[%c0_117, %c0_118, %c112_119], %479 {strides = array<i32>} : memref<1x8x256xf32, #tpu.memory_space<vmem>>, vector<1x8x16xf32>,
    %480 = vector.extract_strided_slice %447 {offsets = [0, 176], sizes = [8, 16], strides = [1, 1]} : vector<8x346xf32> to vector<8x16xf32>
    %c0_120 = arith.constant 0 : index
    %c0_121 = arith.constant 0 : index
    %c128 = arith.constant 128 : index
    %481 = vector.load %arg10[%c0_120, %c0_121, %c128] : memref<1x8x256xf32, #tpu.memory_space<vmem>>, vector<1x8x16xf32>
    %482 = vector.shape_cast %481 : vector<1x8x16xf32> to vector<8x16xf32>
    %483 = vector.shape_cast %480 : vector<8x16xf32> to vector<1x8x16xf32>
    tpu.vector_store %arg10[%c0_120, %c0_121, %c128], %483 {strides = array<i32>} : memref<1x8x256xf32, #tpu.memory_space<vmem>>, vector<1x8x16xf32>,
    %484 = vector.extract_strided_slice %447 {offsets = [0, 198], sizes = [8, 16], strides = [1, 1]} : vector<8x346xf32> to vector<8x16xf32>
    %c0_122 = arith.constant 0 : index
    %c0_123 = arith.constant 0 : index
    %c144 = arith.constant 144 : index
    %485 = vector.load %arg10[%c0_122, %c0_123, %c144] : memref<1x8x256xf32, #tpu.memory_space<vmem>>, vector<1x8x16xf32>
    %486 = vector.shape_cast %485 : vector<1x8x16xf32> to vector<8x16xf32>
    %487 = vector.shape_cast %484 : vector<8x16xf32> to vector<1x8x16xf32>
    tpu.vector_store %arg10[%c0_122, %c0_123, %c144], %487 {strides = array<i32>} : memref<1x8x256xf32, #tpu.memory_space<vmem>>, vector<1x8x16xf32>,
    %488 = vector.extract_strided_slice %447 {offsets = [0, 220], sizes = [8, 16], strides = [1, 1]} : vector<8x346xf32> to vector<8x16xf32>
    %c0_124 = arith.constant 0 : index
    %c0_125 = arith.constant 0 : index
    %c160 = arith.constant 160 : index
    %489 = vector.load %arg10[%c0_124, %c0_125, %c160] : memref<1x8x256xf32, #tpu.memory_space<vmem>>, vector<1x8x16xf32>
    %490 = vector.shape_cast %489 : vector<1x8x16xf32> to vector<8x16xf32>
    %491 = vector.shape_cast %488 : vector<8x16xf32> to vector<1x8x16xf32>
    tpu.vector_store %arg10[%c0_124, %c0_125, %c160], %491 {strides = array<i32>} : memref<1x8x256xf32, #tpu.memory_space<vmem>>, vector<1x8x16xf32>,
    %492 = vector.extract_strided_slice %447 {offsets = [0, 242], sizes = [8, 16], strides = [1, 1]} : vector<8x346xf32> to vector<8x16xf32>
    %c0_126 = arith.constant 0 : index
    %c0_127 = arith.constant 0 : index
    %c176 = arith.constant 176 : index
    %493 = vector.load %arg10[%c0_126, %c0_127, %c176] : memref<1x8x256xf32, #tpu.memory_space<vmem>>, vector<1x8x16xf32>
    %494 = vector.shape_cast %493 : vector<1x8x16xf32> to vector<8x16xf32>
    %495 = vector.shape_cast %492 : vector<8x16xf32> to vector<1x8x16xf32>
    tpu.vector_store %arg10[%c0_126, %c0_127, %c176], %495 {strides = array<i32>} : memref<1x8x256xf32, #tpu.memory_space<vmem>>, vector<1x8x16xf32>,
    %496 = vector.extract_strided_slice %447 {offsets = [0, 264], sizes = [8, 16], strides = [1, 1]} : vector<8x346xf32> to vector<8x16xf32>
    %c0_128 = arith.constant 0 : index
    %c0_129 = arith.constant 0 : index
    %c192 = arith.constant 192 : index
    %497 = vector.load %arg10[%c0_128, %c0_129, %c192] : memref<1x8x256xf32, #tpu.memory_space<vmem>>, vector<1x8x16xf32>
    %498 = vector.shape_cast %497 : vector<1x8x16xf32> to vector<8x16xf32>
    %499 = vector.shape_cast %496 : vector<8x16xf32> to vector<1x8x16xf32>
    tpu.vector_store %arg10[%c0_128, %c0_129, %c192], %499 {strides = array<i32>} : memref<1x8x256xf32, #tpu.memory_space<vmem>>, vector<1x8x16xf32>,
    %500 = vector.extract_strided_slice %447 {offsets = [0, 286], sizes = [8, 16], strides = [1, 1]} : vector<8x346xf32> to vector<8x16xf32>
    %c0_130 = arith.constant 0 : index
    %c0_131 = arith.constant 0 : index
    %c208 = arith.constant 208 : index
    %501 = vector.load %arg10[%c0_130, %c0_131, %c208] : memref<1x8x256xf32, #tpu.memory_space<vmem>>, vector<1x8x16xf32>
    %502 = vector.shape_cast %501 : vector<1x8x16xf32> to vector<8x16xf32>
    %503 = vector.shape_cast %500 : vector<8x16xf32> to vector<1x8x16xf32>
    tpu.vector_store %arg10[%c0_130, %c0_131, %c208], %503 {strides = array<i32>} : memref<1x8x256xf32, #tpu.memory_space<vmem>>, vector<1x8x16xf32>,
    %504 = vector.extract_strided_slice %447 {offsets = [0, 308], sizes = [8, 16], strides = [1, 1]} : vector<8x346xf32> to vector<8x16xf32>
    %c0_132 = arith.constant 0 : index
    %c0_133 = arith.constant 0 : index
    %c224 = arith.constant 224 : index
    %505 = vector.load %arg10[%c0_132, %c0_133, %c224] : memref<1x8x256xf32, #tpu.memory_space<vmem>>, vector<1x8x16xf32>
    %506 = vector.shape_cast %505 : vector<1x8x16xf32> to vector<8x16xf32>
    %507 = vector.shape_cast %504 : vector<8x16xf32> to vector<1x8x16xf32>
    tpu.vector_store %arg10[%c0_132, %c0_133, %c224], %507 {strides = array<i32>} : memref<1x8x256xf32, #tpu.memory_space<vmem>>, vector<1x8x16xf32>,
    %508 = vector.extract_strided_slice %447 {offsets = [0, 330], sizes = [8, 16], strides = [1, 1]} : vector<8x346xf32> to vector<8x16xf32>
    %c0_134 = arith.constant 0 : index
    %c0_135 = arith.constant 0 : index
    %c240 = arith.constant 240 : index
    %509 = vector.load %arg10[%c0_134, %c0_135, %c240] : memref<1x8x256xf32, #tpu.memory_space<vmem>>, vector<1x8x16xf32>
    %510 = vector.shape_cast %509 : vector<1x8x16xf32> to vector<8x16xf32>
    %511 = vector.shape_cast %508 : vector<8x16xf32> to vector<1x8x16xf32>
    tpu.vector_store %arg10[%c0_134, %c0_135, %c240], %511 {strides = array<i32>} : memref<1x8x256xf32, #tpu.memory_space<vmem>>, vector<1x8x16xf32>,
    return
  }
  func.func @transform_0(%arg0: i32) -> (i32, i32, i32) {
    %c0_i32 = arith.constant 0 : i32
    %c0_i32_0 = arith.constant 0 : i32
    %c0_i32_1 = arith.constant 0 : i32
    return %arg0, %c0_i32, %c0_i32_0 : i32, i32, i32
  }
  func.func @transform_1(%arg0: i32) -> (i32, i32) {
    %c0_i32 = arith.constant 0 : i32
    %c0_i32_0 = arith.constant 0 : i32
    %c0_i32_1 = arith.constant 0 : i32
    return %c0_i32, %c0_i32_0 : i32, i32
  }
  func.func @transform_2(%arg0: i32) -> (i32, i32) {
    %c0_i32 = arith.constant 0 : i32
    %c0_i32_0 = arith.constant 0 : i32
    %c0_i32_1 = arith.constant 0 : i32
    return %c0_i32, %c0_i32_0 : i32, i32
  }
  func.func @transform_3(%arg0: i32) -> (i32, i32) {
    %c0_i32 = arith.constant 0 : i32
    %c0_i32_0 = arith.constant 0 : i32
    %c0_i32_1 = arith.constant 0 : i32
    return %c0_i32, %c0_i32_0 : i32, i32
  }
  func.func @transform_4(%arg0: i32) -> (i32, i32) {
    %c0_i32 = arith.constant 0 : i32
    %c0_i32_0 = arith.constant 0 : i32
    %c0_i32_1 = arith.constant 0 : i32
    return %c0_i32, %c0_i32_0 : i32, i32
  }
  func.func @transform_5(%arg0: i32) -> (i32, i32) {
    %c0_i32 = arith.constant 0 : i32
    %c0_i32_0 = arith.constant 0 : i32
    %c0_i32_1 = arith.constant 0 : i32
    return %c0_i32, %c0_i32_0 : i32, i32
  }
  func.func @transform_6(%arg0: i32) -> (i32, i32) {
    %c0_i32 = arith.constant 0 : i32
    %c0_i32_0 = arith.constant 0 : i32
    %c0_i32_1 = arith.constant 0 : i32
    return %c0_i32, %c0_i32_0 : i32, i32
  }
  func.func @transform_7(%arg0: i32) -> (i32, i32) {
    %c0_i32 = arith.constant 0 : i32
    %c0_i32_0 = arith.constant 0 : i32
    %c0_i32_1 = arith.constant 0 : i32
    return %c0_i32, %c0_i32_0 : i32, i32
  }
  func.func @transform_8(%arg0: i32) -> (i32, i32) {
    %c0_i32 = arith.constant 0 : i32
    %c0_i32_0 = arith.constant 0 : i32
    %c0_i32_1 = arith.constant 0 : i32
    return %c0_i32, %c0_i32_0 : i32, i32
  }
  func.func @transform_9(%arg0: i32) -> (i32, i32, i32) {
    %c0_i32 = arith.constant 0 : i32
    %c0_i32_0 = arith.constant 0 : i32
    %c0_i32_1 = arith.constant 0 : i32
    return %arg0, %c0_i32, %c0_i32_0 : i32, i32, i32
  }
}

</mosaic_0001>

<bundles_post_ra>
// kernel: tpu_custom_call.1
= control target key start
LH: loop header
LB: loop body
LE: loop exit
PB: predicated region body
PF: predicated region fallthrough
CT: control target
= control target key end

     0   :  { %14 = vsyncpa [#allocation4], 0  ;;  %s4387_s0 = inlined_call_operand.vmem [shape: f32[2,4,256], index: 0, kind: input, shape index: {}]   ;;  %s4388_s1 = inlined_call_operand.vmem [shape: f32[4,49], index: 1, kind: input, shape index: {}]   ;;  %s4389_s2 = inlined_call_operand.vmem [shape: f32[4,1], index: 2, kind: input, shape index: {}]   ;;  %s4390_s3 = inlined_call_operand.vmem [shape: f32[4,1], index: 3, kind: input, shape index: {}]   ;;  %s4391_s4 = inlined_call_operand.vmem [shape: f32[4,1], index: 4, kind: input, shape index: {}]   ;;  %s4392_s5 = inlined_call_operand.vmem [shape: f32[16,4], index: 5, kind: input, shape index: {}]   ;;  %s4393_s6 = inlined_call_operand.vmem [shape: f32[16,1], index: 6, kind: input, shape index: {}]   ;;  %s4394_s7 = inlined_call_operand.vmem [shape: f32[8,16], index: 7, kind: input, shape index: {}]   ;;  %s4395_s8 = inlined_call_operand.vmem [shape: f32[8,1], index: 8, kind: input, shape index: {}]   ;;  %s4396_s9 = inlined_call_operand.hbm [shape: f32[2,8,256], index: 9, kind: output, shape index: {}]  }
   0x1   :  { %16 = vsyncpa [#allocation4 + $0x1], 0  ;;  %s3204_s30 = smov 0   ;;  %s3206_s10 = smov 0  }
   0x2   :  { %s3208_s11 = smov 0   ;;  %s3210_s12 = smov 0  }
   0x3 LB: > { %s3225_s13 = sadd.s32 4294967295, %s3034_s12   ;;  %s2711_s14 = sadd.s32 4294967294, %s3034_s12   ;;  %s3034_s12 = sphi %s3210_s12, %s4436_s12   ;;  %s3030_s11 = sphi %s3208_s11, %s4435_s11   ;;  %s3026_s10 = sphi %s3206_s10, %s4434_s10   ;;  %s3022_s30 = sphi %s3204_s30, %s4433_s30  }
   0x4   : > { %s3229_s15 = sadd.s32 1, %s3034_s12   ;;  %s223_s16 = sadd.s32 1, %s3030_s11 }
   0x5   : > { %s220_s17 = ssub.s32 %s3034_s12, %s3229_s15  ;;  %p233_p0 = scmp.ne.s32.totalorder %s3030_s11, %s3026_s10 }
   0x6   : > { %p221_p1 = scmp.eq.s32.totalorder %s220_s17, 0  ;;  %p234_p2 = scmp.eq.s32.totalorder %s3225_s13, 1 }
   0x7   : > { %p239_p3 = scmp.ne.s32.totalorder %s3026_s10, %s3022_s30  ;;  %p240_p4 = scmp.eq.s32.totalorder %s2711_s14, 1 }
   0x8   : > { %s3240_s18 = scalar_select %p221_p1, %s3030_s11, %s223_s16  }
   0x9   : > { %p3242_p5 = por %p234_p2, %p233_p0  ;;  %p3246_p6 = por %p240_p4, %p239_p3 }
   0xa   : > { %p2714_p7 = scmp.ge.s32.totalorder %s3034_s12, 1  ;;  %p290_p8 = scmp.lt.s32.totalorder %s3034_s12, 3 }
   0xc   : > { %p291_p9 = pnand %p2714_p7, %p290_p8 }
   0xd   : > { %p326_p10 = scmp.lt.s32.totalorder (!%p291_p9), %s3225_s13, 1  ;;  %s4399_s26 = smov (!%p291_p9), 81  }
   0xe   : > { %294 = sbr.rel (%p291_p9) target bundleno = 1018 (0x3fa), region = 56  ;;  %s3040_s27 = smov (!%p291_p9), 69  }
   0xf   : > { %s3041_s28 = smov (!%p291_p9), 87   ;;  %s3042_s29 = smov (!%p291_p9), 75  }
  0x10   : > { %s3043_s14 = smov (!%p291_p9), 99   ;;  %s3044_s16 = smov (!%p291_p9), 93  }
  0x11   : > { %s3045_s17 = smov (!%p291_p9), 111   ;;  %s3048_s23 = smov (!%p291_p9), 117  }
  0x12   : > { %s3049_s24 = smov (!%p291_p9), 7  }
  0x13   : > { %v3036_v0 = vmov 3   ;;  %v3037_v1 = vmov 1   ;;  %s327_s21 = scalar_select %p326_p10, %s3225_s13, 1  ;;  %vm332_vm0 = vcmask 1043456   ;;  %v3038_v2 = vmov 0.0  }
  0x14   : > { %2883 = vset.pattern.permute.xlu0 %v3036_v0  ;;  %2881 = vset.pattern.permute.xlu1 %v3037_v1  ;;  %331 = vst [vmem:[#allocation2] sm:$0xff] %v3038_v2  ;;  %vm333_vm1 = vcmask 818180   ;;  %v3267_v4 = vld [vmem:[%s4388_s1] sm:$0xf]  ;;  %v3055_v5 = vmov 2   ;;  %v3056_v6 = vmov 4   ;;  %v457_v51 = vlaneseq }
  0x15   : > { %s2723_s22 = sshll.u32 %s327_s21, 3  ;;  %vm334_vm2 = vmor %vm333_vm1, %vm332_vm0  ;;  %s3046_s21 = smov 105   ;;  %v4410_v7 = vmov 5   ;;  %v4409_v8 = vmov 6   ;;  %v3059_v9 = vmov 7   ;;  %v4408_v10 = vmov 8  }
  0x16   : > { %s330_s25 = scalar_lea.vmem %s4387_s0, %s2723_s22  ;;  %335 = vst.msk [vmem:[#allocation2 + $0x8] sm:$0xff] %vm334_vm2, %v3038_v2  ;;  %s3047_s22 = smov 123   ;;  %v4407_v11 = vmov 9   ;;  %v4412_v12 = vmov 10   ;;  %v4406_v13 = vmov 11   ;;  %v4405_v14 = vmov 12  }
  0x17   : > { %v336_v3 = vld [vmem:[%s330_s25] sm:$0xff]  ;;  %s3050_s25 = smov 1   ;;  %v4411_v15 = vmov 13   ;;  %v4404_v16 = vmov 14   ;;  %v4403_v17 = vmov 15   ;;  %v3068_v18 = vmov 16  }
  0x18   : > { %348 = vrot.lane.b32.xlu1 %v336_v3, %s4399_s26  ;;  %338 = vrot.lane.b32.xlu0 %v336_v3, %s3040_s27  ;;  %s3051_s27 = smov 19   ;;  %vm341_vm3 = vcmask 691752   ;;  %vm354_vm4 = vcmask 1044360   ;;  %vm355_vm5 = vcmask 7172   ;;  %vm351_vm6 = vcmask 662528   ;;  %s4402_s26 = smov 100  }
  0x19   : > { %vm346_vm7 = vcmask 872152   ;;  %vm356_vm8 = vmor %vm355_vm5, %vm354_vm4  ;;  %vm361_vm9 = vcmask 183352   ;;  %vm366_vm10 = vcmask 363752   ;;  %vm371_vm11 = vcmask 544152  }
  0x1a   : > { %vm376_vm12 = vcmask 724552   ;;  %vm381_vm13 = vcmask 904952   ;;  %vm389_vm14 = vcmask 1044392   ;;  %vm390_vm15 = vcmask 39940  }
  0x1b   : > { %vm386_vm1 = vcmask 957440   ;;  %vm391_vm2 = vmor %vm390_vm15, %vm389_vm14  ;;  %vm410_vm4 = vcmask 56320   ;;  %vm402_vm5 = vcmask 7168   ;;  %vm438_vm14 = vcmask 72708  }
  0x1c   : > { %358 = vrot.lane.b32.xlu1 %v336_v3, %s3041_s28  ;;  %343 = vrot.lane.b32.xlu0 %v336_v3, %s3042_s29  ;;  %s4397_s28 = smov 13   ;;  %s3053_s29 = smov 31   ;;  %vm434_vm15 = vcmask 203776   ;;  %v3069_v49 = vmov 839922192   ;;  %v3299_v55 = vshrl.u32 %v457_v51, 7 }
  0x1d   : > { %v455_v50 = vunpack.c.l.s4 %v3069_v49  ;;  %v3083_v49 = vmov 25  }
  0x1f   : > { %v456_v54 = vunpack.c.0.s8 %v455_v50 }
  0x20   : > { %368 = vrot.lane.b32.xlu1 %v336_v3, %s3043_s14  ;;  %363 = vrot.lane.b32.xlu0 %v336_v3, %s3044_s16  ;;  %s3054_s14 = smov 25   ;;  %s3079_s16 = smov 104  }
  0x21   : > { %v3302_v56 = vsub.s32 %v456_v54, %v3299_v55 }
  0x24   : > { %378 = vrot.lane.b32.xlu1 %v336_v3, %s3045_s17  ;;  %373 = vrot.lane.b32.xlu0 %v336_v3, %s3046_s21  ;;  %s3081_s17 = smov 103  }
  0x28   : > { %393 = vrot.lane.b32.xlu1 %v336_v3, %s3047_s22  ;;  %383 = vrot.lane.b32.xlu0 %v336_v3, %s3048_s23  ;;  %s3070_s23 = smov 127  }
  0x2c   : > { %407 = vrot.lane.b32.xlu1 %v336_v3, %s3049_s24  ;;  %399 = vrot.lane.b32.xlu0 %v336_v3, %s3050_s25  ;;  %s3071_s24 = smov 125   ;;  %s3072_s25 = smov 126  }
  0x30   : > { %423 = vrot.lane.b32.xlu1 %v336_v3, %s3051_s27  ;;  %415 = vrot.lane.b32.xlu0 %v336_v3, %s4397_s28  ;;  %s3073_s27 = smov 124   ;;  %s4401_s28 = smov 101  }
  0x34   : > { %441 = vrot.lane.b32.xlu1 %v336_v3, %s3053_s29  ;;  %431 = vrot.lane.b32.xlu0 %v336_v3, %s3054_s14  ;;  %s3074_s29 = smov 122   ;;  %s3076_s14 = smov 106  }
  0x38   : > { %467 = vperm.xlu1 %2881, %v3267_v4   ;;  %523 = vperm.xlu0 %2883, %v3267_v4  }
  0x3c   : > { %2882 = vset.pattern.permute.xlu1 %v3055_v5  ;;  %2884 = vset.pattern.permute.xlu0 %v3056_v6 }
  0x3d   : > { %495 = vperm.xlu1 %2882, %v3267_v4   ;;  %551 = vperm.xlu0 %2884, %v3267_v4  }
  0x41   : > { %2885 = vset.pattern.permute.xlu0 %v4410_v7 }
  0x42   : > { %579 = vperm.xlu0 %2885, %v3267_v4  }
  0x46   : > { %2886 = vset.pattern.permute.xlu0 %v4409_v8 }
  0x47   : > { %607 = vperm.xlu0 %2886, %v3267_v4  }
  0x4b   : > { %2887 = vset.pattern.permute.xlu0 %v3059_v9 }
  0x4c   : > { %635 = vperm.xlu0 %2887, %v3267_v4  }
  0x50   : > { %2888 = vset.pattern.permute.xlu0 %v4408_v10 }
  0x51   : > { %663 = vperm.xlu0 %2888, %v3267_v4  }
  0x55   : > { %2889 = vset.pattern.permute.xlu0 %v4407_v11 }
  0x56   : > { %691 = vperm.xlu0 %2889, %v3267_v4  }
  0x5a   : > { %2890 = vset.pattern.permute.xlu0 %v4412_v12 }
  0x5b   : > { %719 = vperm.xlu0 %2890, %v3267_v4  }
  0x5f   : > { %2891 = vset.pattern.permute.xlu0 %v4406_v13 }
  0x60   : > { %747 = vperm.xlu0 %2891, %v3267_v4  }
  0x64   : > { %2892 = vset.pattern.permute.xlu0 %v4405_v14 }
  0x65   : > { %775 = vperm.xlu0 %2892, %v3267_v4  }
  0x69   : > { %2893 = vset.pattern.permute.xlu0 %v4411_v15 }
  0x6a   : > { %803 = vperm.xlu0 %2893, %v3267_v4  }
  0x6e   : > { %2894 = vset.pattern.permute.xlu0 %v4404_v16 }
  0x6f   : > { %833 = vperm.xlu0 %2894, %v3267_v4  }
  0x73   : > { %2895 = vset.pattern.permute.xlu0 %v4403_v17 }
  0x74   : > { %862 = vperm.xlu0 %2895, %v3267_v4  }
  0x78   : > { %2896 = vset.pattern.permute.xlu0 %v3068_v18 }
  0x8a   : > { %v349_v19 = vpop.permute.xlu1 %348  ;;  %v339_v20 = vpop.permute.xlu0 %338 }
  0x8b   : > { %v350_v21 = vrot.slane %v349_v19, 4  ;;  %342 = vst.msk [vmem:[#allocation2] sm:$0xf] %vm341_vm3, %v339_v20  ;;  %vm397_vm3 = vcmask 216152  }
  0x8d   : > { %v352_v24 = vsel %vm351_vm6, %v350_v21, %v349_v19 }
  0x8e   : > { %v359_v22 = vpop.permute.xlu1 %358  ;;  %v344_v23 = vpop.permute.xlu0 %343 }
  0x8f   : > { %347 = vst.msk [vmem:[#allocation2] sm:$0xf] %vm346_vm7, %v344_v23  ;;  %vm405_vm7 = vcmask 396552  }
  0x90   : > { %357 = vst.msk [vmem:[#allocation2] sm:$0xff] %vm356_vm8, %v352_v24  ;;  %vm413_vm8 = vcmask 576952  }
  0x91   : > { %362 = vst.msk [vmem:[#allocation2 + $0x4] sm:$0xf] %vm361_vm9, %v359_v22  ;;  %vm426_vm9 = vcmask 154624  }
  0x92   : > { %v369_v25 = vpop.permute.xlu1 %368  ;;  %v364_v26 = vpop.permute.xlu0 %363 }
  0x93   : > { %367 = vst.msk [vmem:[#allocation2 + $0x4] sm:$0xf] %vm366_vm10, %v364_v26  ;;  %vm418_vm10 = vcmask 105472  }
  0x94   : > { %372 = vst.msk [vmem:[#allocation2 + $0x4] sm:$0xf] %vm371_vm11, %v369_v25  ;;  %vm421_vm11 = vcmask 757352  }
  0x96   : > { %v379_v27 = vpop.permute.xlu1 %378  ;;  %v374_v28 = vpop.permute.xlu0 %373 }
  0x97   : > { %377 = vst.msk [vmem:[#allocation2 + $0x4] sm:$0xf] %vm376_vm12, %v374_v28  ;;  %vm429_vm12 = vcmask 937752  }
  0x98   : > { %382 = vst.msk [vmem:[#allocation2 + $0x4] sm:$0xf] %vm381_vm13, %v379_v27  ;;  %vm437_vm13 = vcmask 1044424  }
  0x9a   : > { %v394_v29 = vpop.permute.xlu1 %393  ;;  %v384_v30 = vpop.permute.xlu0 %383 }
  0x9b   : > { %v385_v31 = vrot.slane %v384_v30, 4  ;;  %v395_v32 = vrot.slane %v394_v29, 4 }
  0x9d   : > { %v387_v33 = vsel %vm386_vm1, %v384_v30, %v385_v31  ;;  %vm439_vm1 = vmor %vm438_vm14, %vm437_vm13  ;;  %vm712_vm13 = vcmask 850944   ;;  %vm740_vm14 = vcmask 842752  }
  0x9e   : > { %392 = vst.msk [vmem:[#allocation2 + $0x4] sm:$0xff] %vm391_vm2, %v387_v33  ;;  %v408_v34 = vpop.permute.xlu1 %407  ;;  %v400_v35 = vpop.permute.xlu0 %399  ;;  %vm445_vm2 = vcmask 248952  }
  0x9f   : > { %v409_v36 = vrot.slane %v408_v34, 4  ;;  %398 = vst.msk [vmem:[#allocation2 + $0x8] sm:$0xf] %vm397_vm3, %v395_v32  ;;  %v401_v37 = vrot.slane %v400_v35, 4  ;;  %v3075_v32 = vmov 17   ;;  %vm488_vm3 = vcmask 1039360  }
  0xa1   : > { %v411_v38 = vsel %vm410_vm4, %v408_v34, %v409_v36  ;;  %v403_v39 = vsel %vm402_vm5, %v400_v35, %v401_v37  ;;  %v3077_v36 = vmov 18   ;;  %vm516_vm4 = vcmask 1031168  }
  0xa2   : > { %406 = vst.msk [vmem:[#allocation2 + $0x8] sm:$0xf] %vm405_vm7, %v403_v39  ;;  %v424_v40 = vpop.permute.xlu1 %423  ;;  %v416_v41 = vpop.permute.xlu0 %415  ;;  %vm544_vm5 = vcmask 1022976   ;;  %vm572_vm7 = vcmask 1014784  }
  0xa3   : > { %v425_v42 = vrot.slane %v424_v40, 4  ;;  %414 = vst.msk [vmem:[#allocation2 + $0x8] sm:$0xf] %vm413_vm8, %v411_v38  ;;  %v417_v43 = vrot.slane %v416_v41, 4  ;;  %vm600_vm8 = vcmask 1006592  }
  0xa5   : > { %v427_v44 = vsel %vm426_vm9, %v424_v40, %v425_v42  ;;  %v419_v45 = vsel %vm418_vm10, %v416_v41, %v417_v43  ;;  %v3305_v60 = vld [vmem:[#allocation2] sm:$0xff]  ;;  %v3078_v40 = vmov 19   ;;  %vm628_vm9 = vcmask 998400  }
  0xa6   : > { %422 = vst.msk [vmem:[#allocation2 + $0x8] sm:$0xf] %vm421_vm11, %v419_v45  ;;  %v442_v46 = vpop.permute.xlu1 %441  ;;  %v432_v47 = vpop.permute.xlu0 %431  ;;  %vm656_vm11 = vcmask 867328  }
  0xa7   : > { %430 = vst.msk [vmem:[#allocation2 + $0x8] sm:$0xf] %vm429_vm12, %v427_v44  ;;  %v433_v48 = vrot.slane %v432_v47, 4  ;;  %v443_v52 = vrot.slane %v442_v46, 4  ;;  %v3080_v44 = vmov 22   ;;  %vm684_vm12 = vcmask 859136  }
  0xa9   : > { %v435_v53 = vsel %vm434_vm15, %v432_v47, %v433_v48  ;;  %v3082_v48 = vmov 20   ;;  %vm768_vm15 = vcmask 834560  }
  0xaa   : > { %440 = vst.msk [vmem:[#allocation2 + $0x8] sm:$0xff] %vm439_vm1, %v435_v53  ;;  %2900 = vset.pattern.permute.xlu1 %v3082_v48  ;;  %v3085_v53 = vmov 28   ;;  %vm796_vm1 = vcmask 826368  }
  0xab   : > { %446 = vst.msk [vmem:[#allocation2 + $0xc] sm:$0xf] %vm445_vm2, %v443_v52  ;;  %vm824_vm2 = vcmask 818176  }
  0xb1   : > { %v3321_v21 = vld [vmem:[#allocation2 + $0x8] sm:$0xf] }
  0xb3   : > { %v468_v57 = vpop.permute.xlu1 %467  ;;  %v524_v58 = vpop.permute.xlu0 %523 }
  0xb4   : > { %v475_v59 = vrot.slane %v468_v57, %v3302_v56  ;;  %v3309_v62 = vrot.slane %v524_v58, %v3302_v56 }
  0xb6   : > { %v477_v61 = vmul.f32 %v475_v59, %v3305_v60  ;;  %v533_v18 = vmul.f32 %v3309_v62, %v3305_v60  ;;  %v478_v25 = vmul.f32 %v475_v59, %v3321_v21  ;;  %v3087_v59 = vmov 31  }
  0xb8   : > { %v496_v63 = vpop.permute.xlu1 %495  ;;  %481 = vrot.lane.b32.xlu1 %v477_v61, %s3070_s23  ;;  %v552_v2 = vpop.permute.xlu0 %551 }
  0xb9   : > { %v3312_v3 = vrot.slane %v496_v63, %v3302_v56  ;;  %v3317_v19 = vrot.slane %v552_v2, %v3302_v56 }
  0xbb   : > { %v505_v20 = vmul.f32 %v3312_v3, %v3305_v60  ;;  %v561_v23 = vmul.f32 %v3317_v19, %v3305_v60 }
  0xbc   : > { %537 = vrot.lane.b32.xlu1 %v533_v18, %s3071_s24  ;;  %v3089_v18 = vmov 34  }
  0xbd   : > { %509 = vrot.lane.b32.xlu0 %v505_v20, %s3072_s25  ;;  %v580_v22 = vpop.permute.xlu0 %579 }
  0xbe   : > { %v3328_v24 = vrot.slane %v580_v22, %v3302_v56 }
  0xc0   : > { %565 = vrot.lane.b32.xlu1 %v561_v23, %s3073_s27  ;;  %v589_v26 = vmul.f32 %v3328_v24, %v3305_v60 }
  0xc1   : > { %483 = vrot.lane.b32.xlu0 %v478_v25, %s3070_s23  ;;  %s3084_s23 = smov 102   ;;  %v3091_v25 = vmov 37  }
  0xc2   : > { %v608_v27 = vpop.permute.xlu0 %607 }
  0xc3   : > { %v3335_v28 = vrot.slane %v608_v27, %v3302_v56  ;;  %v506_v27 = vmul.f32 %v3312_v3, %v3321_v21  ;;  %v590_v3 = vmul.f32 %v3328_v24, %v3321_v21 }
  0xc4   : > { %593 = vrot.lane.b32.xlu1 %v589_v26, %s3047_s22 }
  0xc5   : > { %v617_v29 = vmul.f32 %v3335_v28, %v3305_v60  ;;  %891 = vperm.xlu0 %2896, %v3267_v4  }
  0xc7   : > { %v636_v30 = vpop.permute.xlu0 %635 }
  0xc8   : > { %v3342_v31 = vrot.slane %v636_v30, %v3302_v56  ;;  %621 = vrot.lane.b32.xlu1 %v617_v29, %s3074_s29  ;;  %v3093_v29 = vmov 40   ;;  %v534_v30 = vmul.f32 %v3309_v62, %v3321_v21  ;;  %v3096_v62 = vmov 0  }
  0xc9   : > { %2897 = vset.pattern.permute.xlu0 %v3075_v32  ;;  %v3094_v32 = vmov 43  }
  0xca   : > { %v645_v33 = vmul.f32 %v3342_v31, %v3305_v60  ;;  %920 = vperm.xlu0 %2897, %v3267_v4  }
  0xcc   : > { %649 = vrot.lane.b32.xlu1 %v645_v33, %s3076_s14  ;;  %v664_v34 = vpop.permute.xlu0 %663  ;;  %v562_v33 = vmul.f32 %v3317_v19, %v3321_v21  ;;  %v646_v19 = vmul.f32 %v3342_v31, %v3321_v21 }
  0xcd   : > { %v3350_v35 = vrot.slane %v664_v34, %v3302_v56  ;;  %v3095_v34 = vmov 46  }
  0xce   : > { %2898 = vset.pattern.permute.xlu0 %v3077_v36  ;;  %v618_v36 = vmul.f32 %v3335_v28, %v3321_v21 }
  0xcf   : > { %v673_v37 = vmul.f32 %v3350_v35, %v3305_v60  ;;  %948 = vperm.xlu0 %2898, %v3267_v4   ;;  %v674_v24 = vmul.f32 %v3350_v35, %v3321_v21 }
  0xd1   : > { %677 = vrot.lane.b32.xlu1 %v673_v37, %s3046_s21  ;;  %v692_v38 = vpop.permute.xlu0 %691 }
  0xd2   : > { %v3357_v39 = vrot.slane %v692_v38, %v3302_v56 }
  0xd3   : > { %2899 = vset.pattern.permute.xlu0 %v3078_v40 }
  0xd4   : > { %v701_v41 = vmul.f32 %v3357_v39, %v3305_v60  ;;  %977 = vperm.xlu0 %2899, %v3267_v4   ;;  %v702_v37 = vmul.f32 %v3357_v39, %v3321_v21  ;;  %v3436_v39 = vld [vmem:[#allocation2 + $0x8] sm:$0xff] }
  0xd6   : > { %705 = vrot.lane.b32.xlu1 %v701_v41, %s3079_s16  ;;  %v720_v42 = vpop.permute.xlu0 %719 }
  0xd7   : > { %v3364_v43 = vrot.slane %v720_v42, %v3302_v56 }
  0xd8   : > { %2902 = vset.pattern.permute.xlu0 %v3080_v44 }
  0xd9   : > { %v729_v45 = vmul.f32 %v3364_v43, %v3305_v60  ;;  %1064 = vperm.xlu0 %2902, %v3267_v4   ;;  %v730_v28 = vmul.f32 %v3364_v43, %v3321_v21 }
  0xdb   : > { %733 = vrot.lane.b32.xlu1 %v729_v45, %s3081_s17  ;;  %v748_v46 = vpop.permute.xlu0 %747 }
  0xdc   : > { %v3371_v47 = vrot.slane %v748_v46, %v3302_v56 }
  0xdd   : > { %2905 = vset.pattern.permute.xlu0 %v3083_v49 }
  0xde   : > { %v757_v50 = vmul.f32 %v3371_v47, %v3305_v60  ;;  %1151 = vperm.xlu0 %2905, %v3267_v4   ;;  %v758_v31 = vmul.f32 %v3371_v47, %v3321_v21 }
  0xe0   : > { %761 = vrot.lane.b32.xlu1 %v757_v50, %s3084_s23  ;;  %v776_v51 = vpop.permute.xlu0 %775 }
  0xe1   : > { %v3378_v52 = vrot.slane %v776_v51, %v3302_v56 }
  0xe2   : > { %2908 = vset.pattern.permute.xlu0 %v3085_v53 }
  0xe3   : > { %v785_v54 = vmul.f32 %v3378_v52, %v3305_v60  ;;  %1238 = vperm.xlu0 %2908, %v3267_v4   ;;  %v786_v35 = vmul.f32 %v3378_v52, %v3321_v21 }
  0xe5   : > { %789 = vrot.lane.b32.xlu1 %v785_v54, %s4401_s28  ;;  %v804_v57 = vpop.permute.xlu0 %803  ;;  %s3090_s28 = smov 84  }
  0xe6   : > { %v811_v58 = vrot.slane %v804_v57, %v3302_v56 }
  0xe7   : > { %2911 = vset.pattern.permute.xlu0 %v3087_v59 }
  0xe8   : > { %v813_v61 = vmul.f32 %v811_v58, %v3305_v60  ;;  %1325 = vperm.xlu0 %2911, %v3267_v4   ;;  %v814_v38 = vmul.f32 %v811_v58, %v3321_v21 }
  0xea   : > { %817 = vrot.lane.b32.xlu1 %v813_v61, %s4402_s26  ;;  %v834_v63 = vpop.permute.xlu0 %833  ;;  %s3092_s26 = smov 83  }
  0xeb   : > { %v841_v2 = vrot.slane %v834_v63, %v3302_v56 }
  0xec   : > { %2914 = vset.pattern.permute.xlu0 %v3089_v18 }
  0xed   : > { %v843_v20 = vmul.f32 %v841_v2, %v3305_v60  ;;  %1412 = vperm.xlu0 %2914, %v3267_v4   ;;  %v844_v40 = vmul.f32 %v841_v2, %v3436_v39 }
  0xef   : > { %847 = vrot.lane.b32.xlu1 %v843_v20, %s3090_s28  ;;  %v863_v22 = vpop.permute.xlu0 %862 }
  0xf0   : > { %v870_v23 = vrot.slane %v863_v22, %v3302_v56 }
  0xf1   : > { %2917 = vset.pattern.permute.xlu0 %v3091_v25 }
  0xf2   : > { %v872_v26 = vmul.f32 %v870_v23, %v3305_v60  ;;  %1499 = vperm.xlu0 %2917, %v3267_v4   ;;  %v873_v41 = vmul.f32 %v870_v23, %v3436_v39 }
  0xf4   : > { %876 = vrot.lane.b32.xlu1 %v872_v26, %s3092_s26 }
  0xf6   : > { %2920 = vset.pattern.permute.xlu0 %v3093_v29 }
  0xf7   : > { %1586 = vperm.xlu0 %2920, %v3267_v4  }
  0xf8   : > { %511 = vrot.lane.b32.xlu1 %v506_v27, %s3072_s25  ;;  %s3098_s25 = smov 79  }
  0xfb   : > { %2923 = vset.pattern.permute.xlu0 %v3094_v32 }
  0xfc   : > { %1672 = vperm.xlu0 %2923, %v3267_v4   ;;  %539 = vrot.lane.b32.xlu1 %v534_v30, %s3071_s24  ;;  %s4417_s24 = smov 101  }
 0x100   : > { %2926 = vset.pattern.permute.xlu0 %v3095_v34  ;;  %567 = vrot.lane.b32.xlu1 %v562_v33, %s3073_s27  ;;  %v3100_v34 = vmov 21  }
 0x101   : > { %1754 = vperm.xlu0 %2926, %v3267_v4  }
 0x104   : > { %595 = vrot.lane.b32.xlu1 %v590_v3, %s3047_s22 }
 0x105   : > { %2927 = vset.pattern.permute.xlu0 %v3096_v62 }
 0x106   : > { %452 = vperm.xlu0 %2927, %v3267_v4  }
 0x108   : > { %623 = vrot.lane.b32.xlu1 %v618_v36, %s3074_s29  ;;  %v3101_v36 = vmov 23  }
 0x10c   : > { %651 = vrot.lane.b32.xlu1 %v646_v19, %s3076_s14  ;;  %s3099_s14 = smov 80  }
 0x110   : > { %679 = vrot.lane.b32.xlu1 %v674_v24, %s3046_s21  ;;  %s4418_s21 = smov 100   ;;  %v3102_v24 = vmov 24  }
 0x114   : > { %707 = vrot.lane.b32.xlu1 %v702_v37, %s3079_s16 }
 0x118   : > { %735 = vrot.lane.b32.xlu1 %v730_v28, %s3081_s17  ;;  %v3103_v28 = vmov 26   ;;  %s3119_s17 = smov 78  }
 0x11c   : > { %763 = vrot.lane.b32.xlu1 %v758_v31, %s3084_s23  ;;  %s3120_s23 = smov 62  }
 0x120   : > { %791 = vrot.lane.b32.xlu1 %v786_v35, %s4417_s24  ;;  %v3104_v35 = vmov 27   ;;  %s3121_s24 = smov 61  }
 0x124   : > { %819 = vrot.lane.b32.xlu1 %v814_v38, %s4418_s21  ;;  %s3122_s21 = smov 60  }
 0x128   : > { %849 = vrot.lane.b32.xlu1 %v844_v40, %s3090_s28  ;;  %s4419_s28 = smov 81   ;;  %v3105_v40 = vmov 29  }
 0x12a   : > { %v3441_v42 = vpop.permute.xlu1 %481 }
 0x12c   : > { %878 = vrot.lane.b32.xlu1 %v873_v41, %s3092_s26  ;;  %s3097_s26 = smov 82  }
 0x12e   : > { %v3444_v43 = vpop.permute.xlu1 %537 }
 0x12f   : > { %v3448_v45 = vpop.permute.xlu0 %509 }
 0x132   : > { %v3446_v44 = vpop.permute.xlu1 %565 }
 0x133   : > { %v3454_v48 = vpop.permute.xlu0 %483 }
 0x136   : > { %v3450_v46 = vpop.permute.xlu1 %593 }
 0x13a   : > { %v3452_v47 = vpop.permute.xlu1 %621 }
 0x13e   : > { %v3456_v49 = vpop.permute.xlu1 %649 }
 0x140   : > { %v892_v50 = vpop.permute.xlu0 %891 }
 0x141   : > { %v899_v51 = vrot.slane %v892_v50, %v3302_v56  ;;  %v3106_v50 = vmov 30  }
 0x143   : > { %v901_v52 = vmul.f32 %v899_v51, %v3305_v60  ;;  %v3460_v53 = vpop.permute.xlu1 %677  ;;  %v902_v57 = vmul.f32 %v899_v51, %v3436_v39 }
 0x145   : > { %905 = vrot.lane.b32.xlu1 %v901_v52, %s3097_s26  ;;  %v921_v54 = vpop.permute.xlu0 %920  ;;  %v3107_v52 = vmov 32  }
 0x146   : > { %v928_v58 = vrot.slane %v921_v54, %v3302_v56 }
 0x148   : > { %v3464_v59 = vpop.permute.xlu1 %705  ;;  %v930_v63 = vmul.f32 %v928_v58, %v3305_v60  ;;  %v931_v18 = vmul.f32 %v928_v58, %v3436_v39  ;;  %v3109_v58 = vmov 35  }
 0x149   : > { %907 = vrot.lane.b32.xlu1 %v902_v57, %s3097_s26  ;;  %v3108_v57 = vmov 33   ;;  %s3123_s26 = smov 59  }
 0x14a   : > { %v949_v61 = vpop.permute.xlu0 %948 }
 0x14b   : > { %v956_v20 = vrot.slane %v949_v61, %v3302_v56 }
 0x14d   : > { %v3467_v2 = vpop.permute.xlu1 %733  ;;  %934 = vrot.lane.b32.xlu1 %v930_v63, %s4419_s28  ;;  %v958_v27 = vmul.f32 %v956_v20, %v3305_v60  ;;  %v959_v29 = vmul.f32 %v956_v20, %v3436_v39  ;;  %v3110_v63 = vmov 36   ;;  %v3111_v20 = vmov 38  }
 0x14f   : > { %v978_v22 = vpop.permute.xlu0 %977 }
 0x150   : > { %v3473_v23 = vrot.slane %v978_v22, %v3302_v56 }
 0x151   : > { %936 = vrot.lane.b32.xlu1 %v931_v18, %s4419_s28  ;;  %s3124_s28 = smov 58  }
 0x152   : > { %v987_v25 = vmul.f32 %v3473_v23, %v3305_v60  ;;  %v3478_v26 = vpop.permute.xlu1 %761 }
 0x154   : > { %991 = vrot.lane.b32.xlu0 %v987_v25, %s3098_s25  ;;  %v3112_v25 = vmov 39  }
 0x155   : > { %962 = vrot.lane.b32.xlu1 %v958_v27, %s3099_s14 }
 0x157   : > { %v3484_v30 = vpop.permute.xlu1 %789 }
 0x159   : > { %964 = vrot.lane.b32.xlu1 %v959_v29, %s3099_s14  ;;  %v3113_v29 = vmov 41  }
 0x15c   : > { %v3487_v32 = vpop.permute.xlu1 %817 }
 0x15d   : > { %1006 = vperm.xlu1 %2900, %v3267_v4  }
 0x161   : > { %v3490_v33 = vpop.permute.xlu1 %847  ;;  %2901 = vset.pattern.permute.xlu1 %v3100_v34 }
 0x162   : > { %1035 = vperm.xlu1 %2901, %v3267_v4  }
 0x166   : > { %v3493_v3 = vpop.permute.xlu1 %876  ;;  %2903 = vset.pattern.permute.xlu1 %v3101_v36  ;;  %v3114_v36 = vmov 42  }
 0x167   : > { %1093 = vperm.xlu1 %2903, %v3267_v4  }
 0x16a   : > { %v3496_v19 = vpop.permute.xlu1 %511 }
 0x16b   : > { %2904 = vset.pattern.permute.xlu1 %v3102_v24  ;;  %v3115_v24 = vmov 44  }
 0x16c   : > { %1122 = vperm.xlu1 %2904, %v3267_v4  }
 0x16e   : > { %v3499_v37 = vpop.permute.xlu1 %539 }
 0x170   : > { %2906 = vset.pattern.permute.xlu1 %v3103_v28 }
 0x171   : > { %1180 = vperm.xlu1 %2906, %v3267_v4  }
 0x172   : > { %v3502_v31 = vpop.permute.xlu1 %567 }
 0x175   : > { %2907 = vset.pattern.permute.xlu1 %v3104_v35  ;;  %v3116_v35 = vmov 45  }
 0x176   : > { %1209 = vperm.xlu1 %2907, %v3267_v4   ;;  %v3505_v38 = vpop.permute.xlu1 %595 }
 0x17a   : > { %2909 = vset.pattern.permute.xlu1 %v3105_v40  ;;  %v3508_v41 = vpop.permute.xlu1 %623 }
 0x17b   : > { %1267 = vperm.xlu1 %2909, %v3267_v4  }
 0x17e   : > { %v3511_v51 = vpop.permute.xlu1 %651 }
 0x17f   : > { %2910 = vset.pattern.permute.xlu1 %v3106_v50  ;;  %v3117_v50 = vmov 47  }
 0x180   : > { %1296 = vperm.xlu1 %2910, %v3267_v4  }
 0x182   : > { %v3514_v54 = vpop.permute.xlu1 %679 }
 0x184   : > { %2912 = vset.pattern.permute.xlu1 %v3107_v52 }
 0x185   : > { %1354 = vperm.xlu1 %2912, %v3267_v4  }
 0x186   : > { %v3517_v61 = vpop.permute.xlu1 %707 }
 0x189   : > { %2913 = vset.pattern.permute.xlu1 %v3108_v57  ;;  %v3118_v57 = vmov 48  }
 0x18a   : > { %1383 = vperm.xlu1 %2913, %v3267_v4   ;;  %v3521_v18 = vpop.permute.xlu1 %735 }
 0x18e   : > { %2915 = vset.pattern.permute.xlu1 %v3109_v58  ;;  %v3524_v22 = vpop.permute.xlu1 %763 }
 0x18f   : > { %1441 = vperm.xlu1 %2915, %v3267_v4  }
 0x192   : > { %v3527_v27 = vpop.permute.xlu1 %791 }
 0x193   : > { %2916 = vset.pattern.permute.xlu1 %v3110_v63  ;;  %v988_v63 = vmul.f32 %v3473_v23, %v3436_v39  ;;  %v1065_v23 = vpop.permute.xlu0 %1064 }
 0x194   : > { %1470 = vperm.xlu1 %2916, %v3267_v4   ;;  %v1072_v17 = vrot.slane %v1065_v23, %v3302_v56 }
 0x196   : > { %v3530_v34 = vpop.permute.xlu1 %819 }
 0x197   : > { %v1152_v11 = vpop.permute.xlu0 %1151 }
 0x198   : > { %2918 = vset.pattern.permute.xlu1 %v3111_v20 }
 0x199   : > { %1528 = vperm.xlu1 %2918, %v3267_v4  }
 0x19a   : > { %v3533_v28 = vpop.permute.xlu1 %849 }
 0x19d   : > { %2919 = vset.pattern.permute.xlu1 %v3112_v25 }
 0x19e   : > { %1557 = vperm.xlu1 %2919, %v3267_v4   ;;  %v3537_v40 = vpop.permute.xlu1 %878 }
 0x1a2   : > { %2921 = vset.pattern.permute.xlu1 %v3113_v29 }
 0x1a3   : > { %1614 = vperm.xlu1 %2921, %v3267_v4  }
 0x1a7   : > { %2922 = vset.pattern.permute.xlu1 %v3114_v36 }
 0x1a8   : > { %1645 = vperm.xlu1 %2922, %v3267_v4  }
 0x1ac   : > { %2924 = vset.pattern.permute.xlu1 %v3115_v24 }
 0x1ad   : > { %1699 = vperm.xlu1 %2924, %v3267_v4  }
 0x1b1   : > { %2925 = vset.pattern.permute.xlu1 %v3116_v35 }
 0x1b2   : > { %1726 = vperm.xlu1 %2925, %v3267_v4  }
 0x1b6   : > { %2928 = vset.pattern.permute.xlu1 %v3117_v50 }
 0x1b7   : > { %v3539_v52 = vpop.permute.xlu1 %905  ;;  %1782 = vperm.xlu1 %2928, %v3267_v4  }
 0x1bb   : > { %2929 = vset.pattern.permute.xlu1 %v3118_v57  ;;  %v3542_v58 = vpop.permute.xlu1 %907 }
 0x1bc   : > { %1810 = vperm.xlu1 %2929, %v3267_v4  }
 0x1bf   : > { %v3549_v20 = vpop.permute.xlu1 %934 }
 0x1c0   : > { %993 = vrot.lane.b32.xlu1 %v988_v63, %s3098_s25  ;;  %s3125_s25 = smov 57  }
 0x1c1   : > { %2930 = vset.pattern.permute.xlu1 %v3096_v62 }
 0x1c3   : > { %v3551_v25 = vpop.permute.xlu1 %936 }
 0x1c7   : > { %v3553_v29 = vpop.permute.xlu1 %962 }
 0x1cb   : > { %v3555_v36 = vpop.permute.xlu1 %964 }
 0x1d8   : > { %v1007_v24 = vpop.permute.xlu1 %1006 }
 0x1d9   : > { %v1014_v35 = vrot.slane %v1007_v24, %v3302_v56  ;;  %v1074_v24 = vmul.f32 %v1072_v17, %v3305_v60 }
 0x1db   : > { %v1016_v4 = vmul.f32 %v1014_v35, %v3305_v60  ;;  %v1017_v50 = vmul.f32 %v1014_v35, %v3436_v39  ;;  %v1075_v35 = vmul.f32 %v1072_v17, %v3436_v39 }
 0x1dd   : > { %v1036_v57 = vpop.permute.xlu1 %1035  ;;  %1022 = vrot.lane.b32.xlu1 %v1017_v50, %s3119_s17  ;;  %1020 = vrot.lane.b32.xlu0 %v1016_v4, %s3119_s17  ;;  %s3126_s17 = smov 56  }
 0x1de   : > { %v1043_v63 = vrot.slane %v1036_v57, %v3302_v56 }
 0x1e0   : > { %v1045_v16 = vmul.f32 %v1043_v63, %v3305_v60  ;;  %v1046_v14 = vmul.f32 %v1043_v63, %v3436_v39 }
 0x1e2   : > { %v1094_v13 = vpop.permute.xlu1 %1093  ;;  %1051 = vrot.lane.b32.xlu1 %v1046_v14, %s3120_s23  ;;  %1049 = vrot.lane.b32.xlu0 %v1045_v16, %s3120_s23  ;;  %v1159_v14 = vrot.slane %v1152_v11, %v3302_v56 }
 0x1e3   : > { %v1101_v4 = vrot.slane %v1094_v13, %v3302_v56 }
 0x1e5   : > { %v1103_v23 = vmul.f32 %v1101_v4, %v3305_v60  ;;  %v1104_v57 = vmul.f32 %v1101_v4, %v3436_v39 }
 0x1e6   : > { %1080 = vrot.lane.b32.xlu1 %v1075_v35, %s3121_s24  ;;  %1078 = vrot.lane.b32.xlu0 %v1074_v24, %s3121_s24  ;;  %v1161_v24 = vmul.f32 %v1159_v14, %v3305_v60  ;;  %v1162_v35 = vmul.f32 %v1159_v14, %v3436_v39  ;;  %s3127_s24 = smov 40  }
 0x1e7   : > { %v1123_v50 = vpop.permute.xlu1 %1122 }
 0x1e8   : > { %v1130_v63 = vrot.slane %v1123_v50, %v3302_v56 }
 0x1ea   : > { %1109 = vrot.lane.b32.xlu1 %v1104_v57, %s3122_s21  ;;  %1107 = vrot.lane.b32.xlu0 %v1103_v23, %s3122_s21  ;;  %v1132_v16 = vmul.f32 %v1130_v63, %v3305_v60  ;;  %v1133_v13 = vmul.f32 %v1130_v63, %v3436_v39  ;;  %v1239_v63 = vpop.permute.xlu0 %1238  ;;  %s3128_s21 = smov 39  }
 0x1ec   : > { %v1181_v17 = vpop.permute.xlu1 %1180 }
 0x1ed   : > { %v1188_v4 = vrot.slane %v1181_v17, %v3302_v56 }
 0x1ee   : > { %1138 = vrot.lane.b32.xlu1 %v1133_v13, %s3123_s26  ;;  %1136 = vrot.lane.b32.xlu0 %v1132_v16, %s3123_s26  ;;  %v1246_v13 = vrot.slane %v1239_v63, %v3302_v56  ;;  %v1326_v63 = vpop.permute.xlu0 %1325  ;;  %s4414_s26 = smov 38  }
 0x1ef   : > { %v1190_v11 = vmul.f32 %v1188_v4, %v3305_v60  ;;  %v1191_v23 = vmul.f32 %v1188_v4, %v3436_v39 }
 0x1f1   : > { %v1210_v50 = vpop.permute.xlu1 %1209 }
 0x1f2   : > { %1167 = vrot.lane.b32.xlu1 %v1162_v35, %s3124_s28  ;;  %1165 = vrot.lane.b32.xlu0 %v1161_v24, %s3124_s28  ;;  %v1217_v57 = vrot.slane %v1210_v50, %v3302_v56  ;;  %v1248_v24 = vmul.f32 %v1246_v13, %v3305_v60  ;;  %v1249_v35 = vmul.f32 %v1246_v13, %v3436_v39  ;;  %s3130_s28 = smov 37  }
 0x1f4   : > { %v1219_v14 = vmul.f32 %v1217_v57, %v3305_v60  ;;  %v1220_v17 = vmul.f32 %v1217_v57, %v3436_v39 }
 0x1f6   : > { %1196 = vrot.lane.b32.xlu1 %v1191_v23, %s3125_s25  ;;  %1194 = vrot.lane.b32.xlu0 %v1190_v11, %s3125_s25  ;;  %v1268_v16 = vpop.permute.xlu1 %1267  ;;  %s3131_s25 = smov 36  }
 0x1f7   : > { %v1275_v4 = vrot.slane %v1268_v16, %v3302_v56 }
 0x1f9   : > { %v1277_v11 = vmul.f32 %v1275_v4, %v3305_v60  ;;  %v1278_v23 = vmul.f32 %v1275_v4, %v3436_v39 }
 0x1fa   : > { %1225 = vrot.lane.b32.xlu1 %v1220_v17, %s3126_s17  ;;  %1223 = vrot.lane.b32.xlu0 %v1219_v14, %s3126_s17  ;;  %v1333_v17 = vrot.slane %v1326_v63, %v3302_v56  ;;  %v1413_v63 = vpop.permute.xlu0 %1412 }
 0x1fb   : > { %v1297_v50 = vpop.permute.xlu1 %1296 }
 0x1fc   : > { %v1304_v57 = vrot.slane %v1297_v50, %v3302_v56 }
 0x1fe   : > { %1254 = vrot.lane.b32.xlu1 %v1249_v35, %s3127_s24  ;;  %1252 = vrot.lane.b32.xlu0 %v1248_v24, %s3127_s24  ;;  %v1306_v13 = vmul.f32 %v1304_v57, %v3305_v60  ;;  %v1307_v16 = vmul.f32 %v1304_v57, %v3436_v39  ;;  %v1335_v24 = vmul.f32 %v1333_v17, %v3305_v60  ;;  %s3132_s24 = smov 35  }
 0x1ff   : > { %v1336_v35 = vmul.f32 %v1333_v17, %v3436_v39 }
 0x200   : > { %v1355_v14 = vpop.permute.xlu1 %1354 }
 0x201   : > { %v1362_v4 = vrot.slane %v1355_v14, %v3302_v56 }
 0x202   : > { %1283 = vrot.lane.b32.xlu1 %v1278_v23, %s3128_s21  ;;  %1281 = vrot.lane.b32.xlu0 %v1277_v11, %s3128_s21  ;;  %s3133_s21 = smov 34  }
 0x203   : > { %v1364_v11 = vmul.f32 %v1362_v4, %v3305_v60  ;;  %v1365_v23 = vmul.f32 %v1362_v4, %v3436_v39 }
 0x205   : > { %v1384_v50 = vpop.permute.xlu1 %1383 }
 0x206   : > { %1312 = vrot.lane.b32.xlu1 %v1307_v16, %s4414_s26  ;;  %1310 = vrot.lane.b32.xlu0 %v1306_v13, %s4414_s26  ;;  %v1391_v57 = vrot.slane %v1384_v50, %v3302_v56  ;;  %v1420_v16 = vrot.slane %v1413_v63, %v3302_v56  ;;  %s3149_s26 = smov 116  }
 0x208   : > { %v1393_v17 = vmul.f32 %v1391_v57, %v3305_v60  ;;  %v1394_v14 = vmul.f32 %v1391_v57, %v3436_v39  ;;  %v1500_v57 = vpop.permute.xlu0 %1499 }
 0x20a   : > { %1341 = vrot.lane.b32.xlu1 %v1336_v35, %s3130_s28  ;;  %1339 = vrot.lane.b32.xlu0 %v1335_v24, %s3130_s28  ;;  %v1442_v13 = vpop.permute.xlu1 %1441  ;;  %v1422_v24 = vmul.f32 %v1420_v16, %v3305_v60  ;;  %v1423_v35 = vmul.f32 %v1420_v16, %v3436_v39  ;;  %s3134_s28 = smov 18  }
 0x20b   : > { %v1449_v4 = vrot.slane %v1442_v13, %v3302_v56 }
 0x20e   : > { %1370 = vrot.lane.b32.xlu1 %v1365_v23, %s3131_s25  ;;  %1368 = vrot.lane.b32.xlu0 %v1364_v11, %s3131_s25  ;;  %v1451_v11 = vmul.f32 %v1449_v4, %v3305_v60  ;;  %v1452_v23 = vmul.f32 %v1449_v4, %v3436_v39  ;;  %s3135_s25 = smov 17  }
 0x20f   : > { %v1471_v50 = vpop.permute.xlu1 %1470 }
 0x210   : > { %v1478_v63 = vrot.slane %v1471_v50, %v3302_v56 }
 0x212   : > { %1399 = vrot.lane.b32.xlu1 %v1394_v14, %s3132_s24  ;;  %1397 = vrot.lane.b32.xlu0 %v1393_v17, %s3132_s24  ;;  %v1507_v14 = vrot.slane %v1500_v57, %v3302_v56  ;;  %v1480_v16 = vmul.f32 %v1478_v63, %v3305_v60  ;;  %v1481_v13 = vmul.f32 %v1478_v63, %v3436_v39  ;;  %s3136_s24 = smov 16   ;;  %v1587_v63 = vpop.permute.xlu0 %1586 }
 0x214   : > { %v1529_v17 = vpop.permute.xlu1 %1528 }
 0x215   : > { %v1536_v4 = vrot.slane %v1529_v17, %v3302_v56 }
 0x216   : > { %1428 = vrot.lane.b32.xlu1 %v1423_v35, %s3133_s21  ;;  %1426 = vrot.lane.b32.xlu0 %v1422_v24, %s3133_s21  ;;  %v1509_v24 = vmul.f32 %v1507_v14, %v3305_v60  ;;  %v1510_v35 = vmul.f32 %v1507_v14, %v3436_v39  ;;  %s3137_s21 = smov 15  }
 0x219   : > { %v1558_v50 = vpop.permute.xlu1 %1557 }
 0x21a   : > { %1457 = vrot.lane.b32.xlu1 %v1452_v23, %s3134_s28  ;;  %1455 = vrot.lane.b32.xlu0 %v1451_v11, %s3134_s28  ;;  %v1538_v11 = vmul.f32 %v1536_v4, %v3305_v60  ;;  %v1539_v23 = vmul.f32 %v1536_v4, %v3436_v39  ;;  %v1565_v57 = vrot.slane %v1558_v50, %v3302_v56  ;;  %s3138_s28 = smov 14  }
 0x21c   : > { %v1567_v14 = vmul.f32 %v1565_v57, %v3305_v60  ;;  %v1568_v17 = vmul.f32 %v1565_v57, %v3436_v39 }
 0x21e   : > { %1486 = vrot.lane.b32.xlu1 %v1481_v13, %s3135_s25  ;;  %1484 = vrot.lane.b32.xlu0 %v1480_v16, %s3135_s25  ;;  %v1615_v16 = vpop.permute.xlu1 %1614  ;;  %v1594_v13 = vrot.slane %v1587_v63, %v3302_v56  ;;  %s4420_s25 = smov 13   ;;  %v1673_v63 = vpop.permute.xlu0 %1672 }
 0x21f   : > { %v1622_v4 = vrot.slane %v1615_v16, %v3302_v56 }
 0x222   : > { %1515 = vrot.lane.b32.xlu1 %v1510_v35, %s3136_s24  ;;  %1513 = vrot.lane.b32.xlu0 %v1509_v24, %s3136_s24  ;;  %v1596_v24 = vmul.f32 %v1594_v13, %v3305_v60  ;;  %v1597_v35 = vmul.f32 %v1594_v13, %v3436_v39  ;;  %s3139_s24 = smov 12   ;;  %v3634_v13 = vld [vmem:[#allocation2 + $0xc] sm:$0xf] }
 0x223   : > { %v1646_v50 = vpop.permute.xlu1 %1645 }
 0x224   : > { %v1653_v57 = vrot.slane %v1646_v50, %v3302_v56 }
 0x226   : > { %1544 = vrot.lane.b32.xlu1 %v1539_v23, %s3137_s21  ;;  %1542 = vrot.lane.b32.xlu0 %v1538_v11, %s3137_s21  ;;  %v1624_v11 = vmul.f32 %v1622_v4, %v3305_v60  ;;  %v1625_v23 = vmul.f32 %v1622_v4, %v3436_v39  ;;  %v1755_v39 = vpop.permute.xlu0 %1754  ;;  %s3142_s21 = smov 119  }
 0x228   : > { %v1700_v16 = vpop.permute.xlu1 %1699 }
 0x22a   : > { %1573 = vrot.lane.b32.xlu1 %v1568_v17, %s3138_s28  ;;  %1571 = vrot.lane.b32.xlu0 %v1567_v14, %s3138_s28  ;;  %v3632_v14 = vld [vmem:[#allocation2 + $0x4] sm:$0xff]  ;;  %v1680_v17 = vrot.slane %v1673_v63, %v3302_v56  ;;  %v453_v10 = vpop.permute.xlu0 %452  ;;  %s3146_s28 = smov 44  }
 0x22c   : > { %v1682_v4 = vmul.f32 %v1680_v17, %v3632_v14  ;;  %v1683_v50 = vmul.f32 %v1680_v17, %v3634_v13  ;;  %v486_v17 = vrot.slane %v3454_v48, 4 }
 0x22e   : > { %1602 = vrot.lane.b32.xlu1 %v1597_v35, %s4420_s25  ;;  %1600 = vrot.lane.b32.xlu0 %v1596_v24, %s4420_s25  ;;  %v1655_v35 = vmul.f32 %v1653_v57, %v3632_v14  ;;  %v1656_v24 = vmul.f32 %v1653_v57, %v3634_v13  ;;  %s4413_s25 = sand.u32 1, %s3026_s10  }
 0x232   : > { %1630 = vrot.lane.b32.xlu1 %v1625_v23, %s3139_s24  ;;  %1628 = vrot.lane.b32.xlu0 %v1624_v11, %s3139_s24  ;;  %v1707_v11 = vrot.slane %v1700_v16, %v3302_v56  ;;  %v1727_v23 = vpop.permute.xlu1 %1726  ;;  %v1762_v16 = vrot.slane %v1755_v39, %v3302_v56  ;;  %s3143_s24 = smov 118  }
 0x234   : > { %v1709_v63 = vmul.f32 %v1707_v11, %v3632_v14  ;;  %v1710_v57 = vmul.f32 %v1707_v11, %v3634_v13  ;;  %v485_v11 = vrot.slane %v3441_v42, 4  ;;  %v1765_v39 = vmul.f32 %v1762_v16, %v3634_v13 }
 0x236   : > { %1661 = vrot.lane.b32.xlu1 %v1656_v24, %s3073_s27  ;;  %1659 = vrot.lane.b32.xlu0 %v1655_v35, %s3073_s27  ;;  %v1734_v24 = vrot.slane %v1727_v23, %v3302_v56  ;;  %v1783_v35 = vpop.permute.xlu1 %1782  ;;  %v487_v23 = vsel %vm332_vm0, %v485_v11, %v486_v17  ;;  %s3141_s27 = smov 120  }
 0x237   : > { %v1790_v7 = vrot.slane %v1783_v35, %v3302_v56 }
 0x238   : > { %v1737_v8 = vmul.f32 %v1734_v24, %v3634_v13 }
 0x239   : > { %v1793_v35 = vmul.f32 %v1790_v7, %v3634_v13 }
 0x23a   : > { %1688 = vrot.lane.b32.xlu1 %v1683_v50, %s3047_s22  ;;  %1686 = vrot.lane.b32.xlu0 %v1682_v4, %s3047_s22  ;;  %v460_v50 = vrot.slane %v453_v10, %v3302_v56  ;;  %v1736_v4 = vmul.f32 %v1734_v24, %v3632_v14  ;;  %s3140_s22 = smov 121   ;;  %v513_v24 = vrot.slane %v3448_v45, 4  ;;  %v1811_v12 = vpop.permute.xlu1 %1810 }
 0x23b   : > { %v1818_v11 = vrot.slane %v1811_v12, %v3302_v56 }
 0x23c   : > { %v462_v10 = vmul.f32 %v460_v50, %v3305_v60  ;;  %v463_v15 = vmul.f32 %v460_v50, %v3321_v21  ;;  %v1792_v60 = vmul.f32 %v1790_v7, %v3632_v14  ;;  %v541_v50 = vrot.slane %v3444_v43, 4  ;;  %v1837_v7 = vld [vmem:[%s4389_s2] sm:$0xf] }
 0x23e   : > { %1715 = vrot.lane.b32.xlu1 %v1710_v57, %s3074_s29  ;;  %1713 = vrot.lane.b32.xlu0 %v1709_v63, %s3074_s29  ;;  %v514_v63 = vrot.slane %v3496_v19, 4  ;;  %v1764_v57 = vmul.f32 %v1762_v16, %v3632_v14  ;;  %v493_v21 = vadd.f32 %v3454_v48, %v463_v15  ;;  %v570_v15 = vrot.slane %v3502_v31, 4 }
 0x240   : > { %v515_v17 = vsel %vm332_vm0, %v513_v24, %v514_v63  ;;  %v3676_v63 = vpop.permute.xlu1 %993 }
 0x242   : > { %1742 = vrot.lane.b32.xlu1 %v1737_v8, %s3140_s22  ;;  %1740 = vrot.lane.b32.xlu0 %v1736_v4, %s3140_s22  ;;  %v489_v8 = vsel %vm488_vm3, %v3441_v42, %v487_v23  ;;  %v542_v4 = vrot.slane %v3499_v37, 4  ;;  %v517_v42 = vsel %vm516_vm4, %v3448_v45, %v515_v17  ;;  %v3674_v23 = vpop.permute.xlu0 %991  ;;  %v569_v45 = vrot.slane %v3446_v44, 4  ;;  %v1928_v17 = vld [vmem:[%s4390_s3] sm:$0xf]  ;;  %s2715_s22 = sshll.u32 %s4413_s25, 4  ;;  %s3147_s25 = smov 68  }
 0x243   : > { %v492_v16 = vadd.f32 %v489_v8, %v462_v10  ;;  %vm854_vm3 = vcmask 687104   ;;  %vm883_vm4 = vcmask 678912  }
 0x244   : > { %v543_v12 = vsel %vm332_vm0, %v541_v50, %v542_v4  ;;  %v1943_v50 = vld [vmem:[%s4391_s4] sm:$0xf] }
 0x245   : > { %v520_v48 = vadd.f32 %v517_v42, %v492_v16  ;;  %v545_v10 = vsel %vm544_vm5, %v3444_v43, %v543_v12  ;;  %v1821_v16 = vmul.f32 %v1818_v11, %v3634_v13  ;;  %v597_v43 = vrot.slane %v3450_v46, 4 }
 0x246   : > { %1770 = vrot.lane.b32.xlu1 %v1765_v39, %s3141_s27  ;;  %1768 = vrot.lane.b32.xlu0 %v1764_v57, %s3141_s27  ;;  %v1820_v57 = vmul.f32 %v1818_v11, %v3632_v14  ;;  %v521_v39 = vadd.f32 %v3496_v19, %v493_v21  ;;  %v571_v14 = vsel %vm332_vm0, %v569_v45, %v570_v15  ;;  %v598_v19 = vrot.slane %v3505_v38, 4  ;;  %v1958_v21 = vld [vmem:[%s4392_s5] sm:$0xff]  ;;  %s3144_s27 = smov 50  }
 0x247   : > { %v548_v4 = vadd.f32 %v545_v10, %v520_v48  ;;  %v625_v12 = vrot.slane %v3452_v47, 4  ;;  %vm912_vm5 = vcmask 670720  }
 0x248   : > { %v599_v13 = vsel %vm332_vm0, %v597_v43, %v598_v19  ;;  %v681_v43 = vrot.slane %v3460_v53, 4 }
 0x249   : > { %v601_v15 = vsel %vm600_vm8, %v3450_v46, %v599_v13 }
 0x24a   : > { %1798 = vrot.lane.b32.xlu1 %v1793_v35, %s3142_s21  ;;  %1796 = vrot.lane.b32.xlu0 %v1792_v60, %s3142_s21  ;;  %v549_v60 = vadd.f32 %v3499_v37, %v521_v39  ;;  %v573_v35 = vsel %vm572_vm7, %v3446_v44, %v571_v14  ;;  %v626_v37 = vrot.slane %v3508_v41, 4  ;;  %s3145_s21 = smov 74  }
 0x24b   : > { %v576_v11 = vadd.f32 %v573_v35, %v548_v4  ;;  %v682_v4 = vrot.slane %v3514_v54, 4 }
 0x24c   : > { %v577_v44 = vadd.f32 %v3502_v31, %v549_v60  ;;  %v627_v48 = vsel %vm332_vm0, %v625_v12, %v626_v37  ;;  %v653_v31 = vrot.slane %v3456_v49, 4  ;;  %v710_v37 = vrot.slane %v3517_v61, 4  ;;  %v2152_v12 = vld [vmem:[%s4393_s6] sm:$0xff] }
 0x24d   : > { %v604_v39 = vadd.f32 %v601_v15, %v576_v11  ;;  %v629_v46 = vsel %vm628_vm9, %v3452_v47, %v627_v48  ;;  %v1959_v47 = vld [vmem:[%s4392_s5 + $0x8] sm:$0xff]  ;;  %v683_v13 = vsel %vm332_vm0, %v681_v43, %v682_v4 }
 0x24e   : > { %1824 = vrot.lane.b32.xlu1 %v1820_v57, %s3143_s24  ;;  %1840 = vperm.xlu0 %2927, %v1837_v7   ;;  %v654_v57 = vrot.slane %v3511_v51, 4  ;;  %v685_v15 = vsel %vm684_vm12, %v3460_v53, %v683_v13  ;;  %v737_v53 = vrot.slane %v3467_v2, 4  ;;  %v794_v13 = vrot.slane %v3527_v27, 4 }
 0x24f   : > { %v3687_v24 = vpop.permute.xlu1 %1022  ;;  %v3689_v8 = vpop.permute.xlu0 %1020  ;;  %v632_v19 = vadd.f32 %v629_v46, %v604_v39  ;;  %v738_v39 = vrot.slane %v3521_v18, 4  ;;  %vm998_vm12 = vcmask 646144  }
 0x250   : > { %v655_v14 = vsel %vm332_vm0, %v653_v31, %v654_v57 }
 0x251   : > { %v657_v35 = vsel %vm656_vm11, %v3456_v49, %v655_v14  ;;  %v739_v14 = vsel %vm332_vm0, %v737_v53, %v738_v39  ;;  %v851_v53 = vrot.slane %v3490_v33, 4  ;;  %vm969_vm11 = vcmask 654336  }
 0x252   : > { %1826 = vrot.lane.b32.xlu1 %v1821_v16, %s3143_s24  ;;  %1931 = vperm.xlu0 %2927, %v1928_v17   ;;  %v605_v17 = vadd.f32 %v3505_v38, %v577_v44  ;;  %v709_v44 = vrot.slane %v3464_v59, 4  ;;  %s4311_s24 = scalar_lea.vmem [#allocation3], %s2715_s22  ;;  %s3148_s22 = smov 98  }
 0x254   : > { %v3709_v42 = vpop.permute.xlu1 %1051  ;;  %v3711_v7 = vpop.permute.xlu0 %1049  ;;  %v633_v60 = vadd.f32 %v3508_v41, %v605_v17  ;;  %v711_v57 = vsel %vm332_vm0, %v709_v44, %v710_v37 }
 0x255   : > { %v713_v31 = vsel %vm712_vm13, %v3464_v59, %v711_v57  ;;  %v765_v59 = vrot.slane %v3478_v26, 4  ;;  %vm1056_vm13 = vcmask 506880  }
 0x256   : > { %1962 = vperm.xlu0 %2927, %v1958_v21   ;;  %1946 = vperm.xlu1 %2930, %v1943_v50   ;;  %v660_v50 = vadd.f32 %v657_v35, %v632_v19  ;;  %v661_v49 = vadd.f32 %v3511_v51, %v633_v60  ;;  %v766_v19 = vrot.slane %v3524_v22, 4  ;;  %v741_v35 = vsel %vm740_vm14, %v3467_v2, %v739_v14 }
 0x257   : > { %vm1085_vm14 = vcmask 498688  }
 0x258   : > { %v3719_v45 = vpop.permute.xlu1 %1080  ;;  %v3721_v10 = vpop.permute.xlu0 %1078  ;;  %v688_v48 = vadd.f32 %v685_v15, %v660_v50  ;;  %v689_v51 = vadd.f32 %v3514_v54, %v661_v49  ;;  %v3777_v54 = vld [vmem:[%s4394_s7] sm:$0xff] }
 0x25a   : > { %2931 = vset.pattern.permute.xlu1 %v3037_v1  ;;  %2932 = vset.pattern.permute.xlu0 %v3055_v5  ;;  %v716_v46 = vadd.f32 %v713_v31, %v688_v48  ;;  %v717_v43 = vadd.f32 %v3517_v61, %v689_v51  ;;  %v767_v61 = vsel %vm332_vm0, %v765_v59, %v766_v19  ;;  %v822_v48 = vrot.slane %v3530_v34, 4 }
 0x25b   : > { %2012 = vperm.xlu1 %2931, %v1958_v21   ;;  %2059 = vperm.xlu0 %2932, %v1958_v21   ;;  %v769_v2 = vsel %vm768_vm15, %v3478_v26, %v767_v61  ;;  %v821_v26 = vrot.slane %v3487_v32, 4  ;;  %v4421_v61 = vmov 10   ;;  %vm1114_vm15 = vcmask 490496  }
 0x25c   : > { %v3731_v16 = vpop.permute.xlu1 %1109  ;;  %v3733_v38 = vpop.permute.xlu0 %1107  ;;  %v744_v50 = vadd.f32 %v741_v35, %v716_v46  ;;  %v745_v44 = vadd.f32 %v3521_v18, %v717_v43  ;;  %v881_v43 = vrot.slane %v3537_v40, 4 }
 0x25e   : > { %v773_v39 = vadd.f32 %v3524_v22, %v745_v44  ;;  %v823_v22 = vsel %vm332_vm0, %v821_v26, %v822_v48  ;;  %v938_v26 = vrot.slane %v3549_v20, 4 }
 0x25f   : > { %2933 = vset.pattern.permute.xlu1 %v3036_v0  ;;  %2935 = vset.pattern.permute.xlu0 %v3096_v62 }
 0x260   : > { %v3745_v11 = vpop.permute.xlu1 %1138  ;;  %v3747_v41 = vpop.permute.xlu0 %1136  ;;  %2106 = vperm.xlu1 %2933, %v1958_v21   ;;  %1967 = vperm.xlu0 %2935, %v1959_v47   ;;  %v801_v19 = vadd.f32 %v3527_v27, %v773_v39 }
 0x262   : > { %v829_v27 = vadd.f32 %v3530_v34, %v801_v19 }
 0x264   : > { %v3757_v17 = vpop.permute.xlu1 %1167  ;;  %v3759_v21 = vpop.permute.xlu0 %1165  ;;  %2934 = vset.pattern.permute.xlu1 %v3096_v62  ;;  %2938 = vset.pattern.permute.xlu0 %v3036_v0 }
 0x265   : > { %2156 = vperm.xlu1 %2934, %v2152_v12   ;;  %2110 = vperm.xlu0 %2938, %v1959_v47   ;;  %v772_v12 = vadd.f32 %v769_v2, %v744_v50  ;;  %v909_v2 = vrot.slane %v3539_v52, 4 }
 0x268   : > { %v3768_v4 = vpop.permute.xlu1 %1196  ;;  %v3770_v60 = vpop.permute.xlu0 %1194 }
 0x269   : > { %2936 = vset.pattern.permute.xlu1 %v3037_v1  ;;  %2940 = vset.pattern.permute.xlu0 %v3037_v1  ;;  %v793_v1 = vrot.slane %v3484_v30, 4 }
 0x26a   : > { %2016 = vperm.xlu1 %2936, %v1959_v47   ;;  %2225 = vperm.xlu0 %2940, %v3777_v54  }
 0x26b   : > { %v795_v15 = vsel %vm332_vm0, %v793_v1, %v794_v13  ;;  %v880_v13 = vrot.slane %v3493_v3, 4 }
 0x26c   : > { %v3785_v37 = vpop.permute.xlu1 %1225  ;;  %v3787_v49 = vpop.permute.xlu0 %1223  ;;  %v797_v51 = vsel %vm796_vm1, %v3484_v30, %v795_v15  ;;  %vm1143_vm1 = vcmask 482304  }
 0x26d   : > { %v800_v31 = vadd.f32 %v797_v51, %v772_v12  ;;  %v882_v1 = vsel %vm332_vm0, %v880_v13, %v881_v43  ;;  %v939_v12 = vrot.slane %v3551_v25, 4  ;;  %v967_v51 = vrot.slane %v3555_v36, 4 }
 0x26e   : > { %2937 = vset.pattern.permute.xlu1 %v3055_v5  ;;  %2943 = vset.pattern.permute.xlu0 %v3056_v6  ;;  %v2153_v6 = vld [vmem:[%s4393_s6 + $0x8] sm:$0xff]  ;;  %v995_v13 = vrot.slane %v3674_v23, 4 }
 0x26f   : > { %2063 = vperm.xlu1 %2937, %v1959_v47   ;;  %2291 = vperm.xlu0 %2943, %v3777_v54   ;;  %v852_v47 = vrot.slane %v3533_v28, 4 }
 0x270   : > { %v3797_v57 = vpop.permute.xlu1 %1254  ;;  %v3799_v18 = vpop.permute.xlu0 %1252 }
 0x271   : > { %v853_v30 = vsel %vm332_vm0, %v851_v53, %v852_v47  ;;  %v856_v15 = vsel %vm854_vm3, %v3533_v28, %v852_v47  ;;  %v4422_v53 = vmov 13   ;;  %v884_v28 = vsel %vm883_vm4, %v3493_v3, %v882_v1 }
 0x272   : > { %v855_v44 = vsel %vm854_vm3, %v3490_v33, %v853_v30  ;;  %v860_v33 = vadd.f32 %v856_v15, %v829_v27  ;;  %v885_v47 = vsel %vm883_vm4, %v3537_v40, %v881_v43  ;;  %v996_v30 = vrot.slane %v3676_v63, 4  ;;  %v2554_v40 = vld [vmem:[%s4395_s8] sm:$0xff] }
 0x273   : > { %2939 = vset.pattern.permute.xlu1 %v3096_v62  ;;  %2946 = vset.pattern.permute.xlu0 %v3059_v9  ;;  %v825_v9 = vsel %vm824_vm2, %v3487_v32, %v823_v22  ;;  %v910_v32 = vrot.slane %v3542_v58, 4  ;;  %v1025_v27 = vrot.slane %v3687_v24, 4  ;;  %vm1172_vm2 = vcmask 474112  }
 0x274   : > { %v3812_v46 = vpop.permute.xlu1 %1283  ;;  %v3814_v14 = vpop.permute.xlu0 %1281  ;;  %2161 = vperm.xlu1 %2939, %v2153_v6   ;;  %2357 = vperm.xlu0 %2946, %v3777_v54   ;;  %v828_v59 = vadd.f32 %v825_v9, %v800_v31  ;;  %v966_v31 = vrot.slane %v3553_v29, 4  ;;  %vm1201_vm3 = vcmask 465920   ;;  %vm1230_vm4 = vcmask 457728  }
 0x275   : > { %v911_v6 = vsel %vm332_vm0, %v909_v2, %v910_v32  ;;  %v914_v19 = vsel %vm912_vm5, %v3542_v58, %v910_v32  ;;  %v1054_v2 = vrot.slane %v3709_v42, 4 }
 0x276   : > { %v859_v48 = vadd.f32 %v855_v44, %v828_v59  ;;  %v913_v22 = vsel %vm912_vm5, %v3539_v52, %v911_v6  ;;  %v889_v59 = vadd.f32 %v885_v47, %v860_v33  ;;  %v968_v52 = vsel %vm332_vm0, %v966_v31, %v967_v51 }
 0x277   : > { %v1024_v44 = vrot.slane %v3689_v8, 4  ;;  %v1111_v31 = vrot.slane %v3733_v38, 4  ;;  %vm1259_vm5 = vcmask 326656  }
 0x278   : > { %v3821_v35 = vpop.permute.xlu1 %1312  ;;  %v3823_v50 = vpop.permute.xlu0 %1310  ;;  %2203 = vperm.xlu1 %2939, %v3777_v54   ;;  %2949 = vset.pattern.permute.xlu0 %v4421_v61  ;;  %v888_v43 = vadd.f32 %v884_v28, %v859_v48  ;;  %v942_v61 = vsel %vm351_vm6, %v3551_v25, %v939_v12  ;;  %v918_v1 = vadd.f32 %v914_v19, %v889_v59 }
 0x279   : > { %2423 = vperm.xlu0 %2949, %v3777_v54   ;;  %v971_v25 = vsel %vm969_vm11, %v3555_v36, %v967_v51  ;;  %v1000_v36 = vsel %vm998_vm12, %v3676_v63, %v996_v30  ;;  %v1026_v6 = vsel %vm332_vm0, %v1024_v44, %v1025_v27  ;;  %v4423_v51 = vmov 5  }
 0x27a   : > { %v917_v32 = vadd.f32 %v913_v22, %v888_v43  ;;  %v946_v33 = vadd.f32 %v942_v61, %v918_v1  ;;  %v1112_v63 = vrot.slane %v3731_v16, 4  ;;  %v1141_v61 = vrot.slane %v3745_v11, 4 }
 0x27b   : > { %v4424_v44 = vmov 6  }
 0x27c   : > { %v3838_v34 = vpop.permute.xlu1 %1341  ;;  %v3840_v39 = vpop.permute.xlu0 %1339  ;;  %2941 = vset.pattern.permute.xlu1 %v3055_v5  ;;  %v940_v5 = vsel %vm332_vm0, %v938_v26, %v939_v12  ;;  %v1053_v12 = vrot.slane %v3711_v7, 4  ;;  %v1082_v26 = vrot.slane %v3721_v10, 4 }
 0x27d   : > { %2247 = vperm.xlu1 %2941, %v3777_v54   ;;  %2952 = vset.pattern.permute.xlu0 %v4422_v53  ;;  %v941_v58 = vsel %vm351_vm6, %v3549_v20, %v940_v5  ;;  %v997_v20 = vsel %vm332_vm0, %v995_v13, %v996_v30  ;;  %vm1027_vm6 = vcmask 637952   ;;  %v975_v53 = vadd.f32 %v971_v25, %v946_v33 }
 0x27e   : > { %2489 = vperm.xlu0 %2952, %v3777_v54   ;;  %v999_v47 = vsel %vm998_vm12, %v3674_v23, %v997_v20  ;;  %v1055_v5 = vsel %vm332_vm0, %v1053_v12, %v1054_v2  ;;  %v1028_v23 = vsel %vm1027_vm6, %v3689_v8, %v1026_v6  ;;  %v1113_v8 = vsel %vm332_vm0, %v1111_v31, %v1112_v63 }
 0x27f   : > { %v1004_v30 = vadd.f32 %v1000_v36, %v975_v53  ;;  %v1057_v13 = vsel %vm1056_vm13, %v3711_v7, %v1055_v5  ;;  %v1170_v25 = vrot.slane %v3757_v17, 4  ;;  %v1115_v33 = vsel %vm1114_vm15, %v3733_v38, %v1113_v8 }
 0x280   : > { %v3860_v9 = vpop.permute.xlu1 %1370  ;;  %v3862_v3 = vpop.permute.xlu0 %1368  ;;  %v1199_v36 = vrot.slane %v3768_v4, 4  ;;  %v4425_v53 = vmov 8   ;;  %vm1317_vm12 = vcmask 310272  }
 0x281   : > { %2942 = vset.pattern.permute.xlu1 %v3036_v0  ;;  %v970_v0 = vsel %vm969_vm11, %v3553_v29, %v968_v52  ;;  %v1083_v29 = vrot.slane %v3719_v45, 4  ;;  %v1140_v52 = vrot.slane %v3747_v41, 4  ;;  %vm1288_vm11 = vcmask 318464  }
 0x282   : > { %2269 = vperm.xlu1 %2942, %v3777_v54   ;;  %2955 = vset.pattern.permute.xlu0 %v3096_v62  ;;  %v945_v62 = vadd.f32 %v941_v58, %v917_v32  ;;  %v1058_v58 = vsel %vm1056_vm13, %v3709_v42, %v1054_v2 }
 0x283   : > { %2557 = vperm.xlu0 %2955, %v2554_v40   ;;  %v1029_v40 = vsel %vm1027_vm6, %v3687_v24, %v1025_v27  ;;  %v1084_v59 = vsel %vm332_vm0, %v1082_v26, %v1083_v29  ;;  %v1087_v42 = vsel %vm1085_vm14, %v3719_v45, %v1083_v29  ;;  %v1142_v12 = vsel %vm332_vm0, %v1140_v52, %v1141_v61 }
 0x284   : > { %v3885_v15 = vpop.permute.xlu1 %1399  ;;  %v3887_v48 = vpop.permute.xlu0 %1397  ;;  %v974_v28 = vadd.f32 %v970_v0, %v945_v62  ;;  %v1033_v24 = vadd.f32 %v1029_v40, %v1004_v30  ;;  %v1086_v7 = vsel %vm1085_vm14, %v3721_v10, %v1084_v59  ;;  %v1169_v0 = vrot.slane %v3759_v21, 4 }
 0x285   : > { %v1116_v62 = vsel %vm1114_vm15, %v3731_v16, %v1112_v63  ;;  %v1198_v45 = vrot.slane %v3770_v60, 4  ;;  %v1145_v29 = vsel %vm1143_vm1, %v3745_v11, %v1141_v61  ;;  %v1144_v16 = vsel %vm1143_vm1, %v3747_v41, %v1142_v12 }
 0x286   : > { %2944 = vset.pattern.permute.xlu1 %v4423_v51  ;;  %v1003_v43 = vadd.f32 %v999_v47, %v974_v28  ;;  %v1062_v20 = vadd.f32 %v1058_v58, %v1033_v24  ;;  %v1171_v38 = vsel %vm332_vm0, %v1169_v0, %v1170_v25  ;;  %v1228_v28 = vrot.slane %v3785_v37, 4 }
 0x287   : > { %2313 = vperm.xlu1 %2944, %v3777_v54   ;;  %v1227_v47 = vrot.slane %v3787_v49, 4  ;;  %v1174_v63 = vsel %vm1172_vm2, %v3757_v17, %v1170_v25  ;;  %v1200_v31 = vsel %vm332_vm0, %v1198_v45, %v1199_v36  ;;  %v1257_v30 = vrot.slane %v3797_v57, 4 }
 0x288   : > { %v3901_v22 = vpop.permute.xlu1 %1428  ;;  %v3903_v19 = vpop.permute.xlu0 %1426  ;;  %v1032_v27 = vadd.f32 %v1028_v23, %v1003_v43  ;;  %v1091_v6 = vadd.f32 %v1087_v42, %v1062_v20  ;;  %v1256_v41 = vrot.slane %v3799_v18, 4  ;;  %v1173_v43 = vsel %vm1172_vm2, %v3759_v21, %v1171_v38 }
 0x289   : > { %v1203_v52 = vsel %vm1201_vm3, %v3768_v4, %v1199_v36  ;;  %v1229_v17 = vsel %vm332_vm0, %v1227_v47, %v1228_v28  ;;  %v1286_v58 = vrot.slane %v3812_v46, 4  ;;  %v1202_v21 = vsel %vm1201_vm3, %v3770_v60, %v1200_v31 }
 0x28a   : > { %v1061_v2 = vadd.f32 %v1057_v13, %v1032_v27  ;;  %v1120_v5 = vadd.f32 %v1116_v62, %v1091_v6  ;;  %v1285_v13 = vrot.slane %v3814_v14, 4  ;;  %v1258_v8 = vsel %vm332_vm0, %v1256_v41, %v1257_v30 }
 0x28b   : > { %2945 = vset.pattern.permute.xlu1 %v4424_v44  ;;  %v4426_v44 = vmov 9   ;;  %v1315_v4 = vrot.slane %v3821_v35, 4  ;;  %v1314_v42 = vrot.slane %v3823_v50, 4  ;;  %v1232_v25 = vsel %vm1230_vm4, %v3785_v37, %v1228_v28 }
 0x28c   : > { %v3918_v32 = vpop.permute.xlu1 %1457  ;;  %v3920_v1 = vpop.permute.xlu0 %1455  ;;  %2335 = vperm.xlu1 %2945, %v3777_v54   ;;  %v1090_v10 = vadd.f32 %v1086_v7, %v1061_v2  ;;  %v1149_v40 = vadd.f32 %v1145_v29, %v1120_v5  ;;  %v1231_v0 = vsel %vm1230_vm4, %v3787_v49, %v1229_v17  ;;  %v1287_v12 = vsel %vm332_vm0, %v1285_v13, %v1286_v58 }
 0x28d   : > { %v1344_v62 = vrot.slane %v3838_v34, 4  ;;  %v1261_v36 = vsel %vm1259_vm5, %v3797_v57, %v1257_v30  ;;  %v1260_v37 = vsel %vm1259_vm5, %v3799_v18, %v1258_v8  ;;  %v4427_v49 = vmov 11  }
 0x28e   : > { %v1119_v11 = vadd.f32 %v1115_v33, %v1090_v10  ;;  %v1178_v24 = vadd.f32 %v1174_v63, %v1149_v40  ;;  %v1343_v33 = vrot.slane %v3840_v39, 4  ;;  %v1316_v10 = vsel %vm332_vm0, %v1314_v42, %v1315_v4 }
 0x28f   : > { %vm1346_vm6 = vcmask 302080   ;;  %v1290_v29 = vsel %vm1288_vm11, %v3812_v46, %v1286_v58  ;;  %v1373_v57 = vrot.slane %v3860_v9, 4  ;;  %v1372_v18 = vrot.slane %v3862_v3, 4 }
 0x290   : > { %v3938_v26 = vpop.permute.xlu1 %1486  ;;  %v3940_v51 = vpop.permute.xlu0 %1484  ;;  %2947 = vset.pattern.permute.xlu1 %v4425_v53  ;;  %v1148_v23 = vadd.f32 %v1144_v16, %v1119_v11  ;;  %v1207_v7 = vadd.f32 %v1203_v52, %v1178_v24  ;;  %v1289_v53 = vsel %vm1288_vm11, %v3814_v14, %v1287_v12  ;;  %v1345_v5 = vsel %vm332_vm0, %v1343_v33, %v1344_v62 }
 0x291   : > { %2379 = vperm.xlu1 %2947, %v3777_v54   ;;  %v1319_v11 = vsel %vm1317_vm12, %v3821_v35, %v1315_v4  ;;  %v1318_v46 = vsel %vm1317_vm12, %v3823_v50, %v1316_v10  ;;  %vm1375_vm14 = vcmask 293888   ;;  %v1348_v31 = vsel %vm1346_vm6, %v3838_v34, %v1344_v62 }
 0x292   : > { %v1177_v27 = vadd.f32 %v1173_v43, %v1148_v23  ;;  %v1236_v45 = vadd.f32 %v1232_v25, %v1207_v7  ;;  %vm1404_vm15 = vcmask 285696   ;;  %v4428_v30 = vmov 12  }
 0x293   : > { %v1347_v41 = vsel %vm1346_vm6, %v3840_v39, %v1345_v5  ;;  %v1374_v40 = vsel %vm332_vm0, %v1372_v18, %v1373_v57  ;;  %v1402_v23 = vrot.slane %v3885_v15, 4  ;;  %v1401_v35 = vrot.slane %v3887_v48, 4 }
 0x294   : > { %v3956_v59 = vpop.permute.xlu1 %1515  ;;  %v3958_v61 = vpop.permute.xlu0 %1513  ;;  %v1206_v2 = vadd.f32 %v1202_v21, %v1177_v27  ;;  %v1265_v28 = vadd.f32 %v1261_v36, %v1236_v45  ;;  %v1431_v17 = vrot.slane %v3901_v22, 4  ;;  %v1430_v58 = vrot.slane %v3903_v19, 4 }
 0x295   : > { %2948 = vset.pattern.permute.xlu1 %v4426_v44  ;;  %v1377_v39 = vsel %vm1375_vm14, %v3860_v9, %v1373_v57  ;;  %v1376_v24 = vsel %vm1375_vm14, %v3862_v3, %v1374_v40  ;;  %vm1433_vm1 = vcmask 277504   ;;  %v1406_v21 = vsel %vm1404_vm15, %v3885_v15, %v1402_v23 }
 0x296   : > { %2401 = vperm.xlu1 %2948, %v3777_v54   ;;  %v1235_v6 = vadd.f32 %v1231_v0, %v1206_v2  ;;  %v1294_v14 = vadd.f32 %v1290_v29, %v1265_v28  ;;  %v1403_v27 = vsel %vm332_vm0, %v1401_v35, %v1402_v23  ;;  %v1460_v8 = vrot.slane %v3918_v32, 4 }
 0x297   : > { %v1459_v4 = vrot.slane %v3920_v1, 4  ;;  %v4429_v9 = vmov 14   ;;  %v1432_v0 = vsel %vm332_vm0, %v1430_v58, %v1431_v17  ;;  %v1489_v3 = vrot.slane %v3938_v26, 4 }
 0x298   : > { %v3976_v20 = vpop.permute.xlu1 %1544  ;;  %v3978_v60 = vpop.permute.xlu0 %1542  ;;  %v1264_v47 = vadd.f32 %v1260_v37, %v1235_v6  ;;  %v1323_v52 = vadd.f32 %v1319_v11, %v1294_v14  ;;  %v1488_v2 = vrot.slane %v3940_v51, 4  ;;  %vm1462_vm2 = vcmask 146432  }
 0x299   : > { %vm1491_vm3 = vcmask 138240   ;;  %v1405_v62 = vsel %vm1404_vm15, %v3887_v48, %v1403_v27  ;;  %v1435_v33 = vsel %vm1433_vm1, %v3901_v22, %v1431_v17  ;;  %v1434_v36 = vsel %vm1433_vm1, %v3903_v19, %v1432_v0 }
 0x29a   : > { %2950 = vset.pattern.permute.xlu1 %v4427_v49  ;;  %v1293_v63 = vadd.f32 %v1289_v53, %v1264_v47  ;;  %v1352_v13 = vadd.f32 %v1348_v31, %v1323_v52  ;;  %v1461_v37 = vsel %vm332_vm0, %v1459_v4, %v1460_v8  ;;  %v1518_v49 = vrot.slane %v3956_v59, 4 }
 0x29b   : > { %2445 = vperm.xlu1 %2950, %v3777_v54   ;;  %v1517_v45 = vrot.slane %v3958_v61, 4  ;;  %v1464_v29 = vsel %vm1462_vm2, %v3918_v32, %v1460_v8  ;;  %v1490_v48 = vsel %vm332_vm0, %v1488_v2, %v1489_v3  ;;  %v1547_v22 = vrot.slane %v3976_v20, 4 }
 0x29c   : > { %v3996_v16 = vpop.permute.xlu1 %1573  ;;  %v3998_v38 = vpop.permute.xlu0 %1571  ;;  %v1322_v34 = vadd.f32 %v1318_v46, %v1293_v63  ;;  %v1381_v25 = vadd.f32 %v1377_v39, %v1352_v13  ;;  %v1546_v53 = vrot.slane %v3978_v60, 4  ;;  %v4430_v19 = vmov 15  }
 0x29d   : > { %vm1520_vm4 = vcmask 130048   ;;  %v1463_v28 = vsel %vm1462_vm2, %v3920_v1, %v1461_v37  ;;  %v1493_v47 = vsel %vm1491_vm3, %v3938_v26, %v1489_v3  ;;  %vm1549_vm5 = vcmask 121856  }
 0x29e   : > { %v1351_v44 = vadd.f32 %v1347_v41, %v1322_v34  ;;  %v1410_v12 = vadd.f32 %v1406_v21, %v1381_v25  ;;  %v1492_v11 = vsel %vm1491_vm3, %v3940_v51, %v1490_v48  ;;  %v1519_v46 = vsel %vm332_vm0, %v1517_v45, %v1518_v49 }
 0x29f   : > { %2951 = vset.pattern.permute.xlu1 %v4428_v30  ;;  %v1548_v31 = vsel %vm332_vm0, %v1546_v53, %v1547_v22  ;;  %v1576_v1 = vrot.slane %v3996_v16, 4  ;;  %v1575_v26 = vrot.slane %v3998_v38, 4  ;;  %vm1578_vm11 = vcmask 113664  }
 0x2a0   : > { %v4013_v43 = vpop.permute.xlu1 %1602  ;;  %v4015_v50 = vpop.permute.xlu0 %1600  ;;  %2467 = vperm.xlu1 %2951, %v3777_v54   ;;  %v1380_v15 = vadd.f32 %v1376_v24, %v1351_v44  ;;  %v1439_v18 = vadd.f32 %v1435_v33, %v1410_v12  ;;  %v1521_v51 = vsel %vm1520_vm4, %v3958_v61, %v1519_v46  ;;  %v1551_v40 = vsel %vm1549_vm5, %v3976_v20, %v1547_v22 }
 0x2a1   : > { %v1605_v23 = vrot.slane %v4013_v43, 4  ;;  %v1604_v35 = vrot.slane %v4015_v50, 4  ;;  %v1550_v34 = vsel %vm1549_vm5, %v3978_v60, %v1548_v31  ;;  %v1580_v39 = vsel %vm1578_vm11, %v3996_v16, %v1576_v1 }
 0x2a2   : > { %v1409_v57 = vadd.f32 %v1405_v62, %v1380_v15  ;;  %v1468_v5 = vadd.f32 %v1464_v29, %v1439_v18  ;;  %v1577_v13 = vsel %vm332_vm0, %v1575_v26, %v1576_v1  ;;  %vm1635_vm12 = vcmask 97280  }
 0x2a3   : > { %v1608_v21 = vsel %vm418_vm10, %v4013_v43, %v1605_v23  ;;  %v1606_v27 = vsel %vm332_vm0, %v1604_v35, %v1605_v23  ;;  %vm1869_vm6 = vcmask 732160   ;;  %vm2573_vm14 = vcmask 392448  }
 0x2a4   : > { %v4029_v42 = vpop.permute.xlu1 %1630  ;;  %v4031_v7 = vpop.permute.xlu0 %1628  ;;  %2953 = vset.pattern.permute.xlu1 %v4429_v9  ;;  %v1438_v32 = vadd.f32 %v1434_v36, %v1409_v57  ;;  %v1497_v41 = vadd.f32 %v1493_v47, %v1468_v5  ;;  %v1579_v9 = vsel %vm1578_vm11, %v3998_v38, %v1577_v13  ;;  %v1607_v62 = vsel %vm418_vm10, %v4015_v50, %v1606_v27 }
 0x2a5   : > { %2511 = vperm.xlu1 %2953, %v3777_v54   ;;  %v1633_v61 = vrot.slane %v4029_v42, 4  ;;  %v1632_v20 = vrot.slane %v4031_v7, 4  ;;  %vm1747_vm10 = vcmask 990208   ;;  %vm2578_vm15 = vcmask 523648  }
 0x2a6   : > { %v1467_v30 = vadd.f32 %v1463_v28, %v1438_v32  ;;  %vm2583_vm1 = vcmask 654848   ;;  %vm2588_vm2 = vcmask 786048   ;;  %vm2594_vm3 = vcmask 917248  }
 0x2a7   : > { %v1637_v3 = vsel %vm1635_vm12, %v4029_v42, %v1633_v61  ;;  %v1634_v2 = vsel %vm332_vm0, %v1632_v20, %v1633_v61 }
 0x2a8   : > { %v4047_v6 = vpop.permute.xlu1 %1661  ;;  %v4049_v10 = vpop.permute.xlu0 %1659  ;;  %v1636_v45 = vsel %vm1635_vm12, %v4031_v7, %v1634_v2 }
 0x2a9   : > { %2954 = vset.pattern.permute.xlu1 %v4430_v19  ;;  %v1664_v60 = vrot.slane %v4047_v6, 4  ;;  %v1663_v8 = vrot.slane %v4049_v10, 4 }
 0x2aa   : > { %2533 = vperm.xlu1 %2954, %v3777_v54   ;;  %v1522_v54 = vsel %vm1520_vm4, %v3956_v59, %v1518_v49  ;;  %v1496_v59 = vadd.f32 %v1492_v11, %v1467_v30 }
 0x2ab   : > { %v1526_v52 = vadd.f32 %v1522_v54, %v1497_v41  ;;  %v1665_v36 = vsel %vm332_vm0, %v1663_v8, %v1664_v60 }
 0x2ac   : > { %v4065_v14 = vpop.permute.xlu1 %1688  ;;  %v1687_v63 = vpop.permute.xlu0 %1686  ;;  %v1525_v44 = vadd.f32 %v1521_v51, %v1496_v59  ;;  %v1666_v57 = vsel %vm572_vm7, %v4049_v10, %v1665_v36  ;;  %vm1775_vm7 = vcmask 982016  }
 0x2ad   : > { %v1555_v24 = vadd.f32 %v1551_v40, %v1526_v52  ;;  %v1691_v43 = vrot.slane %v4065_v14, 4  ;;  %v1690_v15 = vrot.slane %v1687_v63, 4 }
 0x2ae   : > { %v1554_v4 = vadd.f32 %v1550_v34, %v1525_v44 }
 0x2af   : > { %v1584_v16 = vadd.f32 %v1580_v39, %v1555_v24  ;;  %v1692_v22 = vsel %vm332_vm0, %v1690_v15, %v1691_v43 }
 0x2b0   : > { %v1716_v17 = vpop.permute.xlu1 %1715  ;;  %v1714_v58 = vpop.permute.xlu0 %1713  ;;  %v1583_v33 = vadd.f32 %v1579_v9, %v1554_v4  ;;  %v1693_v5 = vsel %vm600_vm8, %v1687_v63, %v1692_v22  ;;  %vm1803_vm8 = vcmask 973824  }
 0x2b1   : > { %v1612_v12 = vadd.f32 %v1608_v21, %v1584_v16  ;;  %v1718_v37 = vrot.slane %v1716_v17, 4  ;;  %v1717_v49 = vrot.slane %v1714_v58, 4 }
 0x2b2   : > { %v1611_v48 = vadd.f32 %v1607_v62, %v1583_v33 }
 0x2b3   : > { %v1641_v38 = vadd.f32 %v1637_v3, %v1612_v12  ;;  %v1719_v18 = vsel %vm332_vm0, %v1717_v49, %v1718_v37 }
 0x2b4   : > { %v1743_v25 = vpop.permute.xlu1 %1742  ;;  %v1741_v0 = vpop.permute.xlu0 %1740  ;;  %v1640_v50 = vadd.f32 %v1636_v45, %v1611_v48  ;;  %v1720_v26 = vsel %vm628_vm9, %v1714_v58, %v1719_v18  ;;  %vm1831_vm9 = vcmask 965632  }
 0x2b5   : > { %v1745_v53 = vrot.slane %v1743_v25, 4  ;;  %v1744_v19 = vrot.slane %v1741_v0, 4  ;;  %v1670_v32 = vadd.f32 %v4047_v6, %v1641_v38 }
 0x2b6   : > { %v1669_v46 = vadd.f32 %v1666_v57, %v1640_v50 }
 0x2b7   : > { %v1746_v54 = vsel %vm332_vm0, %v1744_v19, %v1745_v53  ;;  %v1697_v41 = vadd.f32 %v4065_v14, %v1670_v32 }
 0x2b8   : > { %v1771_v29 = vpop.permute.xlu1 %1770  ;;  %v1769_v42 = vpop.permute.xlu0 %1768  ;;  %v1696_v10 = vadd.f32 %v1693_v5, %v1669_v46  ;;  %v1748_v51 = vsel %vm1747_vm10, %v1741_v0, %v1746_v54 }
 0x2b9   : > { %v1773_v28 = vrot.slane %v1771_v29, 4  ;;  %v1772_v47 = vrot.slane %v1769_v42, 4  ;;  %v1724_v23 = vadd.f32 %v1716_v17, %v1697_v41 }
 0x2ba   : > { %v1723_v40 = vadd.f32 %v1720_v26, %v1696_v10 }
 0x2bb   : > { %v1774_v30 = vsel %vm332_vm0, %v1772_v47, %v1773_v28  ;;  %v1752_v52 = vadd.f32 %v1743_v25, %v1724_v23 }
 0x2bc   : > { %v1799_v7 = vpop.permute.xlu1 %1798  ;;  %v1797_v11 = vpop.permute.xlu0 %1796  ;;  %v1776_v35 = vsel %vm1775_vm7, %v1769_v42, %v1774_v30  ;;  %v1751_v59 = vadd.f32 %v1748_v51, %v1723_v40 }
 0x2bd   : > { %v1801_v31 = vrot.slane %v1799_v7, 4  ;;  %v1800_v1 = vrot.slane %v1797_v11, 4  ;;  %v1780_v20 = vadd.f32 %v1771_v29, %v1752_v52 }
 0x2be   : > { %v1779_v13 = vadd.f32 %v1776_v35, %v1751_v59 }
 0x2bf   : > { %v1802_v63 = vsel %vm332_vm0, %v1800_v1, %v1801_v31  ;;  %v1808_v24 = vadd.f32 %v1799_v7, %v1780_v20 }
 0x2c0   : > { %v1825_v6 = vpop.permute.xlu1 %1824  ;;  %v1804_v34 = vsel %vm1803_vm8, %v1797_v11, %v1802_v63 }
 0x2c1   : > { %v1828_v58 = vrot.slane %v1825_v6, 4  ;;  %v1807_v44 = vadd.f32 %v1804_v34, %v1779_v13 }
 0x2c4   : > { %v1827_v39 = vpop.permute.xlu1 %1826 }
 0x2c5   : > { %v1829_v61 = vrot.slane %v1827_v39, 4  ;;  %v1836_v8 = vadd.f32 %v1827_v39, %v1808_v24 }
 0x2c7   : > { %v1830_v14 = vsel %vm332_vm0, %v1828_v58, %v1829_v61 }
 0x2c8   : > { %v1832_v21 = vsel %vm1831_vm9, %v1825_v6, %v1830_v14 }
 0x2c9   : > { %v1835_v27 = vadd.f32 %v1832_v21, %v1807_v44  ;;  %v1841_v60 = vpop.permute.xlu0 %1840 }
 0x2ca   : > { %v1848_v17 = vrot.slane %v1841_v60, %v3302_v56 }
 0x2cc   : > { %v1850_v4 = vadd.f32 %v1848_v17, %v1835_v27  ;;  %v1851_v16 = vadd.f32 %v1848_v17, %v1836_v8 }
 0x2ce   : > { %v1853_v9 = vcombine.high %v1850_v4, %v1850_v4  ;;  %v1855_v25 = vsel %vm332_vm0, %v1850_v4, 0.0  ;;  %v1870_v0 = vsel %vm1869_vm6, %v1851_v16, 0.0 }
 0x2cf   : > { %v1856_v3 = vrot.slane %v1855_v25, 4  ;;  %v1871_v2 = vrot.slane %v1870_v0, 4 }
 0x2d0   : > { %v1862_v43 = vsel %vm332_vm0, %v1853_v9, 0.0 }
 0x2d1   : > { %v1857_v15 = vadd.f32 %v1856_v3, %v1855_v25  ;;  %v1863_v12 = vrot.slane %v1862_v43, 4  ;;  %v1872_v62 = vadd.f32 %v1871_v2, %v1870_v0  ;;  %v1947_v14 = vpop.permute.xlu1 %1946  ;;  %v4126_v2 = vsub.s32 0, %v3299_v55 }
 0x2d3   : > { %v1858_v33 = vrot.slane %v1857_v15, 2  ;;  %v1864_v36 = vadd.f32 %v1863_v12, %v1862_v43  ;;  %v1873_v37 = vrot.slane %v1872_v62, 2  ;;  %v4130_v12 = vsub.s32 1, %v3299_v55 }
 0x2d5   : > { %v1859_v49 = vadd.f32 %v1858_v33, %v1857_v15  ;;  %v1865_v38 = vrot.slane %v1864_v36, 2  ;;  %v1874_v45 = vadd.f32 %v1873_v37, %v1872_v62  ;;  %v1954_v15 = vrot.slane %v1947_v14, %v3302_v56 }
 0x2d6   : > { %v4120_v17 = vpop.permute.xlu1 %2012  ;;  %v4133_v62 = vsub.s32 3, %v3299_v55 }
 0x2d7   : > { %v1860_v29 = vrot.slane %v1859_v49, 1  ;;  %v1866_v42 = vadd.f32 %v1865_v38, %v1864_v36  ;;  %v1875_v48 = vrot.slane %v1874_v45, 1 }
 0x2d9   : > { %v1876_v22 = vadd.f32 %v1875_v48, %v1874_v45  ;;  %v1861_v53 = vadd.f32 %v1860_v29, %v1859_v49  ;;  %v1867_v19 = vrot.slane %v1866_v42, 1  ;;  %v4138_v45 = vsub.s32 2, %v3299_v55 }
 0x2db   : > { %v1880_v57 = vmul.f32 0.25, %v1876_v22  ;;  %v1868_v50 = vadd.f32 %v1867_v19, %v1866_v42  ;;  %v1878_v28 = vmul.f32 0.25, %v1861_v53 }
 0x2dd   : > { %v1886_v18 = vsub.f32 %v1851_v16, %v1880_v57  ;;  %v1879_v47 = vmul.f32 0.25, %v1868_v50  ;;  %v4122_v16 = vpop.permute.xlu1 %2106  ;;  %v4146_v57 = vsub.s32 4, %v3299_v55 }
 0x2df   : > { %v1888_v32 = vmul.f32 %v1886_v18, %v1886_v18  ;;  %v1883_v5 = vcombine.low %v1878_v28, %v1879_v47 }
 0x2e1   : > { %v1906_v7 = vsel %vm1869_vm6, %v1888_v32, 0.0  ;;  %v1885_v11 = vsub.f32 %v1850_v4, %v1883_v5  ;;  %v1932_v4 = vpop.permute.xlu0 %1931  ;;  %v4135_v33 = vpop.permute.xlu1 %2156  ;;  %v4151_v32 = vsub.s32 5, %v3299_v55 }
 0x2e2   : > { %v1907_v46 = vrot.slane %v1906_v7, 4  ;;  %v1939_v0 = vrot.slane %v1932_v4, %v3302_v56 }
 0x2e3   : > { %v1887_v54 = vmul.f32 %v1885_v11, %v1885_v11 }
 0x2e4   : > { %v1908_v31 = vadd.f32 %v1907_v46, %v1906_v7  ;;  %v4155_v46 = vsub.s32 7, %v3299_v55 }
 0x2e5   : > { %v1890_v1 = vcombine.high %v1887_v54, %v1887_v54  ;;  %v1892_v26 = vsel %vm332_vm0, %v1887_v54, 0.0  ;;  %v1963_v3 = vpop.permute.xlu0 %1962 }
 0x2e6   : > { %v1909_v10 = vrot.slane %v1908_v31, 2  ;;  %v1893_v30 = vrot.slane %v1892_v26, 4 }
 0x2e7   : > { %v1899_v41 = vsel %vm332_vm0, %v1890_v1, 0.0  ;;  %vm2568_vm0 = vcmask 261248  }
 0x2e8   : > { %v1910_v51 = vadd.f32 %v1909_v10, %v1908_v31  ;;  %v1894_v6 = vadd.f32 %v1893_v30, %v1892_v26  ;;  %v1900_v40 = vrot.slane %v1899_v41, 4  ;;  %v4158_v31 = vsub.s32 6, %v3299_v55 }
 0x2e9   : > { %v2060_v49 = vpop.permute.xlu0 %2059 }
 0x2ea   : > { %v1911_v63 = vrot.slane %v1910_v51, 1  ;;  %v1895_v23 = vrot.slane %v1894_v6, 2  ;;  %v1901_v35 = vadd.f32 %v1900_v40, %v1899_v41 }
 0x2ec   : > { %v1912_v59 = vadd.f32 %v1911_v63, %v1910_v51  ;;  %v1896_v52 = vadd.f32 %v1895_v23, %v1894_v6  ;;  %v1902_v34 = vrot.slane %v1901_v35, 2 }
 0x2ee   : > { %v1915_v39 = vmul.f32 0.25, %v1912_v59  ;;  %v1897_v13 = vrot.slane %v1896_v52, 1  ;;  %v1903_v58 = vadd.f32 %v1902_v34, %v1901_v35 }
 0x2f0   : > { %v1918_v61 = vadd.f32 1e-06, %v1915_v39  ;;  %v1898_v20 = vadd.f32 %v1897_v13, %v1896_v52  ;;  %v1904_v44 = vrot.slane %v1903_v58, 1 }
 0x2f2   : > { %2956 = vrsqrt.f32 %v1918_v61  ;;  %v1905_v24 = vadd.f32 %v1904_v44, %v1903_v58  ;;  %v1913_v21 = vmul.f32 0.25, %v1898_v20 }
 0x2f4   : > { %v1914_v27 = vmul.f32 0.25, %v1905_v24  ;;  %v1916_v60 = vadd.f32 1e-06, %v1913_v21 }
 0x2f6   : > { %v1917_v8 = vadd.f32 1e-06, %v1914_v27  ;;  %2958 = vrsqrt.f32 %v1916_v60 }
 0x2f8   : > { %2960 = vrsqrt.f32 %v1917_v8 }
 0x2ff   : > { %v2957_v9 = vpop.eup %2956 }
 0x300   : > { %v1927_v25 = vmul.f32 %v2957_v9, %v1886_v18  ;;  %v2017_v18 = vpop.permute.xlu1 %2016 }
 0x302   : > { %v1942_v43 = vmul.f32 %v1939_v0, %v1927_v25 }
 0x303   : > { %v2959_v36 = vpop.eup %2958 }
 0x304   : > { %v1957_v37 = vadd.f32 %v1954_v15, %v1942_v43  ;;  %v2064_v59 = vpop.permute.xlu1 %2063 }
 0x305   : > { %v2961_v38 = vpop.eup %2960 }
 0x306   : > { %v1924_v29 = vcombine.low %v2959_v36, %v2961_v38  ;;  %v1983_v42 = vrot.slane %v1957_v37, %v4126_v2  ;;  %v2030_v56 = vrot.slane %v1957_v37, %v4130_v12  ;;  %v2124_v48 = vrot.slane %v1957_v37, %v4133_v62 }
 0x307   : > { %v2077_v28 = vrot.slane %v1957_v37, %v4138_v45 }
 0x308   : > { %v1926_v22 = vmul.f32 %v1924_v29, %v1885_v11  ;;  %v1998_v53 = vrot.slane %v1983_v42, %v4126_v2  ;;  %v2045_v19 = vrot.slane %v2030_v56, %v4130_v12  ;;  %v2139_v50 = vrot.slane %v2124_v48, %v4133_v62  ;;  %v1968_v11 = vpop.permute.xlu0 %1967  ;;  %v2162_v29 = vpop.permute.xlu1 %2161 }
 0x309   : > { %v2092_v41 = vrot.slane %v2077_v28, %v4138_v45 }
 0x30a   : > { %v1941_v47 = vmul.f32 %v1939_v0, %v1926_v22  ;;  %v2001_v5 = vmul.f32 %v1998_v53, %v1963_v3  ;;  %v2048_v7 = vmul.f32 %v2045_v19, %v4120_v17  ;;  %v2051_v54 = vmul.f32 %v2045_v19, %v2017_v18 }
 0x30b   : > { %v2004_v1 = vmul.f32 %v1998_v53, %v1968_v11  ;;  %v2142_v30 = vmul.f32 %v2139_v50, %v4122_v16  ;;  %v2098_v25 = vmul.f32 %v2092_v41, %v2064_v59  ;;  %v2095_v0 = vmul.f32 %v2092_v41, %v2060_v49 }
 0x30c   : > { %v1956_v26 = vadd.f32 %v1954_v15, %v1941_v47  ;;  %v2054_v10 = vadd.f32 %v2048_v7, %v2001_v5  ;;  %v2111_v20 = vpop.permute.xlu0 %2110 }
 0x30d   : > { %v2057_v51 = vadd.f32 %v2051_v54, %v2004_v1  ;;  %v2145_v43 = vmul.f32 %v2139_v50, %v2111_v20 }
 0x30e   : > { %v1975_v6 = vrot.slane %v1956_v26, %v4126_v2  ;;  %v1979_v40 = vrot.slane %v1956_v26, %v4146_v57  ;;  %v2022_v63 = vrot.slane %v1956_v26, %v4130_v12  ;;  %v2026_v23 = vrot.slane %v1956_v26, %v4151_v32 }
 0x30f   : > { %v2116_v35 = vrot.slane %v1956_v26, %v4133_v62  ;;  %v2120_v55 = vrot.slane %v1956_v26, %v4155_v46  ;;  %v2069_v52 = vrot.slane %v1956_v26, %v4138_v45  ;;  %v2073_v34 = vrot.slane %v1956_v26, %v4158_v31 }
 0x310   : > { %v1990_v39 = vrot.slane %v1975_v6, %v4126_v2  ;;  %v1994_v13 = vrot.slane %v1979_v40, %v4126_v2  ;;  %v2037_v58 = vrot.slane %v2022_v63, %v4130_v12  ;;  %v2041_v61 = vrot.slane %v2026_v23, %v4130_v12  ;;  %v4183_v63 = vpop.permute.xlu1 %2203 }
 0x311   : > { %v2131_v44 = vrot.slane %v2116_v35, %v4133_v62  ;;  %v2135_v14 = vrot.slane %v2120_v55, %v4133_v62  ;;  %v2084_v24 = vrot.slane %v2069_v52, %v4138_v45  ;;  %v2088_v21 = vrot.slane %v2073_v34, %v4138_v45 }
 0x312   : > { %v1999_v27 = vmul.f32 %v1990_v39, %v1963_v3  ;;  %v2000_v60 = vmul.f32 %v1994_v13, %v1963_v3  ;;  %v2046_v8 = vmul.f32 %v2037_v58, %v4120_v17  ;;  %v2047_v4 = vmul.f32 %v2041_v61, %v4120_v17 }
 0x313   : > { %v2049_v9 = vmul.f32 %v2037_v58, %v2017_v18  ;;  %v2140_v37 = vmul.f32 %v2131_v44, %v4122_v16  ;;  %v2050_v38 = vmul.f32 %v2041_v61, %v2017_v18  ;;  %v2093_v42 = vmul.f32 %v2084_v24, %v2060_v49 }
 0x314   : > { %v2052_v15 = vadd.f32 %v2046_v8, %v1999_v27  ;;  %v2053_v36 = vadd.f32 %v2047_v4, %v2000_v60  ;;  %v2094_v56 = vmul.f32 %v2088_v21, %v2060_v49  ;;  %v2101_v48 = vadd.f32 %v2095_v0, %v2054_v10  ;;  %v2248_v58 = vpop.permute.xlu1 %2247 }
 0x315   : > { %v2002_v22 = vmul.f32 %v1990_v39, %v1968_v11  ;;  %v2141_v3 = vmul.f32 %v2135_v14, %v4122_v16  ;;  %v2096_v53 = vmul.f32 %v2084_v24, %v2064_v59  ;;  %v2003_v19 = vmul.f32 %v1994_v13, %v1968_v11 }
 0x316   : > { %v2104_v28 = vadd.f32 %v2098_v25, %v2057_v51  ;;  %v2099_v17 = vadd.f32 %v2093_v42, %v2052_v15  ;;  %v2100_v47 = vadd.f32 %v2094_v56, %v2053_v36  ;;  %v2148_v5 = vadd.f32 %v2142_v30, %v2101_v48 }
 0x317   : > { %v2055_v7 = vadd.f32 %v2049_v9, %v2002_v22  ;;  %v2097_v50 = vmul.f32 %v2088_v21, %v2064_v59  ;;  %v2056_v54 = vadd.f32 %v2050_v38, %v2003_v19  ;;  %v2143_v10 = vmul.f32 %v2131_v44, %v2111_v20 }
 0x318   : > { %v2151_v1 = vadd.f32 %v2145_v43, %v2104_v28  ;;  %v2146_v26 = vadd.f32 %v2140_v37, %v2099_v17  ;;  %v2147_v41 = vadd.f32 %v2141_v3, %v2100_v47  ;;  %v2166_v18 = vadd.f32 %v4135_v33, %v2148_v5 }
 0x319   : > { %v2102_v6 = vadd.f32 %v2096_v53, %v2055_v7  ;;  %v2103_v49 = vadd.f32 %v2097_v50, %v2056_v54  ;;  %v2144_v40 = vmul.f32 %v2135_v14, %v2111_v20  ;;  %v2270_v20 = vpop.permute.xlu1 %2269 }
 0x31a   : > { %v2164_v16 = vadd.f32 %v4135_v33, %v2146_v26  ;;  %v2165_v11 = vadd.f32 %v4135_v33, %v2147_v41  ;;  %v2178_v51 = vmul.f32 0.70710677, %v2166_v18  ;;  %v2169_v30 = vadd.f32 %v2162_v29, %v2151_v1 }
 0x31b   : > { %v2149_v23 = vadd.f32 %v2143_v10, %v2102_v6  ;;  %v2150_v35 = vadd.f32 %v2144_v40, %v2103_v49  ;;  %v2172_v8 = vmul.f32 0.5, %v2166_v18 }
 0x31c   : > { %v2176_v55 = vmul.f32 0.70710677, %v2164_v16  ;;  %v2177_v59 = vmul.f32 0.70710677, %v2165_v11  ;;  %2962 = verf.f32 %v2178_v51  ;;  %v2181_v39 = vmul.f32 0.70710677, %v2169_v30 }
 0x31d   : > { %v2167_v52 = vadd.f32 %v2162_v29, %v2149_v23  ;;  %v2168_v34 = vadd.f32 %v2162_v29, %v2150_v35  ;;  %v4187_v27 = vpop.permute.xlu1 %2313  ;;  %v2170_v60 = vmul.f32 0.5, %v2164_v16  ;;  %v2171_v25 = vmul.f32 0.5, %v2165_v11 }
 0x31e   : > { %2964 = verf.f32 %v2176_v55  ;;  %v2175_v3 = vmul.f32 0.5, %v2169_v30 }
 0x31f   : > { %2966 = verf.f32 %v2177_v59  ;;  %v2179_v13 = vmul.f32 0.70710677, %v2167_v52  ;;  %v2180_v61 = vmul.f32 0.70710677, %v2168_v34  ;;  %v2173_v47 = vmul.f32 0.5, %v2167_v52  ;;  %v2226_v59 = vpop.permute.xlu0 %2225 }
 0x320   : > { %2968 = verf.f32 %v2181_v39  ;;  %v2174_v5 = vmul.f32 0.5, %v2168_v34 }
 0x321   : > { %2970 = verf.f32 %v2179_v13  ;;  %v4195_v29 = vpop.permute.xlu1 %2335 }
 0x322   : > { %2972 = verf.f32 %v2180_v61 }
 0x325   : > { %v2380_v6 = vpop.permute.xlu1 %2379 }
 0x329   : > { %v2963_v33 = vpop.eup %2962 }
 0x32a   : > { %v2190_v14 = vadd.f32 1.0, %v2963_v33 }
 0x32b   : > { %v2965_v44 = vpop.eup %2964 }
 0x32c   : > { %v2967_v24 = vpop.eup %2966  ;;  %v2188_v21 = vadd.f32 1.0, %v2965_v44  ;;  %v4191_v43 = vmul.f32 %v2190_v14, %v2172_v8  ;;  %v2402_v8 = vpop.permute.xlu1 %2401 }
 0x32d   : > { %v2189_v4 = vadd.f32 1.0, %v2967_v24  ;;  %v2969_v9 = vpop.eup %2968 }
 0x32e   : > { %v4189_v0 = vmul.f32 %v2188_v21, %v2170_v60  ;;  %v2971_v15 = vpop.eup %2970  ;;  %v2193_v38 = vadd.f32 1.0, %v2969_v9  ;;  %v2261_v56 = vrot.slane %v4191_v43, %v4138_v45  ;;  %v2283_v22 = vrot.slane %v4191_v43, %v4133_v62 }
 0x32f   : > { %v2973_v36 = vpop.eup %2972  ;;  %v4193_v37 = vmul.f32 %v2189_v4, %v2171_v25  ;;  %v2191_v53 = vadd.f32 1.0, %v2971_v15  ;;  %v2217_v11 = vrot.slane %v4191_v43, %v4126_v2  ;;  %v2239_v39 = vrot.slane %v4191_v43, %v4130_v12 }
 0x330   : > { %v2253_v42 = vrot.slane %v4189_v0, %v4138_v45  ;;  %v2275_v48 = vrot.slane %v4189_v0, %v4133_v62  ;;  %v2192_v19 = vadd.f32 1.0, %v2973_v36  ;;  %v4209_v7 = vmul.f32 %v2193_v38, %v2175_v3  ;;  %v2292_v3 = vpop.permute.xlu0 %2291 }
 0x331   : > { %v2257_v28 = vrot.slane %v4193_v37, %v4138_v45  ;;  %v2279_v17 = vrot.slane %v4193_v37, %v4133_v62  ;;  %v2264_v54 = vmul.f32 %v2261_v56, %v2248_v58  ;;  %v2286_v26 = vmul.f32 %v2283_v22, %v2270_v20 }
 0x332   : > { %v2262_v50 = vmul.f32 %v2253_v42, %v2248_v58  ;;  %v2284_v1 = vmul.f32 %v2275_v48, %v2270_v20  ;;  %v4211_v41 = vmul.f32 %v2191_v53, %v2173_v47  ;;  %v4213_v18 = vmul.f32 %v2192_v19, %v2174_v5 }
 0x333   : > { %v2209_v49 = vrot.slane %v4189_v0, %v4126_v2  ;;  %v2213_v10 = vrot.slane %v4193_v37, %v4126_v2  ;;  %v2263_v40 = vmul.f32 %v2257_v28, %v2248_v58  ;;  %v2285_v16 = vmul.f32 %v2279_v17, %v2270_v20 }
 0x334   : > { %v2231_v51 = vrot.slane %v4189_v0, %v4130_v12  ;;  %v2319_v30 = vrot.slane %v4189_v0, %v4151_v32  ;;  %v2323_v23 = vrot.slane %v4193_v37, %v4151_v32  ;;  %v2220_v52 = vmul.f32 %v2217_v11, %v4183_v63 }
 0x335   : > { %v2218_v35 = vmul.f32 %v2209_v49, %v4183_v63  ;;  %v2219_v55 = vmul.f32 %v2213_v10, %v4183_v63  ;;  %v2235_v34 = vrot.slane %v4193_v37, %v4130_v12  ;;  %v2327_v58 = vrot.slane %v4191_v43, %v4151_v32 }
 0x336   : > { %v2240_v13 = vmul.f32 %v2231_v51, %v2226_v59  ;;  %v2341_v61 = vrot.slane %v4189_v0, %v4158_v31  ;;  %v2345_v20 = vrot.slane %v4193_v37, %v4158_v31  ;;  %v2349_v33 = vrot.slane %v4191_v43, %v4158_v31 }
 0x337   : > { %v2241_v63 = vmul.f32 %v2235_v34, %v2226_v59  ;;  %v2242_v44 = vmul.f32 %v2239_v39, %v2226_v59  ;;  %v2297_v24 = vrot.slane %v4189_v0, %v4146_v57  ;;  %v2328_v21 = vmul.f32 %v2319_v30, %v4187_v27 }
 0x338   : > { %v2243_v14 = vadd.f32 %v2240_v13, %v2218_v35  ;;  %v2329_v60 = vmul.f32 %v2323_v23, %v4187_v27  ;;  %v2301_v4 = vrot.slane %v4193_v37, %v4146_v57  ;;  %v2305_v9 = vrot.slane %v4191_v43, %v4146_v57 }
 0x339   : > { %v2385_v25 = vrot.slane %v4211_v41, %v4126_v2  ;;  %v2244_v15 = vadd.f32 %v2241_v63, %v2219_v55  ;;  %v2245_v36 = vadd.f32 %v2242_v44, %v2220_v52  ;;  %v2330_v42 = vmul.f32 %v2327_v58, %v4187_v27  ;;  %v2358_v52 = vpop.permute.xlu0 %2357 }
 0x33a   : > { %v2265_v38 = vadd.f32 %v2262_v50, %v2243_v14  ;;  %v2350_v56 = vmul.f32 %v2341_v61, %v4195_v29  ;;  %v2351_v48 = vmul.f32 %v2345_v20, %v4195_v29  ;;  %v2389_v22 = vrot.slane %v4213_v18, %v4126_v2 }
 0x33b   : > { %v2266_v53 = vadd.f32 %v2263_v40, %v2244_v15  ;;  %v2267_v19 = vadd.f32 %v2264_v54, %v2245_v36  ;;  %v2306_v17 = vmul.f32 %v2297_v24, %v2292_v3  ;;  %v2393_v47 = vrot.slane %v4209_v7, %v4126_v2  ;;  %v2446_v54 = vpop.permute.xlu1 %2445 }
 0x33c   : > { %v2287_v28 = vadd.f32 %v2284_v1, %v2265_v38  ;;  %v2407_v5 = vrot.slane %v4211_v41, %v4130_v12  ;;  %v2307_v50 = vmul.f32 %v2301_v4, %v2292_v3  ;;  %v2308_v27 = vmul.f32 %v2305_v9, %v2292_v3 }
 0x33d   : > { %v2288_v49 = vadd.f32 %v2285_v16, %v2266_v53  ;;  %v2289_v10 = vadd.f32 %v2286_v26, %v2267_v19  ;;  %v2363_v51 = vrot.slane %v4189_v0, %v4155_v46  ;;  %v2352_v30 = vmul.f32 %v2349_v33, %v4195_v29 }
 0x33e   : > { %v2309_v11 = vadd.f32 %v2306_v17, %v2287_v28  ;;  %v2394_v40 = vmul.f32 %v2385_v25, %v2380_v6  ;;  %v2367_v1 = vrot.slane %v4193_v37, %v4155_v46  ;;  %v2371_v2 = vrot.slane %v4191_v43, %v4155_v46 }
 0x33f   : > { %v2395_v23 = vmul.f32 %v2389_v22, %v2380_v6  ;;  %v2310_v35 = vadd.f32 %v2307_v50, %v2288_v49  ;;  %v2311_v55 = vadd.f32 %v2308_v27, %v2289_v10  ;;  %v2396_v16 = vmul.f32 %v2393_v47, %v2380_v6  ;;  %v2468_v24 = vpop.permute.xlu1 %2467 }
 0x340   : > { %v2331_v59 = vadd.f32 %v2328_v21, %v2309_v11  ;;  %v2411_v26 = vrot.slane %v4213_v18, %v4130_v12  ;;  %v2415_v0 = vrot.slane %v4209_v7, %v4130_v12  ;;  %v2416_v29 = vmul.f32 %v2407_v5, %v2402_v8 }
 0x341   : > { %v2332_v34 = vadd.f32 %v2329_v60, %v2310_v35  ;;  %v2333_v39 = vadd.f32 %v2330_v42, %v2311_v55  ;;  %v2372_v37 = vmul.f32 %v2363_v51, %v2358_v52  ;;  %v2451_v43 = vrot.slane %v4211_v41, %v4133_v62 }
 0x342   : > { %v2353_v13 = vadd.f32 %v2350_v56, %v2331_v59  ;;  %v2455_v58 = vrot.slane %v4213_v18, %v4133_v62  ;;  %v2373_v61 = vmul.f32 %v2367_v1, %v2358_v52  ;;  %v2374_v6 = vmul.f32 %v2371_v2, %v2358_v52 }
 0x343   : > { %v2354_v20 = vadd.f32 %v2351_v48, %v2332_v34  ;;  %v2355_v33 = vadd.f32 %v2352_v30, %v2333_v39  ;;  %v2429_v12 = vrot.slane %v4211_v41, %v4138_v45  ;;  %v2417_v44 = vmul.f32 %v2411_v26, %v2402_v8  ;;  %v2512_v10 = vpop.permute.xlu1 %2511 }
 0x344   : > { %v2375_v63 = vadd.f32 %v2372_v37, %v2353_v13  ;;  %v2459_v14 = vrot.slane %v4209_v7, %v4133_v62  ;;  %v2433_v21 = vrot.slane %v4213_v18, %v4138_v45  ;;  %v2437_v60 = vrot.slane %v4209_v7, %v4138_v45  ;;  %v2424_v62 = vpop.permute.xlu0 %2423 }
 0x345   : > { %v2418_v4 = vmul.f32 %v2415_v0, %v2402_v8  ;;  %v2376_v9 = vadd.f32 %v2373_v61, %v2354_v20  ;;  %v2377_v25 = vadd.f32 %v2374_v6, %v2355_v33  ;;  %v2460_v36 = vmul.f32 %v2451_v43, %v2446_v54 }
 0x346   : > { %v2397_v15 = vadd.f32 %v2394_v40, %v2375_v63  ;;  %v2461_v38 = vmul.f32 %v2455_v58, %v2446_v54  ;;  %v2473_v42 = vrot.slane %v4211_v41, %v4146_v57  ;;  %v2477_v56 = vrot.slane %v4213_v18, %v4146_v57 }
 0x347   : > { %v2398_v48 = vadd.f32 %v2395_v23, %v2376_v9  ;;  %v2399_v22 = vadd.f32 %v2396_v16, %v2377_v25  ;;  %v2438_v53 = vmul.f32 %v2429_v12, %v2424_v62  ;;  %v2462_v19 = vmul.f32 %v2459_v14, %v2446_v54  ;;  %v2534_v58 = vpop.permute.xlu1 %2533 }
 0x348   : > { %v2419_v3 = vadd.f32 %v2416_v29, %v2397_v15  ;;  %v2481_v45 = vrot.slane %v4209_v7, %v4146_v57  ;;  %v2439_v8 = vmul.f32 %v2433_v21, %v2424_v62  ;;  %v2440_v28 = vmul.f32 %v2437_v60, %v2424_v62  ;;  %v2490_v55 = vpop.permute.xlu0 %2489 }
 0x349   : > { %v2420_v17 = vadd.f32 %v2417_v44, %v2398_v48  ;;  %v2421_v47 = vadd.f32 %v2418_v4, %v2399_v22  ;;  %v2495_v50 = vrot.slane %v4211_v41, %v4151_v32  ;;  %v2482_v27 = vmul.f32 %v2473_v42, %v2468_v24 }
 0x34a   : > { %v2441_v5 = vadd.f32 %v2438_v53, %v2419_v3  ;;  %v2483_v49 = vmul.f32 %v2477_v56, %v2468_v24  ;;  %v2517_v11 = vrot.slane %v4211_v41, %v4158_v31  ;;  %v2499_v51 = vrot.slane %v4213_v18, %v4151_v32 }
 0x34b   : > { %v2442_v30 = vadd.f32 %v2439_v8, %v2420_v17  ;;  %v2443_v40 = vadd.f32 %v2440_v28, %v2421_v47  ;;  %v2503_v54 = vrot.slane %v4209_v7, %v4151_v32  ;;  %v2484_v1 = vmul.f32 %v2481_v45, %v2468_v24 }
 0x34c   : > { %v2463_v57 = vadd.f32 %v2460_v36, %v2441_v5  ;;  %v2521_v2 = vrot.slane %v4213_v18, %v4158_v31  ;;  %v2525_v23 = vrot.slane %v4209_v7, %v4158_v31  ;;  %v2539_v35 = vrot.slane %v4211_v41, %v4155_v46 }
 0x34d   : > { %v2464_v59 = vadd.f32 %v2461_v38, %v2442_v30  ;;  %v2465_v16 = vadd.f32 %v2462_v19, %v2443_v40  ;;  %v2504_v0 = vmul.f32 %v2495_v50, %v2490_v55  ;;  %v2526_v29 = vmul.f32 %v2517_v11, %v2512_v10 }
 0x34e   : > { %v2485_v26 = vadd.f32 %v2482_v27, %v2463_v57  ;;  %v2543_v32 = vrot.slane %v4213_v18, %v4155_v46  ;;  %v2547_v52 = vrot.slane %v4209_v7, %v4155_v46  ;;  %v2505_v34 = vmul.f32 %v2499_v51, %v2490_v55  ;;  %v2558_v7 = vpop.permute.xlu0 %2557 }
 0x34f   : > { %v2486_v39 = vadd.f32 %v2483_v49, %v2464_v59  ;;  %v2487_v31 = vadd.f32 %v2484_v1, %v2465_v16  ;;  %v2506_v13 = vmul.f32 %v2503_v54, %v2490_v55  ;;  %v2527_v41 = vmul.f32 %v2521_v2, %v2512_v10 }
 0x350   : > { %v2507_v37 = vadd.f32 %v2504_v0, %v2485_v26  ;;  %v2528_v43 = vmul.f32 %v2525_v23, %v2512_v10  ;;  %v2548_v61 = vmul.f32 %v2539_v35, %v2534_v58  ;;  %v2549_v63 = vmul.f32 %v2543_v32, %v2534_v58 }
 0x351   : > { %v2508_v6 = vadd.f32 %v2505_v34, %v2486_v39  ;;  %v2509_v20 = vadd.f32 %v2506_v13, %v2487_v31  ;;  %v2550_v18 = vmul.f32 %v2547_v52, %v2534_v58 }
 0x352   : > { %v2529_v33 = vadd.f32 %v2526_v29, %v2507_v37 }
 0x353   : > { %v2530_v12 = vadd.f32 %v2527_v41, %v2508_v6  ;;  %v2531_v44 = vadd.f32 %v2528_v43, %v2509_v20 }
 0x354   : > { %v2551_v46 = vadd.f32 %v2548_v61, %v2529_v33 }
 0x355   : > { %v2552_v14 = vadd.f32 %v2549_v63, %v2530_v12  ;;  %v2553_v24 = vadd.f32 %v2550_v18, %v2531_v44 }
 0x356   : > { %v2560_v21 = vadd.f32 %v2558_v7, %v2551_v46 }
 0x357   : > { %v2562_v60 = vadd.f32 %v2558_v7, %v2553_v24  ;;  %v2561_v4 = vadd.f32 %v2558_v7, %v2552_v14 }
 0x358   : > { %2563 = vst.msk [vmem:[%s4311_s24] sm:$0xff] %vm1520_vm4, %v2560_v21 }
 0x359   : > { %2621 = vrot.lane.b32.xlu1 %v2562_v60, %s3126_s17  ;;  %2616 = vrot.lane.b32.xlu0 %v2562_v60, %s3120_s23  ;;  %s3150_s17 = smov 92  }
 0x35d   : > { %2625 = vrot.lane.b32.xlu1 %v2562_v60, %s3144_s27  ;;  %2605 = vrot.lane.b32.xlu0 %v2561_v4, %s3145_s21  ;;  %s3151_s27 = smov 86  }
 0x361   : > { %2629 = vrot.lane.b32.xlu1 %v2562_v60, %s3146_s28  ;;  %2609 = vrot.lane.b32.xlu0 %v2561_v4, %s3147_s25  ;;  %s3152_s25 = smov 110  }
 0x365   : > { %2601 = vrot.lane.b32.xlu1 %v2561_v4, %s3099_s14  ;;  %2580 = vrot.lane.b32.xlu0 %v2560_v21, %s3079_s16  ;;  %s4431_s14 = smov 38   ;;  %s2652_s16 = sshll.u32 %s4311_s24, 4  ;;  %s4343_s16 = int_to_ptr.vmem [resolvable:$true] %s2652_s16 }
 0x369   : > { %2565 = vrot.lane.b32.xlu1 %v2560_v21, %s3074_s29  ;;  %2585 = vrot.lane.b32.xlu0 %v2560_v21, %s3148_s22  ;;  %s2724_s29 = sshll.u32 %s3225_s13, 8  ;;  %s4432_s13 = sand.u32 1, %s3026_s10  }
 0x36a   : > { %s4341_s21 = scalar_lea.hbm %s4396_s9, %s2724_s29  ;;  %s2638_s28 = scalar_lea.sflag [#allocation4], %s4432_s13 }
 0x36b   : > { %s2974_s22 = scalar_lea.vmem %s4343_s16, 256 }
 0x36c   : > { %p2975_p11 = scmp.ne.s32.totalorder %s4343_s16, %s2974_s22 }
 0x36d   : > { %2570 = vrot.lane.b32.xlu1 %v2560_v21, %s3149_s26  ;;  %2591 = vrot.lane.b32.xlu0 %v2561_v4, %s3150_s17  ;;  %s3153_s17 = smov [#allocation3]  }
 0x36e   : > { %p2976_p12 = pnand %p2975_p11, %p3242_p5 }
 0x370   : > { %p2977_p13 = pneg %p2976_p12 }
 0x371   : > { %2614 = vrot.lane.b32.xlu1 %v2561_v4, %s3120_s23  ;;  %2596 = vrot.lane.b32.xlu0 %v2561_v4, %s3151_s27  ;;  %s2978_s27 = sshll.u32 %s3153_s17, 4  ;;  %s2979_s27 = int_to_ptr.vmem [resolvable:$false] %s2978_s27 }
 0x372   : > { %p2981_p0 = scmp.lt.s32.totalorder %s4343_s16, %s2979_s27 }
 0x375   : > { %2575 = vrot.lane.b32.xlu1 %v2560_v21, %s3152_s25  ;;  %s2980_s25 = scalar_lea.vmem %s2979_s27, 512 }
 0x376   : > { %p2982_p1 = scmp.lt.s32.totalorder %s2980_s25, %s2974_s22 }
 0x378   : > { %p2983_p2 = por %p2982_p1, %p2981_p0 }
 0x379   : > { %2633 = vrot.lane.b32.xlu1 %v2562_v60, %s4431_s14 }
 0x37a   : > { %p2984_p3 = pnand %p2983_p2, %p2977_p13 }
 0x3cb   : > { %v2622_v9 = vpop.permute.xlu1 %2621  ;;  %v2617_v25 = vpop.permute.xlu0 %2616 }
 0x3cf   : > { %v2626_v15 = vpop.permute.xlu1 %2625  ;;  %v2606_v36 = vpop.permute.xlu0 %2605 }
 0x3d3   : > { %v2630_v38 = vpop.permute.xlu1 %2629  ;;  %v2610_v42 = vpop.permute.xlu0 %2609 }
 0x3d7   : > { %v2602_v56 = vpop.permute.xlu1 %2601  ;;  %v2581_v62 = vpop.permute.xlu0 %2580 }
 0x3d8   : > { %2604 = vst.msk [vmem:[%s4311_s24 + $0x8] sm:$0xff] %vm1520_vm4, %v2602_v56  ;;  %vm2599_vm4 = vcmask 1048448  }
 0x3d9   : > { %2608 = vst.msk [vmem:[%s4311_s24 + $0x8] sm:$0xff] %vm2568_vm0, %v2606_v36 }
 0x3da   : > { %2612 = vst.msk [vmem:[%s4311_s24 + $0x8] sm:$0xff] %vm2573_vm14, %v2610_v42 }
 0x3db   : > { %v2566_v48 = vpop.permute.xlu1 %2565  ;;  %v2586_v22 = vpop.permute.xlu0 %2585 }
 0x3dc   : > { %2569 = vst.msk [vmem:[%s4311_s24] sm:$0xff] %vm2568_vm0, %v2566_v48 }
 0x3df   : > { %v2571_v3 = vpop.permute.xlu1 %2570  ;;  %v2592_v45 = vpop.permute.xlu0 %2591 }
 0x3e0   : > { %2574 = vst.msk [vmem:[%s4311_s24] sm:$0xff] %vm2573_vm14, %v2571_v3 }
 0x3e3   : > { %v2615_v53 = vpop.permute.xlu1 %2614  ;;  %v2597_v28 = vpop.permute.xlu0 %2596 }
 0x3e4   : > { %v2618_v19 = vsel %vm1056_vm13, %v2615_v53, %v2617_v25 }
 0x3e5   : > { %2620 = vst.msk [vmem:[%s4311_s24 + $0x8] sm:$0xff] %vm2578_vm15, %v2618_v19 }
 0x3e6   : > { %2624 = vst.msk [vmem:[%s4311_s24 + $0x8] sm:$0xff] %vm2583_vm1, %v2622_v9 }
 0x3e7   : > { %v2576_v8 = vpop.permute.xlu1 %2575  ;;  %2628 = vst.msk [vmem:[%s4311_s24 + $0x8] sm:$0xff] %vm2588_vm2, %v2626_v15 }
 0x3e8   : > { %2579 = vst.msk [vmem:[%s4311_s24] sm:$0xff] %vm2578_vm15, %v2576_v8 }
 0x3e9   : > { %2632 = vst.msk [vmem:[%s4311_s24 + $0x8] sm:$0xff] %vm2594_vm3, %v2630_v38 }
 0x3ea   : > { %2584 = vst.msk [vmem:[%s4311_s24] sm:$0xff] %vm2583_vm1, %v2581_v62 }
 0x3eb   : > { %2589 = vst.msk [vmem:[%s4311_s24] sm:$0xff] %vm2588_vm2, %v2586_v22  ;;  %v2634_v17 = vpop.permute.xlu1 %2633 }
 0x3ec   : > { %2595 = vst.msk [vmem:[%s4311_s24] sm:$0xff] %vm2594_vm3, %v2592_v45 }
 0x3ed   : > { %2636 = vst.msk [vmem:[%s4311_s24 + $0x8] sm:$0xff] %vm2599_vm4, %v2634_v17  ;;  %2600 = vst.msk [vmem:[%s4311_s24] sm:$0xff] %vm2599_vm4, %v2597_v28 }
 0x3ee   : > { %2987 = shalt.err (!%p2984_p3)
}
 0x3ef   : > { %s2988_s24 = scalar_lea.hbm %s4341_s21, 256  ;;  %s2992_s23 = scalar_lea.hbm %s4396_s9, 512 }
 0x3f0   : > { %p2989_p4 = scmp.ne.s32.totalorder %s4341_s21, %s2988_s24  ;;  %p2993_p9 = scmp.lt.s32.totalorder %s4341_s21, %s4396_s9 }
 0x3f1   : > { %p2994_p10 = scmp.lt.s32.totalorder %s2992_s23, %s2988_s24 }
 0x3f2   : > { %p2990_p7 = pnand %p2989_p4, %p3242_p5 }
 0x3f3   : > { %p2995_p11 = por %p2994_p10, %p2993_p9 }
 0x3f4   : > { %p2991_p8 = pneg %p2990_p7 }
 0x3f6   : > { %p2996_p12 = pnand %p2995_p11, %p2991_p8 }
 0x3f8   : > { %2999 = shalt.err (!%p2996_p12)
}
 0x3f9   : > { %2725 = dma.vmem_to_hbm [thread:$0]  (%p3242_p5), %s4343_s16, 256, %s4341_s21, %s2638_s28  }
 0x3fa PF: > { %p2731_p13 = scmp.ge.s32.totalorder %s3034_s12, 2  ;;  %s2664_s22 = sand.u32 1, %s3022_s30  }
 0x3fb   : > { %s2665_s17 = scalar_lea.sflag [#allocation4], %s2664_s22 }
 0x3fc   : > { %p2728_p0 = pnand %p2731_p13, %p3246_p6 }
 0x3fe   : > { %p2729_p1 = pneg %p2728_p0 }
 0x400   : > { %3017 = dma.done.wait (%p2729_p1), %s2665_s17, 256  }
 0x401   : > { %3019 = vsyncadd (%p2729_p1), %s2665_s17, 4294967040  ;;  %p19_p2 = scmp.ge.s32.totalorder %s3229_s15, 4   ;;  %s4433_s30 = smov %s3026_s10 }
 0x402   : > { %s4434_s10 = smov %s3030_s11  ;;  %s4435_s11 = smov %s3240_s18 }
 0x403   : > { %s4436_s12 = smov %s3229_s15  ;;  %21 = sbr.rel (!%p19_p2) target bundleno = 3 (0x3), region = 91 }
 0x408   :  { %2670 = vsyncpa [#allocation4], 1 }
 0x409   :  { %2672 = vsyncpa [#allocation4 + $0x1], 1 }

</bundles_post_ra>
